<compile_context>
chip_gen: v5e
topology: v5e:2x2
jax: 0.10.0
libtpu: 0.0.40
codegen_flags: <defaults>
</compile_context>

<pallas_src>
import numpy as np
import jax
import jax.numpy as jnp
from jax.experimental import pallas as pl
from jax.experimental.pallas import tpu as pltpu

# ---------------------------------------------------------------------------
# Layout constants
# ---------------------------------------------------------------------------
C1, C2 = 8, 16          # conv channel counts
NTAP = 25               # 5x5 taps
H1, W1P = 28, 32        # conv1 output rows, padded row width (lanes)
L1 = H1 * W1P           # 896  : conv1 activation flat length
XLEN = (H1 + 5) * W1P   # 1056 : pre-padded input flat length (33 rows x 32)
M1LEN = 863             # pool1 window-max map length (max selected idx 858; 33+863<=896)
H2, W2P = 14, 18        # conv2 output rows, padded row width
L2C = 19 * W2P          # 342  : conv2 input (padded pooled) flat length (18x18 + slack)
L2 = H2 * W2P           # 252  : conv2 activation flat length
M2LEN = 229             # pool2 window-max map length (max selected idx 228; 19+229<=252)
NPIX = 49               # 7*7 pooled pixels per channel
NH = 128                # fc hidden / padded logits width
NOUT = 10


# ---------------------------------------------------------------------------
# Fused forward kernel: one image per grid step
# ---------------------------------------------------------------------------
def _fmnist_kernel(x_ref, w1_ref, b1_ref, s1_ref, w2_ref, b2_ref, s2_ref,
                   wf1_ref, bf1_ref, wf2_ref, bf2_ref, out_ref,
                   a1_ref, c2_ref, p2_ref, a2_ref):
    # x_ref:  [1, 1, 1056]   zero-padded 33x32 input image, flattened
    # w1_ref: [8, 25]        conv1 weights (tap minor)
    # b1_ref: [8, 1]
    # s1_ref: [863, 342]     pool1 stride-2 compaction + conv2-input re-pad (0/1)
    # w2_ref: [16, 200]      conv2 weights, column = tap*8 + cin
    # b2_ref: [16, 1]
    # s2_ref: [229, 49]      pool2 stride-2 compaction (0/1)
    # wf1_ref:[16, 49, 128]  fc1 weights grouped by input channel (torch .view order)
    # bf1_ref:[1, 128]
    # wf2_ref:[128, 128]     fc2 weights padded 10 -> 128 output columns
    # bf2_ref:[1, 128]
    # out_ref:[1, 1, 128]    padded logits (first 10 valid)
    # scratch: a1 [8,896], c2 [8,342], p2 [200,252], a2 [16,252]
    f32 = jnp.float32

    # ---- conv1 (1->8, 5x5, pad 2): 25 shift-FMAs, accumulator stays in vregs ----
    w1 = w1_ref[...]                                        # [8, 25]
    acc1 = jnp.zeros((C1, L1), f32)
    for tap in range(NTAP):
        ki, kj = divmod(tap, 5)
        xs = x_ref[0, :, pl.ds(ki * W1P + kj, L1)]          # [1, 896] shifted view
        acc1 = acc1 + w1[:, tap:tap + 1] * xs               # [8,1]*[1,896] -> [8,896]
    a1_ref[...] = jnp.maximum(acc1 + b1_ref[...], 0.0)      # bias + ReLU, single store

    # ---- maxpool1 2x2/2 + re-pad for conv2: 4 shifted loads + one selection matmul ----
    m1 = jnp.maximum(
        jnp.maximum(a1_ref[:, pl.ds(0, M1LEN)], a1_ref[:, pl.ds(1, M1LEN)]),
        jnp.maximum(a1_ref[:, pl.ds(W1P, M1LEN)], a1_ref[:, pl.ds(W1P + 1, M1LEN)]))
    c2_ref[...] = jnp.dot(m1, s1_ref[...], preferred_element_type=f32)   # [8, 342]

    # ---- conv2 (8->16, 5x5, pad 2): im2col (25 block copies) + ONE MXU matmul ----
    for tap in range(NTAP):
        ki, kj = divmod(tap, 5)
        p2_ref[tap * C1:(tap + 1) * C1, :] = c2_ref[:, pl.ds(ki * W2P + kj, L2)]
    z2 = jnp.dot(w2_ref[...], p2_ref[...], preferred_element_type=f32)   # [16,200]@[200,252]
    a2_ref[...] = jnp.maximum(z2 + b2_ref[...], 0.0)

    # ---- maxpool2 2x2/2 + compaction to [16, 49] ----
    m2 = jnp.maximum(
        jnp.maximum(a2_ref[:, pl.ds(0, M2LEN)], a2_ref[:, pl.ds(1, M2LEN)]),
        jnp.maximum(a2_ref[:, pl.ds(W2P, M2LEN)], a2_ref[:, pl.ds(W2P + 1, M2LEN)]))
    pooled = jnp.dot(m2, s2_ref[...], preferred_element_type=f32)        # [16, 49]

    # ---- fc1 + ReLU + fc2 (flatten-free: per-channel contraction blocks) ----
    h = bf1_ref[...]                                                     # [1, 128]
    for c in range(C2):
        h = h + jnp.dot(pooled[c:c + 1, :], wf1_ref[c],
                        preferred_element_type=f32)                      # [1,49]@[49,128]
    h = jnp.maximum(h, 0.0)
    out = jnp.dot(h, wf2_ref[...], preferred_element_type=f32) + bf2_ref[...]
    out_ref[0] = out                                                     # lane-dense [1,128]


# ---------------------------------------------------------------------------
# Wrapper
# ---------------------------------------------------------------------------
def fmnist_cnn_forward(x, kp):
    """x: [B, 1, 28, 28] float32, kp: prepare_params(...) -> logits [B, 10]."""
    B = x.shape[0]
    # Lane-dense presentation: pad 28x28 -> 33x32 (2 top/left, 3/2 bottom/right), flatten.
    ximg = x.reshape(B, 28, 28)
    xflat = jnp.pad(ximg, ((0, 0), (2, 3), (2, 2))).reshape(B, 1, XLEN)

    flops = 2 * B * (NTAP * C1 * L1 + C1 * M1LEN * L2C + (NTAP * C1) * C2 * L2
                     + C2 * M2LEN * NPIX + C2 * NPIX * NH + NH * NH)
    bytes_accessed = 4 * (B * XLEN + C1 * NTAP + C1 + M1LEN * L2C + C2 * NTAP * C1 + C2
                          + M2LEN * NPIX + C2 * NPIX * NH + NH + NH * NH + NH + B * NH)

    out = pl.pallas_call(
        _fmnist_kernel,
        out_shape=jax.ShapeDtypeStruct((B, 1, NH), jnp.float32),
        grid=(B,),
        in_specs=[
            pl.BlockSpec((1, 1, XLEN), lambda b: (b, 0, 0)),       # image b
            pl.BlockSpec((C1, NTAP), lambda b: (0, 0)),            # w1
            pl.BlockSpec((C1, 1), lambda b: (0, 0)),               # b1
            pl.BlockSpec((M1LEN, L2C), lambda b: (0, 0)),          # pool1 selection
            pl.BlockSpec((C2, NTAP * C1), lambda b: (0, 0)),       # w2
            pl.BlockSpec((C2, 1), lambda b: (0, 0)),               # b2
            pl.BlockSpec((M2LEN, NPIX), lambda b: (0, 0)),         # pool2 selection
            pl.BlockSpec((C2, NPIX, NH), lambda b: (0, 0, 0)),     # fc1 weights
            pl.BlockSpec((1, NH), lambda b: (0, 0)),               # fc1 bias
            pl.BlockSpec((NH, NH), lambda b: (0, 0)),              # fc2 weights (padded)
            pl.BlockSpec((1, NH), lambda b: (0, 0)),               # fc2 bias (padded)
        ],
        out_specs=pl.BlockSpec((1, 1, NH), lambda b: (b, 0, 0)),
        scratch_shapes=[
            pltpu.VMEM((C1, L1), jnp.float32),          # conv1 activation
            pltpu.VMEM((C1, L2C), jnp.float32),         # padded pooled conv2 input
            pltpu.VMEM((NTAP * C1, L2), jnp.float32),   # conv2 im2col patches
            pltpu.VMEM((C2, L2), jnp.float32),          # conv2 activation
        ],
        compiler_params=pltpu.CompilerParams(
            dimension_semantics=("parallel",)),
        cost_estimate=pl.CostEstimate(
            flops=flops, transcendentals=0, bytes_accessed=bytes_accessed),
    )(xflat, kp["w1"], kp["b1"], kp["s1"], kp["w2"], kp["b2"], kp["s2"],
      kp["wf1"], kp["bf1"], kp["wf2"], kp["bf2"])
    return out.reshape(B, NH)[:, :NOUT]


# ---------------------------------------------------------------------------
# One-time parameter re-layout (PyTorch layouts -> kernel layouts)
# ---------------------------------------------------------------------------
def prepare_params(p):
    w1 = p["w1"].reshape(C1, NTAP)                                        # [8, 25]
    b1 = p["b1"].reshape(C1, 1)
    # [co, ci, kh, kw] -> [co, kh, kw, ci] -> [16, 200] (column = tap*8 + ci)
    w2 = jnp.transpose(p["w2"], (0, 2, 3, 1)).reshape(C2, NTAP * C1)
    b2 = p["b2"].reshape(C2, 1)
    wf1 = p["wf1"].T.reshape(C2, NPIX, NH)                                # [16, 49, 128]
    bf1 = p["bf1"].reshape(1, NH)
    wf2 = jnp.pad(p["wf2"].T, ((0, 0), (0, NH - NOUT)))                   # [128, 128]
    bf2 = jnp.pad(p["bf2"].reshape(1, NOUT), ((0, 0), (0, NH - NOUT)))    # [1, 128]

    # Pool1: conv1 flat idx (2Y*32 + 2X) -> conv2-input flat idx ((Y+2)*18 + (X+2))
    s1 = np.zeros((M1LEN, L2C), np.float32)
    for Y in range(14):
        for X in range(14):
            s1[2 * Y * W1P + 2 * X, (Y + 2) * W2P + (X + 2)] = 1.0
    # Pool2: conv2 flat idx (2Y*18 + 2X) -> pooled pixel idx (Y*7 + X)
    s2 = np.zeros((M2LEN, NPIX), np.float32)
    for Y in range(7):
        for X in range(7):
            s2[2 * Y * W2P + 2 * X, Y * 7 + X] = 1.0

    return {"w1": w1, "b1": b1, "w2": w2, "b2": b2,
            "s1": jnp.asarray(s1), "s2": jnp.asarray(s2),
            "wf1": wf1, "bf1": bf1, "wf2": wf2, "bf2": bf2}


# ---------------------------------------------------------------------------
# Deterministic parameter init (PyTorch-style uniform(-1/sqrt(fan_in), ...))
# ---------------------------------------------------------------------------
def init_params(key):
    def uni(k, shape, fan_in):
        bound = 1.0 / np.sqrt(fan_in)
        return jax.random.uniform(k, shape, jnp.float32, -bound, bound)

    ks = jax.random.split(key, 8)
    return {
        "w1": uni(ks[0], (8, 1, 5, 5), 1 * 25),
        "b1": uni(ks[1], (8,), 1 * 25),
        "w2": uni(ks[2], (16, 8, 5, 5), 8 * 25),
        "b2": uni(ks[3], (16,), 8 * 25),
        "wf1": uni(ks[4], (128, 16 * 7 * 7), 16 * 7 * 7),
        "bf1": uni(ks[5], (128,), 16 * 7 * 7),
        "wf2": uni(ks[6], (10, 128), 128),
        "bf2": uni(ks[7], (10,), 128),
    }


# ---------------------------------------------------------------------------
# Pure-JAX reference for validation
# ---------------------------------------------------------------------------
def ref_forward(x, p):
    def conv(x, w, b):
        y = jax.lax.conv_general_dilated(
            x, w, window_strides=(1, 1), padding=((2, 2), (2, 2)),
            dimension_numbers=("NCHW", "OIHW", "NCHW"))
        return jax.nn.relu(y + b[None, :, None, None])

    def pool(x):
        return jax.lax.reduce_window(
            x, -jnp.inf, jax.lax.max, (1, 1, 2, 2), (1, 1, 2, 2), "VALID")

    x = pool(conv(x, p["w1"], p["b1"]))
    x = pool(conv(x, p["w2"], p["b2"]))
    x = x.reshape(x.shape[0], -1)
    x = jax.nn.relu(x @ p["wf1"].T + p["bf1"])
    return x @ p["wf2"].T + p["bf2"]


if __name__ == "__main__":
    key = jax.random.PRNGKey(0)
    kx, kp = jax.random.split(key)
    # FMNIST input: batch=2, 1 channel, 28x28 (fixed by fc1 = 16*7*7)
    x = jax.random.normal(kx, (2, 1, 28, 28), dtype=jnp.float32)
    params = init_params(kp)
    kparams = prepare_params(params)   # once, at init

    fwd = jax.jit(fmnist_cnn_forward)
    out = jax.block_until_ready(fwd(x, kparams))
    ref = jax.block_until_ready(ref_forward(x, params))

    assert out.shape == (2, 10), out.shape
    np.testing.assert_allclose(np.asarray(out), np.asarray(ref), atol=5e-4, rtol=5e-4)
    print("KERNEL_OK")
</pallas_src>

<mosaic_0001>
module attributes {stable_mosaic.version = 11 : i64} {
  func.func @_fmnist_kernel(%arg0: i32, %arg1: memref<1x1x1056xf32, #tpu.memory_space<vmem>>, %arg2: memref<8x25xf32, #tpu.memory_space<vmem>>, %arg3: memref<8x1xf32, #tpu.memory_space<vmem>>, %arg4: memref<863x342xf32, #tpu.memory_space<vmem>>, %arg5: memref<16x200xf32, #tpu.memory_space<vmem>>, %arg6: memref<16x1xf32, #tpu.memory_space<vmem>>, %arg7: memref<229x49xf32, #tpu.memory_space<vmem>>, %arg8: memref<16x49x128xf32, #tpu.memory_space<vmem>>, %arg9: memref<1x128xf32, #tpu.memory_space<vmem>>, %arg10: memref<128x128xf32, #tpu.memory_space<vmem>>, %arg11: memref<1x128xf32, #tpu.memory_space<vmem>>, %arg12: memref<1x1x128xf32, #tpu.memory_space<vmem>>, %arg13: memref<8x896xf32, #tpu.memory_space<vmem>>, %arg14: memref<8x342xf32, #tpu.memory_space<vmem>>, %arg15: memref<200x252xf32, #tpu.memory_space<vmem>>, %arg16: memref<16x252xf32, #tpu.memory_space<vmem>>) attributes {dimension_semantics = [#tpu.dimension_semantics<parallel>], iteration_bounds = array<i64: 2>, scalar_prefetch = 0 : i64, scratch_operands = 4 : i64, tpu.core_type = #tpu.core_type<tc>, window_params = [{transform_indices = @transform_0, window_bounds = array<i64: 1, 1, 1056>}, {pipeline_mode = #tpu.pipeline_mode<synchronous>, transform_indices = @transform_1, window_bounds = array<i64: 8, 25>}, {pipeline_mode = #tpu.pipeline_mode<synchronous>, transform_indices = @transform_2, window_bounds = array<i64: 8, 1>}, {pipeline_mode = #tpu.pipeline_mode<synchronous>, transform_indices = @transform_3, window_bounds = array<i64: 863, 342>}, {pipeline_mode = #tpu.pipeline_mode<synchronous>, transform_indices = @transform_4, window_bounds = array<i64: 16, 200>}, {pipeline_mode = #tpu.pipeline_mode<synchronous>, transform_indices = @transform_5, window_bounds = array<i64: 16, 1>}, {pipeline_mode = #tpu.pipeline_mode<synchronous>, transform_indices = @transform_6, window_bounds = array<i64: 229, 49>}, {pipeline_mode = #tpu.pipeline_mode<synchronous>, transform_indices = @transform_7, window_bounds = array<i64: 16, 49, 128>}, {pipeline_mode = #tpu.pipeline_mode<synchronous>, transform_indices = @transform_8, window_bounds = array<i64: 1, 128>}, {pipeline_mode = #tpu.pipeline_mode<synchronous>, transform_indices = @transform_9, window_bounds = array<i64: 128, 128>}, {pipeline_mode = #tpu.pipeline_mode<synchronous>, transform_indices = @transform_10, window_bounds = array<i64: 1, 128>}, {transform_indices = @transform_11, window_bounds = array<i64: 1, 1, 128>}]} {
    %c0 = arith.constant 0 : index
    %c0_0 = arith.constant 0 : index
    %0 = vector.load %arg2[%c0, %c0_0] : memref<8x25xf32, #tpu.memory_space<vmem>>, vector<8x25xf32>
    %cst = arith.constant 0.000000e+00 : f32
    %1 = vector.broadcast %cst : f32 to vector<8x896xf32>
    %c0_1 = arith.constant 0 : index
    %c0_2 = arith.constant 0 : index
    %c0_3 = arith.constant 0 : index
    %2 = vector.load %arg1[%c0_1, %c0_2, %c0_3] : memref<1x1x1056xf32, #tpu.memory_space<vmem>>, vector<1x1x896xf32>
    %3 = vector.shape_cast %2 : vector<1x1x896xf32> to vector<1x896xf32>
    %4 = vector.extract_strided_slice %0 {offsets = [0, 0], sizes = [8, 1], strides = [1, 1]} : vector<8x25xf32> to vector<8x1xf32>
    %5 = vector.broadcast %4 : vector<8x1xf32> to vector<8x896xf32>
    %6 = vector.broadcast %3 : vector<1x896xf32> to vector<8x896xf32>
    %7 = arith.mulf %5, %6 : vector<8x896xf32>
    %8 = arith.addf %1, %7 : vector<8x896xf32>
    %c0_4 = arith.constant 0 : index
    %c0_5 = arith.constant 0 : index
    %c1 = arith.constant 1 : index
    %9 = vector.load %arg1[%c0_4, %c0_5, %c1] : memref<1x1x1056xf32, #tpu.memory_space<vmem>>, vector<1x1x896xf32>
    %10 = vector.shape_cast %9 : vector<1x1x896xf32> to vector<1x896xf32>
    %11 = vector.extract_strided_slice %0 {offsets = [0, 1], sizes = [8, 1], strides = [1, 1]} : vector<8x25xf32> to vector<8x1xf32>
    %12 = vector.broadcast %11 : vector<8x1xf32> to vector<8x896xf32>
    %13 = vector.broadcast %10 : vector<1x896xf32> to vector<8x896xf32>
    %14 = arith.mulf %12, %13 : vector<8x896xf32>
    %15 = arith.addf %8, %14 : vector<8x896xf32>
    %c0_6 = arith.constant 0 : index
    %c0_7 = arith.constant 0 : index
    %c2 = arith.constant 2 : index
    %16 = vector.load %arg1[%c0_6, %c0_7, %c2] : memref<1x1x1056xf32, #tpu.memory_space<vmem>>, vector<1x1x896xf32>
    %17 = vector.shape_cast %16 : vector<1x1x896xf32> to vector<1x896xf32>
    %18 = vector.extract_strided_slice %0 {offsets = [0, 2], sizes = [8, 1], strides = [1, 1]} : vector<8x25xf32> to vector<8x1xf32>
    %19 = vector.broadcast %18 : vector<8x1xf32> to vector<8x896xf32>
    %20 = vector.broadcast %17 : vector<1x896xf32> to vector<8x896xf32>
    %21 = arith.mulf %19, %20 : vector<8x896xf32>
    %22 = arith.addf %15, %21 : vector<8x896xf32>
    %c0_8 = arith.constant 0 : index
    %c0_9 = arith.constant 0 : index
    %c3 = arith.constant 3 : index
    %23 = vector.load %arg1[%c0_8, %c0_9, %c3] : memref<1x1x1056xf32, #tpu.memory_space<vmem>>, vector<1x1x896xf32>
    %24 = vector.shape_cast %23 : vector<1x1x896xf32> to vector<1x896xf32>
    %25 = vector.extract_strided_slice %0 {offsets = [0, 3], sizes = [8, 1], strides = [1, 1]} : vector<8x25xf32> to vector<8x1xf32>
    %26 = vector.broadcast %25 : vector<8x1xf32> to vector<8x896xf32>
    %27 = vector.broadcast %24 : vector<1x896xf32> to vector<8x896xf32>
    %28 = arith.mulf %26, %27 : vector<8x896xf32>
    %29 = arith.addf %22, %28 : vector<8x896xf32>
    %c0_10 = arith.constant 0 : index
    %c0_11 = arith.constant 0 : index
    %c4 = arith.constant 4 : index
    %30 = vector.load %arg1[%c0_10, %c0_11, %c4] : memref<1x1x1056xf32, #tpu.memory_space<vmem>>, vector<1x1x896xf32>
    %31 = vector.shape_cast %30 : vector<1x1x896xf32> to vector<1x896xf32>
    %32 = vector.extract_strided_slice %0 {offsets = [0, 4], sizes = [8, 1], strides = [1, 1]} : vector<8x25xf32> to vector<8x1xf32>
    %33 = vector.broadcast %32 : vector<8x1xf32> to vector<8x896xf32>
    %34 = vector.broadcast %31 : vector<1x896xf32> to vector<8x896xf32>
    %35 = arith.mulf %33, %34 : vector<8x896xf32>
    %36 = arith.addf %29, %35 : vector<8x896xf32>
    %c0_12 = arith.constant 0 : index
    %c0_13 = arith.constant 0 : index
    %c32 = arith.constant 32 : index
    %37 = vector.load %arg1[%c0_12, %c0_13, %c32] : memref<1x1x1056xf32, #tpu.memory_space<vmem>>, vector<1x1x896xf32>
    %38 = vector.shape_cast %37 : vector<1x1x896xf32> to vector<1x896xf32>
    %39 = vector.extract_strided_slice %0 {offsets = [0, 5], sizes = [8, 1], strides = [1, 1]} : vector<8x25xf32> to vector<8x1xf32>
    %40 = vector.broadcast %39 : vector<8x1xf32> to vector<8x896xf32>
    %41 = vector.broadcast %38 : vector<1x896xf32> to vector<8x896xf32>
    %42 = arith.mulf %40, %41 : vector<8x896xf32>
    %43 = arith.addf %36, %42 : vector<8x896xf32>
    %c0_14 = arith.constant 0 : index
    %c0_15 = arith.constant 0 : index
    %c33 = arith.constant 33 : index
    %44 = vector.load %arg1[%c0_14, %c0_15, %c33] : memref<1x1x1056xf32, #tpu.memory_space<vmem>>, vector<1x1x896xf32>
    %45 = vector.shape_cast %44 : vector<1x1x896xf32> to vector<1x896xf32>
    %46 = vector.extract_strided_slice %0 {offsets = [0, 6], sizes = [8, 1], strides = [1, 1]} : vector<8x25xf32> to vector<8x1xf32>
    %47 = vector.broadcast %46 : vector<8x1xf32> to vector<8x896xf32>
    %48 = vector.broadcast %45 : vector<1x896xf32> to vector<8x896xf32>
    %49 = arith.mulf %47, %48 : vector<8x896xf32>
    %50 = arith.addf %43, %49 : vector<8x896xf32>
    %c0_16 = arith.constant 0 : index
    %c0_17 = arith.constant 0 : index
    %c34 = arith.constant 34 : index
    %51 = vector.load %arg1[%c0_16, %c0_17, %c34] : memref<1x1x1056xf32, #tpu.memory_space<vmem>>, vector<1x1x896xf32>
    %52 = vector.shape_cast %51 : vector<1x1x896xf32> to vector<1x896xf32>
    %53 = vector.extract_strided_slice %0 {offsets = [0, 7], sizes = [8, 1], strides = [1, 1]} : vector<8x25xf32> to vector<8x1xf32>
    %54 = vector.broadcast %53 : vector<8x1xf32> to vector<8x896xf32>
    %55 = vector.broadcast %52 : vector<1x896xf32> to vector<8x896xf32>
    %56 = arith.mulf %54, %55 : vector<8x896xf32>
    %57 = arith.addf %50, %56 : vector<8x896xf32>
    %c0_18 = arith.constant 0 : index
    %c0_19 = arith.constant 0 : index
    %c35 = arith.constant 35 : index
    %58 = vector.load %arg1[%c0_18, %c0_19, %c35] : memref<1x1x1056xf32, #tpu.memory_space<vmem>>, vector<1x1x896xf32>
    %59 = vector.shape_cast %58 : vector<1x1x896xf32> to vector<1x896xf32>
    %60 = vector.extract_strided_slice %0 {offsets = [0, 8], sizes = [8, 1], strides = [1, 1]} : vector<8x25xf32> to vector<8x1xf32>
    %61 = vector.broadcast %60 : vector<8x1xf32> to vector<8x896xf32>
    %62 = vector.broadcast %59 : vector<1x896xf32> to vector<8x896xf32>
    %63 = arith.mulf %61, %62 : vector<8x896xf32>
    %64 = arith.addf %57, %63 : vector<8x896xf32>
    %c0_20 = arith.constant 0 : index
    %c0_21 = arith.constant 0 : index
    %c36 = arith.constant 36 : index
    %65 = vector.load %arg1[%c0_20, %c0_21, %c36] : memref<1x1x1056xf32, #tpu.memory_space<vmem>>, vector<1x1x896xf32>
    %66 = vector.shape_cast %65 : vector<1x1x896xf32> to vector<1x896xf32>
    %67 = vector.extract_strided_slice %0 {offsets = [0, 9], sizes = [8, 1], strides = [1, 1]} : vector<8x25xf32> to vector<8x1xf32>
    %68 = vector.broadcast %67 : vector<8x1xf32> to vector<8x896xf32>
    %69 = vector.broadcast %66 : vector<1x896xf32> to vector<8x896xf32>
    %70 = arith.mulf %68, %69 : vector<8x896xf32>
    %71 = arith.addf %64, %70 : vector<8x896xf32>
    %c0_22 = arith.constant 0 : index
    %c0_23 = arith.constant 0 : index
    %c64 = arith.constant 64 : index
    %72 = vector.load %arg1[%c0_22, %c0_23, %c64] : memref<1x1x1056xf32, #tpu.memory_space<vmem>>, vector<1x1x896xf32>
    %73 = vector.shape_cast %72 : vector<1x1x896xf32> to vector<1x896xf32>
    %74 = vector.extract_strided_slice %0 {offsets = [0, 10], sizes = [8, 1], strides = [1, 1]} : vector<8x25xf32> to vector<8x1xf32>
    %75 = vector.broadcast %74 : vector<8x1xf32> to vector<8x896xf32>
    %76 = vector.broadcast %73 : vector<1x896xf32> to vector<8x896xf32>
    %77 = arith.mulf %75, %76 : vector<8x896xf32>
    %78 = arith.addf %71, %77 : vector<8x896xf32>
    %c0_24 = arith.constant 0 : index
    %c0_25 = arith.constant 0 : index
    %c65 = arith.constant 65 : index
    %79 = vector.load %arg1[%c0_24, %c0_25, %c65] : memref<1x1x1056xf32, #tpu.memory_space<vmem>>, vector<1x1x896xf32>
    %80 = vector.shape_cast %79 : vector<1x1x896xf32> to vector<1x896xf32>
    %81 = vector.extract_strided_slice %0 {offsets = [0, 11], sizes = [8, 1], strides = [1, 1]} : vector<8x25xf32> to vector<8x1xf32>
    %82 = vector.broadcast %81 : vector<8x1xf32> to vector<8x896xf32>
    %83 = vector.broadcast %80 : vector<1x896xf32> to vector<8x896xf32>
    %84 = arith.mulf %82, %83 : vector<8x896xf32>
    %85 = arith.addf %78, %84 : vector<8x896xf32>
    %c0_26 = arith.constant 0 : index
    %c0_27 = arith.constant 0 : index
    %c66 = arith.constant 66 : index
    %86 = vector.load %arg1[%c0_26, %c0_27, %c66] : memref<1x1x1056xf32, #tpu.memory_space<vmem>>, vector<1x1x896xf32>
    %87 = vector.shape_cast %86 : vector<1x1x896xf32> to vector<1x896xf32>
    %88 = vector.extract_strided_slice %0 {offsets = [0, 12], sizes = [8, 1], strides = [1, 1]} : vector<8x25xf32> to vector<8x1xf32>
    %89 = vector.broadcast %88 : vector<8x1xf32> to vector<8x896xf32>
    %90 = vector.broadcast %87 : vector<1x896xf32> to vector<8x896xf32>
    %91 = arith.mulf %89, %90 : vector<8x896xf32>
    %92 = arith.addf %85, %91 : vector<8x896xf32>
    %c0_28 = arith.constant 0 : index
    %c0_29 = arith.constant 0 : index
    %c67 = arith.constant 67 : index
    %93 = vector.load %arg1[%c0_28, %c0_29, %c67] : memref<1x1x1056xf32, #tpu.memory_space<vmem>>, vector<1x1x896xf32>
    %94 = vector.shape_cast %93 : vector<1x1x896xf32> to vector<1x896xf32>
    %95 = vector.extract_strided_slice %0 {offsets = [0, 13], sizes = [8, 1], strides = [1, 1]} : vector<8x25xf32> to vector<8x1xf32>
    %96 = vector.broadcast %95 : vector<8x1xf32> to vector<8x896xf32>
    %97 = vector.broadcast %94 : vector<1x896xf32> to vector<8x896xf32>
    %98 = arith.mulf %96, %97 : vector<8x896xf32>
    %99 = arith.addf %92, %98 : vector<8x896xf32>
    %c0_30 = arith.constant 0 : index
    %c0_31 = arith.constant 0 : index
    %c68 = arith.constant 68 : index
    %100 = vector.load %arg1[%c0_30, %c0_31, %c68] : memref<1x1x1056xf32, #tpu.memory_space<vmem>>, vector<1x1x896xf32>
    %101 = vector.shape_cast %100 : vector<1x1x896xf32> to vector<1x896xf32>
    %102 = vector.extract_strided_slice %0 {offsets = [0, 14], sizes = [8, 1], strides = [1, 1]} : vector<8x25xf32> to vector<8x1xf32>
    %103 = vector.broadcast %102 : vector<8x1xf32> to vector<8x896xf32>
    %104 = vector.broadcast %101 : vector<1x896xf32> to vector<8x896xf32>
    %105 = arith.mulf %103, %104 : vector<8x896xf32>
    %106 = arith.addf %99, %105 : vector<8x896xf32>
    %c0_32 = arith.constant 0 : index
    %c0_33 = arith.constant 0 : index
    %c96 = arith.constant 96 : index
    %107 = vector.load %arg1[%c0_32, %c0_33, %c96] : memref<1x1x1056xf32, #tpu.memory_space<vmem>>, vector<1x1x896xf32>
    %108 = vector.shape_cast %107 : vector<1x1x896xf32> to vector<1x896xf32>
    %109 = vector.extract_strided_slice %0 {offsets = [0, 15], sizes = [8, 1], strides = [1, 1]} : vector<8x25xf32> to vector<8x1xf32>
    %110 = vector.broadcast %109 : vector<8x1xf32> to vector<8x896xf32>
    %111 = vector.broadcast %108 : vector<1x896xf32> to vector<8x896xf32>
    %112 = arith.mulf %110, %111 : vector<8x896xf32>
    %113 = arith.addf %106, %112 : vector<8x896xf32>
    %c0_34 = arith.constant 0 : index
    %c0_35 = arith.constant 0 : index
    %c97 = arith.constant 97 : index
    %114 = vector.load %arg1[%c0_34, %c0_35, %c97] : memref<1x1x1056xf32, #tpu.memory_space<vmem>>, vector<1x1x896xf32>
    %115 = vector.shape_cast %114 : vector<1x1x896xf32> to vector<1x896xf32>
    %116 = vector.extract_strided_slice %0 {offsets = [0, 16], sizes = [8, 1], strides = [1, 1]} : vector<8x25xf32> to vector<8x1xf32>
    %117 = vector.broadcast %116 : vector<8x1xf32> to vector<8x896xf32>
    %118 = vector.broadcast %115 : vector<1x896xf32> to vector<8x896xf32>
    %119 = arith.mulf %117, %118 : vector<8x896xf32>
    %120 = arith.addf %113, %119 : vector<8x896xf32>
    %c0_36 = arith.constant 0 : index
    %c0_37 = arith.constant 0 : index
    %c98 = arith.constant 98 : index
    %121 = vector.load %arg1[%c0_36, %c0_37, %c98] : memref<1x1x1056xf32, #tpu.memory_space<vmem>>, vector<1x1x896xf32>
    %122 = vector.shape_cast %121 : vector<1x1x896xf32> to vector<1x896xf32>
    %123 = vector.extract_strided_slice %0 {offsets = [0, 17], sizes = [8, 1], strides = [1, 1]} : vector<8x25xf32> to vector<8x1xf32>
    %124 = vector.broadcast %123 : vector<8x1xf32> to vector<8x896xf32>
    %125 = vector.broadcast %122 : vector<1x896xf32> to vector<8x896xf32>
    %126 = arith.mulf %124, %125 : vector<8x896xf32>
    %127 = arith.addf %120, %126 : vector<8x896xf32>
    %c0_38 = arith.constant 0 : index
    %c0_39 = arith.constant 0 : index
    %c99 = arith.constant 99 : index
    %128 = vector.load %arg1[%c0_38, %c0_39, %c99] : memref<1x1x1056xf32, #tpu.memory_space<vmem>>, vector<1x1x896xf32>
    %129 = vector.shape_cast %128 : vector<1x1x896xf32> to vector<1x896xf32>
    %130 = vector.extract_strided_slice %0 {offsets = [0, 18], sizes = [8, 1], strides = [1, 1]} : vector<8x25xf32> to vector<8x1xf32>
    %131 = vector.broadcast %130 : vector<8x1xf32> to vector<8x896xf32>
    %132 = vector.broadcast %129 : vector<1x896xf32> to vector<8x896xf32>
    %133 = arith.mulf %131, %132 : vector<8x896xf32>
    %134 = arith.addf %127, %133 : vector<8x896xf32>
    %c0_40 = arith.constant 0 : index
    %c0_41 = arith.constant 0 : index
    %c100 = arith.constant 100 : index
    %135 = vector.load %arg1[%c0_40, %c0_41, %c100] : memref<1x1x1056xf32, #tpu.memory_space<vmem>>, vector<1x1x896xf32>
    %136 = vector.shape_cast %135 : vector<1x1x896xf32> to vector<1x896xf32>
    %137 = vector.extract_strided_slice %0 {offsets = [0, 19], sizes = [8, 1], strides = [1, 1]} : vector<8x25xf32> to vector<8x1xf32>
    %138 = vector.broadcast %137 : vector<8x1xf32> to vector<8x896xf32>
    %139 = vector.broadcast %136 : vector<1x896xf32> to vector<8x896xf32>
    %140 = arith.mulf %138, %139 : vector<8x896xf32>
    %141 = arith.addf %134, %140 : vector<8x896xf32>
    %c0_42 = arith.constant 0 : index
    %c0_43 = arith.constant 0 : index
    %c128 = arith.constant 128 : index
    %142 = vector.load %arg1[%c0_42, %c0_43, %c128] : memref<1x1x1056xf32, #tpu.memory_space<vmem>>, vector<1x1x896xf32>
    %143 = vector.shape_cast %142 : vector<1x1x896xf32> to vector<1x896xf32>
    %144 = vector.extract_strided_slice %0 {offsets = [0, 20], sizes = [8, 1], strides = [1, 1]} : vector<8x25xf32> to vector<8x1xf32>
    %145 = vector.broadcast %144 : vector<8x1xf32> to vector<8x896xf32>
    %146 = vector.broadcast %143 : vector<1x896xf32> to vector<8x896xf32>
    %147 = arith.mulf %145, %146 : vector<8x896xf32>
    %148 = arith.addf %141, %147 : vector<8x896xf32>
    %c0_44 = arith.constant 0 : index
    %c0_45 = arith.constant 0 : index
    %c129 = arith.constant 129 : index
    %149 = vector.load %arg1[%c0_44, %c0_45, %c129] : memref<1x1x1056xf32, #tpu.memory_space<vmem>>, vector<1x1x896xf32>
    %150 = vector.shape_cast %149 : vector<1x1x896xf32> to vector<1x896xf32>
    %151 = vector.extract_strided_slice %0 {offsets = [0, 21], sizes = [8, 1], strides = [1, 1]} : vector<8x25xf32> to vector<8x1xf32>
    %152 = vector.broadcast %151 : vector<8x1xf32> to vector<8x896xf32>
    %153 = vector.broadcast %150 : vector<1x896xf32> to vector<8x896xf32>
    %154 = arith.mulf %152, %153 : vector<8x896xf32>
    %155 = arith.addf %148, %154 : vector<8x896xf32>
    %c0_46 = arith.constant 0 : index
    %c0_47 = arith.constant 0 : index
    %c130 = arith.constant 130 : index
    %156 = vector.load %arg1[%c0_46, %c0_47, %c130] : memref<1x1x1056xf32, #tpu.memory_space<vmem>>, vector<1x1x896xf32>
    %157 = vector.shape_cast %156 : vector<1x1x896xf32> to vector<1x896xf32>
    %158 = vector.extract_strided_slice %0 {offsets = [0, 22], sizes = [8, 1], strides = [1, 1]} : vector<8x25xf32> to vector<8x1xf32>
    %159 = vector.broadcast %158 : vector<8x1xf32> to vector<8x896xf32>
    %160 = vector.broadcast %157 : vector<1x896xf32> to vector<8x896xf32>
    %161 = arith.mulf %159, %160 : vector<8x896xf32>
    %162 = arith.addf %155, %161 : vector<8x896xf32>
    %c0_48 = arith.constant 0 : index
    %c0_49 = arith.constant 0 : index
    %c131 = arith.constant 131 : index
    %163 = vector.load %arg1[%c0_48, %c0_49, %c131] : memref<1x1x1056xf32, #tpu.memory_space<vmem>>, vector<1x1x896xf32>
    %164 = vector.shape_cast %163 : vector<1x1x896xf32> to vector<1x896xf32>
    %165 = vector.extract_strided_slice %0 {offsets = [0, 23], sizes = [8, 1], strides = [1, 1]} : vector<8x25xf32> to vector<8x1xf32>
    %166 = vector.broadcast %165 : vector<8x1xf32> to vector<8x896xf32>
    %167 = vector.broadcast %164 : vector<1x896xf32> to vector<8x896xf32>
    %168 = arith.mulf %166, %167 : vector<8x896xf32>
    %169 = arith.addf %162, %168 : vector<8x896xf32>
    %c0_50 = arith.constant 0 : index
    %c0_51 = arith.constant 0 : index
    %c132 = arith.constant 132 : index
    %170 = vector.load %arg1[%c0_50, %c0_51, %c132] : memref<1x1x1056xf32, #tpu.memory_space<vmem>>, vector<1x1x896xf32>
    %171 = vector.shape_cast %170 : vector<1x1x896xf32> to vector<1x896xf32>
    %172 = vector.extract_strided_slice %0 {offsets = [0, 24], sizes = [8, 1], strides = [1, 1]} : vector<8x25xf32> to vector<8x1xf32>
    %173 = vector.broadcast %172 : vector<8x1xf32> to vector<8x896xf32>
    %174 = vector.broadcast %171 : vector<1x896xf32> to vector<8x896xf32>
    %175 = arith.mulf %173, %174 : vector<8x896xf32>
    %176 = arith.addf %169, %175 : vector<8x896xf32>
    %c0_52 = arith.constant 0 : index
    %c0_53 = arith.constant 0 : index
    %177 = vector.load %arg3[%c0_52, %c0_53] : memref<8x1xf32, #tpu.memory_space<vmem>>, vector<8x1xf32>
    %178 = vector.broadcast %177 : vector<8x1xf32> to vector<8x896xf32>
    %179 = arith.addf %176, %178 : vector<8x896xf32>
    %cst_54 = arith.constant 0.000000e+00 : f32
    %180 = vector.broadcast %cst_54 : f32 to vector<8x896xf32>
    %181 = arith.maximumf %179, %180 : vector<8x896xf32>
    %c0_55 = arith.constant 0 : index
    %c0_56 = arith.constant 0 : index
    %182 = vector.load %arg13[%c0_55, %c0_56] : memref<8x896xf32, #tpu.memory_space<vmem>>, vector<8x896xf32>
    tpu.vector_store %arg13[%c0_55, %c0_56], %181 {strides = array<i32>} : memref<8x896xf32, #tpu.memory_space<vmem>>, vector<8x896xf32>,
    %c0_57 = arith.constant 0 : index
    %c0_58 = arith.constant 0 : index
    %183 = vector.load %arg13[%c0_57, %c0_58] : memref<8x896xf32, #tpu.memory_space<vmem>>, vector<8x863xf32>
    %c0_59 = arith.constant 0 : index
    %c1_60 = arith.constant 1 : index
    %184 = vector.load %arg13[%c0_59, %c1_60] : memref<8x896xf32, #tpu.memory_space<vmem>>, vector<8x863xf32>
    %185 = arith.maximumf %183, %184 : vector<8x863xf32>
    %c0_61 = arith.constant 0 : index
    %c32_62 = arith.constant 32 : index
    %186 = vector.load %arg13[%c0_61, %c32_62] : memref<8x896xf32, #tpu.memory_space<vmem>>, vector<8x863xf32>
    %c0_63 = arith.constant 0 : index
    %c33_64 = arith.constant 33 : index
    %187 = vector.load %arg13[%c0_63, %c33_64] : memref<8x896xf32, #tpu.memory_space<vmem>>, vector<8x863xf32>
    %188 = arith.maximumf %186, %187 : vector<8x863xf32>
    %189 = arith.maximumf %185, %188 : vector<8x863xf32>
    %c0_65 = arith.constant 0 : index
    %c0_66 = arith.constant 0 : index
    %190 = vector.load %arg4[%c0_65, %c0_66] : memref<863x342xf32, #tpu.memory_space<vmem>>, vector<863x342xf32>
    %cst_67 = arith.constant dense<0.000000e+00> : vector<8x342xf32>
    %191 = tpu.matmul %189, %190, %cst_67 {dimension_numbers = #tpu.dot_dimension_numbers<[1], [0], [0], [1], [0, 0, 1, 1], [], []>} : vector<8x863xf32>, vector<863x342xf32>, vector<8x342xf32> -> vector<8x342xf32>
    %c0_68 = arith.constant 0 : index
    %c0_69 = arith.constant 0 : index
    %192 = vector.load %arg14[%c0_68, %c0_69] : memref<8x342xf32, #tpu.memory_space<vmem>>, vector<8x342xf32>
    tpu.vector_store %arg14[%c0_68, %c0_69], %191 {strides = array<i32>} : memref<8x342xf32, #tpu.memory_space<vmem>>, vector<8x342xf32>,
    %c0_70 = arith.constant 0 : index
    %c0_71 = arith.constant 0 : index
    %193 = vector.load %arg14[%c0_70, %c0_71] : memref<8x342xf32, #tpu.memory_space<vmem>>, vector<8x252xf32>
    %c0_72 = arith.constant 0 : index
    %c0_73 = arith.constant 0 : index
    %194 = vector.load %arg15[%c0_72, %c0_73] : memref<200x252xf32, #tpu.memory_space<vmem>>, vector<8x252xf32>
    tpu.vector_store %arg15[%c0_72, %c0_73], %193 {strides = array<i32>} : memref<200x252xf32, #tpu.memory_space<vmem>>, vector<8x252xf32>,
    %c0_74 = arith.constant 0 : index
    %c1_75 = arith.constant 1 : index
    %195 = vector.load %arg14[%c0_74, %c1_75] : memref<8x342xf32, #tpu.memory_space<vmem>>, vector<8x252xf32>
    %c8 = arith.constant 8 : index
    %c0_76 = arith.constant 0 : index
    %196 = vector.load %arg15[%c8, %c0_76] : memref<200x252xf32, #tpu.memory_space<vmem>>, vector<8x252xf32>
    tpu.vector_store %arg15[%c8, %c0_76], %195 {strides = array<i32>} : memref<200x252xf32, #tpu.memory_space<vmem>>, vector<8x252xf32>,
    %c0_77 = arith.constant 0 : index
    %c2_78 = arith.constant 2 : index
    %197 = vector.load %arg14[%c0_77, %c2_78] : memref<8x342xf32, #tpu.memory_space<vmem>>, vector<8x252xf32>
    %c16 = arith.constant 16 : index
    %c0_79 = arith.constant 0 : index
    %198 = vector.load %arg15[%c16, %c0_79] : memref<200x252xf32, #tpu.memory_space<vmem>>, vector<8x252xf32>
    tpu.vector_store %arg15[%c16, %c0_79], %197 {strides = array<i32>} : memref<200x252xf32, #tpu.memory_space<vmem>>, vector<8x252xf32>,
    %c0_80 = arith.constant 0 : index
    %c3_81 = arith.constant 3 : index
    %199 = vector.load %arg14[%c0_80, %c3_81] : memref<8x342xf32, #tpu.memory_space<vmem>>, vector<8x252xf32>
    %c24 = arith.constant 24 : index
    %c0_82 = arith.constant 0 : index
    %200 = vector.load %arg15[%c24, %c0_82] : memref<200x252xf32, #tpu.memory_space<vmem>>, vector<8x252xf32>
    tpu.vector_store %arg15[%c24, %c0_82], %199 {strides = array<i32>} : memref<200x252xf32, #tpu.memory_space<vmem>>, vector<8x252xf32>,
    %c0_83 = arith.constant 0 : index
    %c4_84 = arith.constant 4 : index
    %201 = vector.load %arg14[%c0_83, %c4_84] : memref<8x342xf32, #tpu.memory_space<vmem>>, vector<8x252xf32>
    %c32_85 = arith.constant 32 : index
    %c0_86 = arith.constant 0 : index
    %202 = vector.load %arg15[%c32_85, %c0_86] : memref<200x252xf32, #tpu.memory_space<vmem>>, vector<8x252xf32>
    tpu.vector_store %arg15[%c32_85, %c0_86], %201 {strides = array<i32>} : memref<200x252xf32, #tpu.memory_space<vmem>>, vector<8x252xf32>,
    %c0_87 = arith.constant 0 : index
    %c18 = arith.constant 18 : index
    %203 = vector.load %arg14[%c0_87, %c18] : memref<8x342xf32, #tpu.memory_space<vmem>>, vector<8x252xf32>
    %c40 = arith.constant 40 : index
    %c0_88 = arith.constant 0 : index
    %204 = vector.load %arg15[%c40, %c0_88] : memref<200x252xf32, #tpu.memory_space<vmem>>, vector<8x252xf32>
    tpu.vector_store %arg15[%c40, %c0_88], %203 {strides = array<i32>} : memref<200x252xf32, #tpu.memory_space<vmem>>, vector<8x252xf32>,
    %c0_89 = arith.constant 0 : index
    %c19 = arith.constant 19 : index
    %205 = vector.load %arg14[%c0_89, %c19] : memref<8x342xf32, #tpu.memory_space<vmem>>, vector<8x252xf32>
    %c48 = arith.constant 48 : index
    %c0_90 = arith.constant 0 : index
    %206 = vector.load %arg15[%c48, %c0_90] : memref<200x252xf32, #tpu.memory_space<vmem>>, vector<8x252xf32>
    tpu.vector_store %arg15[%c48, %c0_90], %205 {strides = array<i32>} : memref<200x252xf32, #tpu.memory_space<vmem>>, vector<8x252xf32>,
    %c0_91 = arith.constant 0 : index
    %c20 = arith.constant 20 : index
    %207 = vector.load %arg14[%c0_91, %c20] : memref<8x342xf32, #tpu.memory_space<vmem>>, vector<8x252xf32>
    %c56 = arith.constant 56 : index
    %c0_92 = arith.constant 0 : index
    %208 = vector.load %arg15[%c56, %c0_92] : memref<200x252xf32, #tpu.memory_space<vmem>>, vector<8x252xf32>
    tpu.vector_store %arg15[%c56, %c0_92], %207 {strides = array<i32>} : memref<200x252xf32, #tpu.memory_space<vmem>>, vector<8x252xf32>,
    %c0_93 = arith.constant 0 : index
    %c21 = arith.constant 21 : index
    %209 = vector.load %arg14[%c0_93, %c21] : memref<8x342xf32, #tpu.memory_space<vmem>>, vector<8x252xf32>
    %c64_94 = arith.constant 64 : index
    %c0_95 = arith.constant 0 : index
    %210 = vector.load %arg15[%c64_94, %c0_95] : memref<200x252xf32, #tpu.memory_space<vmem>>, vector<8x252xf32>
    tpu.vector_store %arg15[%c64_94, %c0_95], %209 {strides = array<i32>} : memref<200x252xf32, #tpu.memory_space<vmem>>, vector<8x252xf32>,
    %c0_96 = arith.constant 0 : index
    %c22 = arith.constant 22 : index
    %211 = vector.load %arg14[%c0_96, %c22] : memref<8x342xf32, #tpu.memory_space<vmem>>, vector<8x252xf32>
    %c72 = arith.constant 72 : index
    %c0_97 = arith.constant 0 : index
    %212 = vector.load %arg15[%c72, %c0_97] : memref<200x252xf32, #tpu.memory_space<vmem>>, vector<8x252xf32>
    tpu.vector_store %arg15[%c72, %c0_97], %211 {strides = array<i32>} : memref<200x252xf32, #tpu.memory_space<vmem>>, vector<8x252xf32>,
    %c0_98 = arith.constant 0 : index
    %c36_99 = arith.constant 36 : index
    %213 = vector.load %arg14[%c0_98, %c36_99] : memref<8x342xf32, #tpu.memory_space<vmem>>, vector<8x252xf32>
    %c80 = arith.constant 80 : index
    %c0_100 = arith.constant 0 : index
    %214 = vector.load %arg15[%c80, %c0_100] : memref<200x252xf32, #tpu.memory_space<vmem>>, vector<8x252xf32>
    tpu.vector_store %arg15[%c80, %c0_100], %213 {strides = array<i32>} : memref<200x252xf32, #tpu.memory_space<vmem>>, vector<8x252xf32>,
    %c0_101 = arith.constant 0 : index
    %c37 = arith.constant 37 : index
    %215 = vector.load %arg14[%c0_101, %c37] : memref<8x342xf32, #tpu.memory_space<vmem>>, vector<8x252xf32>
    %c88 = arith.constant 88 : index
    %c0_102 = arith.constant 0 : index
    %216 = vector.load %arg15[%c88, %c0_102] : memref<200x252xf32, #tpu.memory_space<vmem>>, vector<8x252xf32>
    tpu.vector_store %arg15[%c88, %c0_102], %215 {strides = array<i32>} : memref<200x252xf32, #tpu.memory_space<vmem>>, vector<8x252xf32>,
    %c0_103 = arith.constant 0 : index
    %c38 = arith.constant 38 : index
    %217 = vector.load %arg14[%c0_103, %c38] : memref<8x342xf32, #tpu.memory_space<vmem>>, vector<8x252xf32>
    %c96_104 = arith.constant 96 : index
    %c0_105 = arith.constant 0 : index
    %218 = vector.load %arg15[%c96_104, %c0_105] : memref<200x252xf32, #tpu.memory_space<vmem>>, vector<8x252xf32>
    tpu.vector_store %arg15[%c96_104, %c0_105], %217 {strides = array<i32>} : memref<200x252xf32, #tpu.memory_space<vmem>>, vector<8x252xf32>,
    %c0_106 = arith.constant 0 : index
    %c39 = arith.constant 39 : index
    %219 = vector.load %arg14[%c0_106, %c39] : memref<8x342xf32, #tpu.memory_space<vmem>>, vector<8x252xf32>
    %c104 = arith.constant 104 : index
    %c0_107 = arith.constant 0 : index
    %220 = vector.load %arg15[%c104, %c0_107] : memref<200x252xf32, #tpu.memory_space<vmem>>, vector<8x252xf32>
    tpu.vector_store %arg15[%c104, %c0_107], %219 {strides = array<i32>} : memref<200x252xf32, #tpu.memory_space<vmem>>, vector<8x252xf32>,
    %c0_108 = arith.constant 0 : index
    %c40_109 = arith.constant 40 : index
    %221 = vector.load %arg14[%c0_108, %c40_109] : memref<8x342xf32, #tpu.memory_space<vmem>>, vector<8x252xf32>
    %c112 = arith.constant 112 : index
    %c0_110 = arith.constant 0 : index
    %222 = vector.load %arg15[%c112, %c0_110] : memref<200x252xf32, #tpu.memory_space<vmem>>, vector<8x252xf32>
    tpu.vector_store %arg15[%c112, %c0_110], %221 {strides = array<i32>} : memref<200x252xf32, #tpu.memory_space<vmem>>, vector<8x252xf32>,
    %c0_111 = arith.constant 0 : index
    %c54 = arith.constant 54 : index
    %223 = vector.load %arg14[%c0_111, %c54] : memref<8x342xf32, #tpu.memory_space<vmem>>, vector<8x252xf32>
    %c120 = arith.constant 120 : index
    %c0_112 = arith.constant 0 : index
    %224 = vector.load %arg15[%c120, %c0_112] : memref<200x252xf32, #tpu.memory_space<vmem>>, vector<8x252xf32>
    tpu.vector_store %arg15[%c120, %c0_112], %223 {strides = array<i32>} : memref<200x252xf32, #tpu.memory_space<vmem>>, vector<8x252xf32>,
    %c0_113 = arith.constant 0 : index
    %c55 = arith.constant 55 : index
    %225 = vector.load %arg14[%c0_113, %c55] : memref<8x342xf32, #tpu.memory_space<vmem>>, vector<8x252xf32>
    %c128_114 = arith.constant 128 : index
    %c0_115 = arith.constant 0 : index
    %226 = vector.load %arg15[%c128_114, %c0_115] : memref<200x252xf32, #tpu.memory_space<vmem>>, vector<8x252xf32>
    tpu.vector_store %arg15[%c128_114, %c0_115], %225 {strides = array<i32>} : memref<200x252xf32, #tpu.memory_space<vmem>>, vector<8x252xf32>,
    %c0_116 = arith.constant 0 : index
    %c56_117 = arith.constant 56 : index
    %227 = vector.load %arg14[%c0_116, %c56_117] : memref<8x342xf32, #tpu.memory_space<vmem>>, vector<8x252xf32>
    %c136 = arith.constant 136 : index
    %c0_118 = arith.constant 0 : index
    %228 = vector.load %arg15[%c136, %c0_118] : memref<200x252xf32, #tpu.memory_space<vmem>>, vector<8x252xf32>
    tpu.vector_store %arg15[%c136, %c0_118], %227 {strides = array<i32>} : memref<200x252xf32, #tpu.memory_space<vmem>>, vector<8x252xf32>,
    %c0_119 = arith.constant 0 : index
    %c57 = arith.constant 57 : index
    %229 = vector.load %arg14[%c0_119, %c57] : memref<8x342xf32, #tpu.memory_space<vmem>>, vector<8x252xf32>
    %c144 = arith.constant 144 : index
    %c0_120 = arith.constant 0 : index
    %230 = vector.load %arg15[%c144, %c0_120] : memref<200x252xf32, #tpu.memory_space<vmem>>, vector<8x252xf32>
    tpu.vector_store %arg15[%c144, %c0_120], %229 {strides = array<i32>} : memref<200x252xf32, #tpu.memory_space<vmem>>, vector<8x252xf32>,
    %c0_121 = arith.constant 0 : index
    %c58 = arith.constant 58 : index
    %231 = vector.load %arg14[%c0_121, %c58] : memref<8x342xf32, #tpu.memory_space<vmem>>, vector<8x252xf32>
    %c152 = arith.constant 152 : index
    %c0_122 = arith.constant 0 : index
    %232 = vector.load %arg15[%c152, %c0_122] : memref<200x252xf32, #tpu.memory_space<vmem>>, vector<8x252xf32>
    tpu.vector_store %arg15[%c152, %c0_122], %231 {strides = array<i32>} : memref<200x252xf32, #tpu.memory_space<vmem>>, vector<8x252xf32>,
    %c0_123 = arith.constant 0 : index
    %c72_124 = arith.constant 72 : index
    %233 = vector.load %arg14[%c0_123, %c72_124] : memref<8x342xf32, #tpu.memory_space<vmem>>, vector<8x252xf32>
    %c160 = arith.constant 160 : index
    %c0_125 = arith.constant 0 : index
    %234 = vector.load %arg15[%c160, %c0_125] : memref<200x252xf32, #tpu.memory_space<vmem>>, vector<8x252xf32>
    tpu.vector_store %arg15[%c160, %c0_125], %233 {strides = array<i32>} : memref<200x252xf32, #tpu.memory_space<vmem>>, vector<8x252xf32>,
    %c0_126 = arith.constant 0 : index
    %c73 = arith.constant 73 : index
    %235 = vector.load %arg14[%c0_126, %c73] : memref<8x342xf32, #tpu.memory_space<vmem>>, vector<8x252xf32>
    %c168 = arith.constant 168 : index
    %c0_127 = arith.constant 0 : index
    %236 = vector.load %arg15[%c168, %c0_127] : memref<200x252xf32, #tpu.memory_space<vmem>>, vector<8x252xf32>
    tpu.vector_store %arg15[%c168, %c0_127], %235 {strides = array<i32>} : memref<200x252xf32, #tpu.memory_space<vmem>>, vector<8x252xf32>,
    %c0_128 = arith.constant 0 : index
    %c74 = arith.constant 74 : index
    %237 = vector.load %arg14[%c0_128, %c74] : memref<8x342xf32, #tpu.memory_space<vmem>>, vector<8x252xf32>
    %c176 = arith.constant 176 : index
    %c0_129 = arith.constant 0 : index
    %238 = vector.load %arg15[%c176, %c0_129] : memref<200x252xf32, #tpu.memory_space<vmem>>, vector<8x252xf32>
    tpu.vector_store %arg15[%c176, %c0_129], %237 {strides = array<i32>} : memref<200x252xf32, #tpu.memory_space<vmem>>, vector<8x252xf32>,
    %c0_130 = arith.constant 0 : index
    %c75 = arith.constant 75 : index
    %239 = vector.load %arg14[%c0_130, %c75] : memref<8x342xf32, #tpu.memory_space<vmem>>, vector<8x252xf32>
    %c184 = arith.constant 184 : index
    %c0_131 = arith.constant 0 : index
    %240 = vector.load %arg15[%c184, %c0_131] : memref<200x252xf32, #tpu.memory_space<vmem>>, vector<8x252xf32>
    tpu.vector_store %arg15[%c184, %c0_131], %239 {strides = array<i32>} : memref<200x252xf32, #tpu.memory_space<vmem>>, vector<8x252xf32>,
    %c0_132 = arith.constant 0 : index
    %c76 = arith.constant 76 : index
    %241 = vector.load %arg14[%c0_132, %c76] : memref<8x342xf32, #tpu.memory_space<vmem>>, vector<8x252xf32>
    %c192 = arith.constant 192 : index
    %c0_133 = arith.constant 0 : index
    %242 = vector.load %arg15[%c192, %c0_133] : memref<200x252xf32, #tpu.memory_space<vmem>>, vector<8x252xf32>
    tpu.vector_store %arg15[%c192, %c0_133], %241 {strides = array<i32>} : memref<200x252xf32, #tpu.memory_space<vmem>>, vector<8x252xf32>,
    %c0_134 = arith.constant 0 : index
    %c0_135 = arith.constant 0 : index
    %243 = vector.load %arg5[%c0_134, %c0_135] : memref<16x200xf32, #tpu.memory_space<vmem>>, vector<16x200xf32>
    %c0_136 = arith.constant 0 : index
    %c0_137 = arith.constant 0 : index
    %244 = vector.load %arg15[%c0_136, %c0_137] : memref<200x252xf32, #tpu.memory_space<vmem>>, vector<200x252xf32>
    %cst_138 = arith.constant dense<0.000000e+00> : vector<16x252xf32>
    %245 = tpu.matmul %243, %244, %cst_138 {dimension_numbers = #tpu.dot_dimension_numbers<[1], [0], [0], [1], [0, 0, 1, 1], [], []>} : vector<16x200xf32>, vector<200x252xf32>, vector<16x252xf32> -> vector<16x252xf32>
    %c0_139 = arith.constant 0 : index
    %c0_140 = arith.constant 0 : index
    %246 = vector.load %arg6[%c0_139, %c0_140] : memref<16x1xf32, #tpu.memory_space<vmem>>, vector<16x1xf32>
    %247 = vector.broadcast %246 : vector<16x1xf32> to vector<16x252xf32>
    %248 = arith.addf %245, %247 : vector<16x252xf32>
    %cst_141 = arith.constant 0.000000e+00 : f32
    %249 = vector.broadcast %cst_141 : f32 to vector<16x252xf32>
    %250 = arith.maximumf %248, %249 : vector<16x252xf32>
    %c0_142 = arith.constant 0 : index
    %c0_143 = arith.constant 0 : index
    %251 = vector.load %arg16[%c0_142, %c0_143] : memref<16x252xf32, #tpu.memory_space<vmem>>, vector<16x252xf32>
    tpu.vector_store %arg16[%c0_142, %c0_143], %250 {strides = array<i32>} : memref<16x252xf32, #tpu.memory_space<vmem>>, vector<16x252xf32>,
    %c0_144 = arith.constant 0 : index
    %c0_145 = arith.constant 0 : index
    %252 = vector.load %arg16[%c0_144, %c0_145] : memref<16x252xf32, #tpu.memory_space<vmem>>, vector<16x229xf32>
    %c0_146 = arith.constant 0 : index
    %c1_147 = arith.constant 1 : index
    %253 = vector.load %arg16[%c0_146, %c1_147] : memref<16x252xf32, #tpu.memory_space<vmem>>, vector<16x229xf32>
    %254 = arith.maximumf %252, %253 : vector<16x229xf32>
    %c0_148 = arith.constant 0 : index
    %c18_149 = arith.constant 18 : index
    %255 = vector.load %arg16[%c0_148, %c18_149] : memref<16x252xf32, #tpu.memory_space<vmem>>, vector<16x229xf32>
    %c0_150 = arith.constant 0 : index
    %c19_151 = arith.constant 19 : index
    %256 = vector.load %arg16[%c0_150, %c19_151] : memref<16x252xf32, #tpu.memory_space<vmem>>, vector<16x229xf32>
    %257 = arith.maximumf %255, %256 : vector<16x229xf32>
    %258 = arith.maximumf %254, %257 : vector<16x229xf32>
    %c0_152 = arith.constant 0 : index
    %c0_153 = arith.constant 0 : index
    %259 = vector.load %arg7[%c0_152, %c0_153] : memref<229x49xf32, #tpu.memory_space<vmem>>, vector<229x49xf32>
    %cst_154 = arith.constant dense<0.000000e+00> : vector<16x49xf32>
    %260 = tpu.matmul %258, %259, %cst_154 {dimension_numbers = #tpu.dot_dimension_numbers<[1], [0], [0], [1], [0, 0, 1, 1], [], []>} : vector<16x229xf32>, vector<229x49xf32>, vector<16x49xf32> -> vector<16x49xf32>
    %c0_155 = arith.constant 0 : index
    %c0_156 = arith.constant 0 : index
    %261 = vector.load %arg9[%c0_155, %c0_156] : memref<1x128xf32, #tpu.memory_space<vmem>>, vector<1x128xf32>
    %262 = vector.extract_strided_slice %260 {offsets = [0, 0], sizes = [1, 49], strides = [1, 1]} : vector<16x49xf32> to vector<1x49xf32>
    %c0_157 = arith.constant 0 : index
    %c0_158 = arith.constant 0 : index
    %c0_159 = arith.constant 0 : index
    %263 = vector.load %arg8[%c0_157, %c0_158, %c0_159] : memref<16x49x128xf32, #tpu.memory_space<vmem>>, vector<1x49x128xf32>
    %264 = vector.shape_cast %263 : vector<1x49x128xf32> to vector<49x128xf32>
    %cst_160 = arith.constant dense<0.000000e+00> : vector<1x128xf32>
    %265 = tpu.matmul %262, %264, %cst_160 {dimension_numbers = #tpu.dot_dimension_numbers<[1], [0], [0], [1], [0, 0, 1, 1], [], []>} : vector<1x49xf32>, vector<49x128xf32>, vector<1x128xf32> -> vector<1x128xf32>
    %266 = arith.addf %261, %265 : vector<1x128xf32>
    %267 = vector.extract_strided_slice %260 {offsets = [1, 0], sizes = [1, 49], strides = [1, 1]} : vector<16x49xf32> to vector<1x49xf32>
    %c1_161 = arith.constant 1 : index
    %c0_162 = arith.constant 0 : index
    %c0_163 = arith.constant 0 : index
    %268 = vector.load %arg8[%c1_161, %c0_162, %c0_163] : memref<16x49x128xf32, #tpu.memory_space<vmem>>, vector<1x49x128xf32>
    %269 = vector.shape_cast %268 : vector<1x49x128xf32> to vector<49x128xf32>
    %cst_164 = arith.constant dense<0.000000e+00> : vector<1x128xf32>
    %270 = tpu.matmul %267, %269, %cst_164 {dimension_numbers = #tpu.dot_dimension_numbers<[1], [0], [0], [1], [0, 0, 1, 1], [], []>} : vector<1x49xf32>, vector<49x128xf32>, vector<1x128xf32> -> vector<1x128xf32>
    %271 = arith.addf %266, %270 : vector<1x128xf32>
    %272 = vector.extract_strided_slice %260 {offsets = [2, 0], sizes = [1, 49], strides = [1, 1]} : vector<16x49xf32> to vector<1x49xf32>
    %c2_165 = arith.constant 2 : index
    %c0_166 = arith.constant 0 : index
    %c0_167 = arith.constant 0 : index
    %273 = vector.load %arg8[%c2_165, %c0_166, %c0_167] : memref<16x49x128xf32, #tpu.memory_space<vmem>>, vector<1x49x128xf32>
    %274 = vector.shape_cast %273 : vector<1x49x128xf32> to vector<49x128xf32>
    %cst_168 = arith.constant dense<0.000000e+00> : vector<1x128xf32>
    %275 = tpu.matmul %272, %274, %cst_168 {dimension_numbers = #tpu.dot_dimension_numbers<[1], [0], [0], [1], [0, 0, 1, 1], [], []>} : vector<1x49xf32>, vector<49x128xf32>, vector<1x128xf32> -> vector<1x128xf32>
    %276 = arith.addf %271, %275 : vector<1x128xf32>
    %277 = vector.extract_strided_slice %260 {offsets = [3, 0], sizes = [1, 49], strides = [1, 1]} : vector<16x49xf32> to vector<1x49xf32>
    %c3_169 = arith.constant 3 : index
    %c0_170 = arith.constant 0 : index
    %c0_171 = arith.constant 0 : index
    %278 = vector.load %arg8[%c3_169, %c0_170, %c0_171] : memref<16x49x128xf32, #tpu.memory_space<vmem>>, vector<1x49x128xf32>
    %279 = vector.shape_cast %278 : vector<1x49x128xf32> to vector<49x128xf32>
    %cst_172 = arith.constant dense<0.000000e+00> : vector<1x128xf32>
    %280 = tpu.matmul %277, %279, %cst_172 {dimension_numbers = #tpu.dot_dimension_numbers<[1], [0], [0], [1], [0, 0, 1, 1], [], []>} : vector<1x49xf32>, vector<49x128xf32>, vector<1x128xf32> -> vector<1x128xf32>
    %281 = arith.addf %276, %280 : vector<1x128xf32>
    %282 = vector.extract_strided_slice %260 {offsets = [4, 0], sizes = [1, 49], strides = [1, 1]} : vector<16x49xf32> to vector<1x49xf32>
    %c4_173 = arith.constant 4 : index
    %c0_174 = arith.constant 0 : index
    %c0_175 = arith.constant 0 : index
    %283 = vector.load %arg8[%c4_173, %c0_174, %c0_175] : memref<16x49x128xf32, #tpu.memory_space<vmem>>, vector<1x49x128xf32>
    %284 = vector.shape_cast %283 : vector<1x49x128xf32> to vector<49x128xf32>
    %cst_176 = arith.constant dense<0.000000e+00> : vector<1x128xf32>
    %285 = tpu.matmul %282, %284, %cst_176 {dimension_numbers = #tpu.dot_dimension_numbers<[1], [0], [0], [1], [0, 0, 1, 1], [], []>} : vector<1x49xf32>, vector<49x128xf32>, vector<1x128xf32> -> vector<1x128xf32>
    %286 = arith.addf %281, %285 : vector<1x128xf32>
    %287 = vector.extract_strided_slice %260 {offsets = [5, 0], sizes = [1, 49], strides = [1, 1]} : vector<16x49xf32> to vector<1x49xf32>
    %c5 = arith.constant 5 : index
    %c0_177 = arith.constant 0 : index
    %c0_178 = arith.constant 0 : index
    %288 = vector.load %arg8[%c5, %c0_177, %c0_178] : memref<16x49x128xf32, #tpu.memory_space<vmem>>, vector<1x49x128xf32>
    %289 = vector.shape_cast %288 : vector<1x49x128xf32> to vector<49x128xf32>
    %cst_179 = arith.constant dense<0.000000e+00> : vector<1x128xf32>
    %290 = tpu.matmul %287, %289, %cst_179 {dimension_numbers = #tpu.dot_dimension_numbers<[1], [0], [0], [1], [0, 0, 1, 1], [], []>} : vector<1x49xf32>, vector<49x128xf32>, vector<1x128xf32> -> vector<1x128xf32>
    %291 = arith.addf %286, %290 : vector<1x128xf32>
    %292 = vector.extract_strided_slice %260 {offsets = [6, 0], sizes = [1, 49], strides = [1, 1]} : vector<16x49xf32> to vector<1x49xf32>
    %c6 = arith.constant 6 : index
    %c0_180 = arith.constant 0 : index
    %c0_181 = arith.constant 0 : index
    %293 = vector.load %arg8[%c6, %c0_180, %c0_181] : memref<16x49x128xf32, #tpu.memory_space<vmem>>, vector<1x49x128xf32>
    %294 = vector.shape_cast %293 : vector<1x49x128xf32> to vector<49x128xf32>
    %cst_182 = arith.constant dense<0.000000e+00> : vector<1x128xf32>
    %295 = tpu.matmul %292, %294, %cst_182 {dimension_numbers = #tpu.dot_dimension_numbers<[1], [0], [0], [1], [0, 0, 1, 1], [], []>} : vector<1x49xf32>, vector<49x128xf32>, vector<1x128xf32> -> vector<1x128xf32>
    %296 = arith.addf %291, %295 : vector<1x128xf32>
    %297 = vector.extract_strided_slice %260 {offsets = [7, 0], sizes = [1, 49], strides = [1, 1]} : vector<16x49xf32> to vector<1x49xf32>
    %c7 = arith.constant 7 : index
    %c0_183 = arith.constant 0 : index
    %c0_184 = arith.constant 0 : index
    %298 = vector.load %arg8[%c7, %c0_183, %c0_184] : memref<16x49x128xf32, #tpu.memory_space<vmem>>, vector<1x49x128xf32>
    %299 = vector.shape_cast %298 : vector<1x49x128xf32> to vector<49x128xf32>
    %cst_185 = arith.constant dense<0.000000e+00> : vector<1x128xf32>
    %300 = tpu.matmul %297, %299, %cst_185 {dimension_numbers = #tpu.dot_dimension_numbers<[1], [0], [0], [1], [0, 0, 1, 1], [], []>} : vector<1x49xf32>, vector<49x128xf32>, vector<1x128xf32> -> vector<1x128xf32>
    %301 = arith.addf %296, %300 : vector<1x128xf32>
    %302 = vector.extract_strided_slice %260 {offsets = [8, 0], sizes = [1, 49], strides = [1, 1]} : vector<16x49xf32> to vector<1x49xf32>
    %c8_186 = arith.constant 8 : index
    %c0_187 = arith.constant 0 : index
    %c0_188 = arith.constant 0 : index
    %303 = vector.load %arg8[%c8_186, %c0_187, %c0_188] : memref<16x49x128xf32, #tpu.memory_space<vmem>>, vector<1x49x128xf32>
    %304 = vector.shape_cast %303 : vector<1x49x128xf32> to vector<49x128xf32>
    %cst_189 = arith.constant dense<0.000000e+00> : vector<1x128xf32>
    %305 = tpu.matmul %302, %304, %cst_189 {dimension_numbers = #tpu.dot_dimension_numbers<[1], [0], [0], [1], [0, 0, 1, 1], [], []>} : vector<1x49xf32>, vector<49x128xf32>, vector<1x128xf32> -> vector<1x128xf32>
    %306 = arith.addf %301, %305 : vector<1x128xf32>
    %307 = vector.extract_strided_slice %260 {offsets = [9, 0], sizes = [1, 49], strides = [1, 1]} : vector<16x49xf32> to vector<1x49xf32>
    %c9 = arith.constant 9 : index
    %c0_190 = arith.constant 0 : index
    %c0_191 = arith.constant 0 : index
    %308 = vector.load %arg8[%c9, %c0_190, %c0_191] : memref<16x49x128xf32, #tpu.memory_space<vmem>>, vector<1x49x128xf32>
    %309 = vector.shape_cast %308 : vector<1x49x128xf32> to vector<49x128xf32>
    %cst_192 = arith.constant dense<0.000000e+00> : vector<1x128xf32>
    %310 = tpu.matmul %307, %309, %cst_192 {dimension_numbers = #tpu.dot_dimension_numbers<[1], [0], [0], [1], [0, 0, 1, 1], [], []>} : vector<1x49xf32>, vector<49x128xf32>, vector<1x128xf32> -> vector<1x128xf32>
    %311 = arith.addf %306, %310 : vector<1x128xf32>
    %312 = vector.extract_strided_slice %260 {offsets = [10, 0], sizes = [1, 49], strides = [1, 1]} : vector<16x49xf32> to vector<1x49xf32>
    %c10 = arith.constant 10 : index
    %c0_193 = arith.constant 0 : index
    %c0_194 = arith.constant 0 : index
    %313 = vector.load %arg8[%c10, %c0_193, %c0_194] : memref<16x49x128xf32, #tpu.memory_space<vmem>>, vector<1x49x128xf32>
    %314 = vector.shape_cast %313 : vector<1x49x128xf32> to vector<49x128xf32>
    %cst_195 = arith.constant dense<0.000000e+00> : vector<1x128xf32>
    %315 = tpu.matmul %312, %314, %cst_195 {dimension_numbers = #tpu.dot_dimension_numbers<[1], [0], [0], [1], [0, 0, 1, 1], [], []>} : vector<1x49xf32>, vector<49x128xf32>, vector<1x128xf32> -> vector<1x128xf32>
    %316 = arith.addf %311, %315 : vector<1x128xf32>
    %317 = vector.extract_strided_slice %260 {offsets = [11, 0], sizes = [1, 49], strides = [1, 1]} : vector<16x49xf32> to vector<1x49xf32>
    %c11 = arith.constant 11 : index
    %c0_196 = arith.constant 0 : index
    %c0_197 = arith.constant 0 : index
    %318 = vector.load %arg8[%c11, %c0_196, %c0_197] : memref<16x49x128xf32, #tpu.memory_space<vmem>>, vector<1x49x128xf32>
    %319 = vector.shape_cast %318 : vector<1x49x128xf32> to vector<49x128xf32>
    %cst_198 = arith.constant dense<0.000000e+00> : vector<1x128xf32>
    %320 = tpu.matmul %317, %319, %cst_198 {dimension_numbers = #tpu.dot_dimension_numbers<[1], [0], [0], [1], [0, 0, 1, 1], [], []>} : vector<1x49xf32>, vector<49x128xf32>, vector<1x128xf32> -> vector<1x128xf32>
    %321 = arith.addf %316, %320 : vector<1x128xf32>
    %322 = vector.extract_strided_slice %260 {offsets = [12, 0], sizes = [1, 49], strides = [1, 1]} : vector<16x49xf32> to vector<1x49xf32>
    %c12 = arith.constant 12 : index
    %c0_199 = arith.constant 0 : index
    %c0_200 = arith.constant 0 : index
    %323 = vector.load %arg8[%c12, %c0_199, %c0_200] : memref<16x49x128xf32, #tpu.memory_space<vmem>>, vector<1x49x128xf32>
    %324 = vector.shape_cast %323 : vector<1x49x128xf32> to vector<49x128xf32>
    %cst_201 = arith.constant dense<0.000000e+00> : vector<1x128xf32>
    %325 = tpu.matmul %322, %324, %cst_201 {dimension_numbers = #tpu.dot_dimension_numbers<[1], [0], [0], [1], [0, 0, 1, 1], [], []>} : vector<1x49xf32>, vector<49x128xf32>, vector<1x128xf32> -> vector<1x128xf32>
    %326 = arith.addf %321, %325 : vector<1x128xf32>
    %327 = vector.extract_strided_slice %260 {offsets = [13, 0], sizes = [1, 49], strides = [1, 1]} : vector<16x49xf32> to vector<1x49xf32>
    %c13 = arith.constant 13 : index
    %c0_202 = arith.constant 0 : index
    %c0_203 = arith.constant 0 : index
    %328 = vector.load %arg8[%c13, %c0_202, %c0_203] : memref<16x49x128xf32, #tpu.memory_space<vmem>>, vector<1x49x128xf32>
    %329 = vector.shape_cast %328 : vector<1x49x128xf32> to vector<49x128xf32>
    %cst_204 = arith.constant dense<0.000000e+00> : vector<1x128xf32>
    %330 = tpu.matmul %327, %329, %cst_204 {dimension_numbers = #tpu.dot_dimension_numbers<[1], [0], [0], [1], [0, 0, 1, 1], [], []>} : vector<1x49xf32>, vector<49x128xf32>, vector<1x128xf32> -> vector<1x128xf32>
    %331 = arith.addf %326, %330 : vector<1x128xf32>
    %332 = vector.extract_strided_slice %260 {offsets = [14, 0], sizes = [1, 49], strides = [1, 1]} : vector<16x49xf32> to vector<1x49xf32>
    %c14 = arith.constant 14 : index
    %c0_205 = arith.constant 0 : index
    %c0_206 = arith.constant 0 : index
    %333 = vector.load %arg8[%c14, %c0_205, %c0_206] : memref<16x49x128xf32, #tpu.memory_space<vmem>>, vector<1x49x128xf32>
    %334 = vector.shape_cast %333 : vector<1x49x128xf32> to vector<49x128xf32>
    %cst_207 = arith.constant dense<0.000000e+00> : vector<1x128xf32>
    %335 = tpu.matmul %332, %334, %cst_207 {dimension_numbers = #tpu.dot_dimension_numbers<[1], [0], [0], [1], [0, 0, 1, 1], [], []>} : vector<1x49xf32>, vector<49x128xf32>, vector<1x128xf32> -> vector<1x128xf32>
    %336 = arith.addf %331, %335 : vector<1x128xf32>
    %337 = vector.extract_strided_slice %260 {offsets = [15, 0], sizes = [1, 49], strides = [1, 1]} : vector<16x49xf32> to vector<1x49xf32>
    %c15 = arith.constant 15 : index
    %c0_208 = arith.constant 0 : index
    %c0_209 = arith.constant 0 : index
    %338 = vector.load %arg8[%c15, %c0_208, %c0_209] : memref<16x49x128xf32, #tpu.memory_space<vmem>>, vector<1x49x128xf32>
    %339 = vector.shape_cast %338 : vector<1x49x128xf32> to vector<49x128xf32>
    %cst_210 = arith.constant dense<0.000000e+00> : vector<1x128xf32>
    %340 = tpu.matmul %337, %339, %cst_210 {dimension_numbers = #tpu.dot_dimension_numbers<[1], [0], [0], [1], [0, 0, 1, 1], [], []>} : vector<1x49xf32>, vector<49x128xf32>, vector<1x128xf32> -> vector<1x128xf32>
    %341 = arith.addf %336, %340 : vector<1x128xf32>
    %cst_211 = arith.constant 0.000000e+00 : f32
    %342 = vector.broadcast %cst_211 : f32 to vector<1x128xf32>
    %343 = arith.maximumf %341, %342 : vector<1x128xf32>
    %c0_212 = arith.constant 0 : index
    %c0_213 = arith.constant 0 : index
    %344 = vector.load %arg10[%c0_212, %c0_213] : memref<128x128xf32, #tpu.memory_space<vmem>>, vector<128x128xf32>
    %cst_214 = arith.constant dense<0.000000e+00> : vector<1x128xf32>
    %345 = tpu.matmul %343, %344, %cst_214 {dimension_numbers = #tpu.dot_dimension_numbers<[1], [0], [0], [1], [0, 0, 1, 1], [], []>} : vector<1x128xf32>, vector<128x128xf32>, vector<1x128xf32> -> vector<1x128xf32>
    %c0_215 = arith.constant 0 : index
    %c0_216 = arith.constant 0 : index
    %346 = vector.load %arg11[%c0_215, %c0_216] : memref<1x128xf32, #tpu.memory_space<vmem>>, vector<1x128xf32>
    %347 = arith.addf %345, %346 : vector<1x128xf32>
    %c0_217 = arith.constant 0 : index
    %c0_218 = arith.constant 0 : index
    %c0_219 = arith.constant 0 : index
    %348 = vector.load %arg12[%c0_217, %c0_218, %c0_219] : memref<1x1x128xf32, #tpu.memory_space<vmem>>, vector<1x1x128xf32>
    %349 = vector.shape_cast %348 : vector<1x1x128xf32> to vector<1x128xf32>
    %350 = vector.shape_cast %347 : vector<1x128xf32> to vector<1x1x128xf32>
    tpu.vector_store %arg12[%c0_217, %c0_218, %c0_219], %350 {strides = array<i32>} : memref<1x1x128xf32, #tpu.memory_space<vmem>>, vector<1x1x128xf32>,
    return
  }
  func.func @transform_0(%arg0: i32) -> (i32, i32, i32) {
    %c0_i32 = arith.constant 0 : i32
    %c0_i32_0 = arith.constant 0 : i32
    %c0_i32_1 = arith.constant 0 : i32
    return %arg0, %c0_i32, %c0_i32_0 : i32, i32, i32
  }
  func.func @transform_1(%arg0: i32) -> (i32, i32) {
    %c0_i32 = arith.constant 0 : i32
    %c0_i32_0 = arith.constant 0 : i32
    %c0_i32_1 = arith.constant 0 : i32
    return %c0_i32, %c0_i32_0 : i32, i32
  }
  func.func @transform_2(%arg0: i32) -> (i32, i32) {
    %c0_i32 = arith.constant 0 : i32
    %c0_i32_0 = arith.constant 0 : i32
    %c0_i32_1 = arith.constant 0 : i32
    return %c0_i32, %c0_i32_0 : i32, i32
  }
  func.func @transform_3(%arg0: i32) -> (i32, i32) {
    %c0_i32 = arith.constant 0 : i32
    %c0_i32_0 = arith.constant 0 : i32
    %c0_i32_1 = arith.constant 0 : i32
    return %c0_i32, %c0_i32_0 : i32, i32
  }
  func.func @transform_4(%arg0: i32) -> (i32, i32) {
    %c0_i32 = arith.constant 0 : i32
    %c0_i32_0 = arith.constant 0 : i32
    %c0_i32_1 = arith.constant 0 : i32
    return %c0_i32, %c0_i32_0 : i32, i32
  }
  func.func @transform_5(%arg0: i32) -> (i32, i32) {
    %c0_i32 = arith.constant 0 : i32
    %c0_i32_0 = arith.constant 0 : i32
    %c0_i32_1 = arith.constant 0 : i32
    return %c0_i32, %c0_i32_0 : i32, i32
  }
  func.func @transform_6(%arg0: i32) -> (i32, i32) {
    %c0_i32 = arith.constant 0 : i32
    %c0_i32_0 = arith.constant 0 : i32
    %c0_i32_1 = arith.constant 0 : i32
    return %c0_i32, %c0_i32_0 : i32, i32
  }
  func.func @transform_7(%arg0: i32) -> (i32, i32, i32) {
    %c0_i32 = arith.constant 0 : i32
    %c0_i32_0 = arith.constant 0 : i32
    %c0_i32_1 = arith.constant 0 : i32
    %c0_i32_2 = arith.constant 0 : i32
    return %c0_i32, %c0_i32_0, %c0_i32_1 : i32, i32, i32
  }
  func.func @transform_8(%arg0: i32) -> (i32, i32) {
    %c0_i32 = arith.constant 0 : i32
    %c0_i32_0 = arith.constant 0 : i32
    %c0_i32_1 = arith.constant 0 : i32
    return %c0_i32, %c0_i32_0 : i32, i32
  }
  func.func @transform_9(%arg0: i32) -> (i32, i32) {
    %c0_i32 = arith.constant 0 : i32
    %c0_i32_0 = arith.constant 0 : i32
    %c0_i32_1 = arith.constant 0 : i32
    return %c0_i32, %c0_i32_0 : i32, i32
  }
  func.func @transform_10(%arg0: i32) -> (i32, i32) {
    %c0_i32 = arith.constant 0 : i32
    %c0_i32_0 = arith.constant 0 : i32
    %c0_i32_1 = arith.constant 0 : i32
    return %c0_i32, %c0_i32_0 : i32, i32
  }
  func.func @transform_11(%arg0: i32) -> (i32, i32, i32) {
    %c0_i32 = arith.constant 0 : i32
    %c0_i32_0 = arith.constant 0 : i32
    %c0_i32_1 = arith.constant 0 : i32
    return %arg0, %c0_i32, %c0_i32_0 : i32, i32, i32
  }
}

</mosaic_0001>

<bundles_post_ra>
// kernel: fmnist_cnn_forward.1
= control target key start
LH: loop header
LB: loop body
LE: loop exit
PB: predicated region body
PF: predicated region fallthrough
CT: control target
= control target key end

     0   :  { %s8220_s0 = inlined_call_operand.vmem [shape: f32[2,1,1056], index: 0, kind: input, shape index: {}]   ;;  %s8221_s1 = inlined_call_operand.vmem [shape: f32[8,25], index: 1, kind: input, shape index: {}]   ;;  %s8222_s2 = inlined_call_operand.vmem [shape: f32[8,1], index: 2, kind: input, shape index: {}]   ;;  %s8223_s3 = inlined_call_operand.vmem [shape: f32[863,342], index: 3, kind: input, shape index: {}]   ;;  %s8224_s4 = inlined_call_operand.vmem [shape: f32[16,200], index: 4, kind: input, shape index: {}]   ;;  %s8225_s5 = inlined_call_operand.vmem [shape: f32[16,1], index: 5, kind: input, shape index: {}]   ;;  %s8226_s6 = inlined_call_operand.vmem [shape: f32[229,49], index: 6, kind: input, shape index: {}]   ;;  %s8227_s7 = inlined_call_operand.vmem [shape: f32[16,49,128], index: 7, kind: input, shape index: {}]   ;;  %s8228_s8 = inlined_call_operand.vmem [shape: f32[1,128], index: 8, kind: input, shape index: {}]   ;;  %s8229_s9 = inlined_call_operand.vmem [shape: f32[128,128], index: 9, kind: input, shape index: {}]   ;;  %s8230_s10 = inlined_call_operand.vmem [shape: f32[1,128], index: 10, kind: input, shape index: {}]   ;;  %s8231_s11 = inlined_call_operand.hbm [shape: f32[2,1,128], index: 11, kind: output, shape index: {}]  }
   0x1   :  { %8345 = sst [smem:[#allocation115_spill]] %s8220_s0 }
   0x2   :  { %8346 = sst [smem:[#allocation116_spill]] %s8221_s1 }
   0x3   :  { %8347 = sst [smem:[#allocation117_spill]] %s8222_s2 }
   0x4   :  { %16 = vsyncpa [#allocation7], 0 }
   0x5   :  { %18 = vsyncpa [#allocation7 + $0x1], 0  ;;  %s4602_s17 = smov 0   ;;  %s4604_s18 = smov 0  }
   0x6   :  { %s4606_s19 = smov 0   ;;  %s4608_s20 = smov 0  }
   0x7 LB: > { %s4623_s21 = sadd.s32 4294967295, %s4477_s20   ;;  %s4104_s22 = sadd.s32 4294967294, %s4477_s20   ;;  %s4477_s20 = sphi %s4608_s20, %s8604_s20   ;;  %s4473_s19 = sphi %s4606_s19, %s8603_s19   ;;  %s4469_s18 = sphi %s4604_s18, %s8602_s18   ;;  %s4465_s17 = sphi %s4602_s17, %s8601_s17  }
   0x8   : > { %s4627_s23 = sadd.s32 1, %s4477_s20   ;;  %s267_s24 = sadd.s32 1, %s4473_s19 }
   0x9   : > { %s264_s25 = ssub.s32 %s4477_s20, %s4627_s23  ;;  %p277_p0 = scmp.ne.s32.totalorder %s4473_s19, %s4469_s18 }
   0xa   : > { %p265_p1 = scmp.eq.s32.totalorder %s264_s25, 0  ;;  %p278_p2 = scmp.eq.s32.totalorder %s4623_s21, 1 }
   0xb   : > { %p283_p3 = scmp.ne.s32.totalorder %s4469_s18, %s4465_s17  ;;  %p284_p4 = scmp.eq.s32.totalorder %s4104_s22, 1 }
   0xc   : > { %s4638_s26 = scalar_select %p265_p1, %s4473_s19, %s267_s24  }
   0xd   : > { %p4640_p5 = por %p278_p2, %p277_p0  ;;  %p4644_p6 = por %p284_p4, %p283_p3 }
   0xe   : > { %p4107_p7 = scmp.ge.s32.totalorder %s4477_s20, 1  ;;  %p339_p8 = scmp.lt.s32.totalorder %s4477_s20, 3 }
  0x10   : > { %p340_p9 = pnand %p4107_p7, %p339_p8 }
  0x12   : > { %343 = sbr.rel (%p340_p9) target bundleno = 2295 (0x8f7), region = 64 }
  0x17   : > { %s8350_s1 = sld [smem:[#allocation116_spill]]  ;;  %v4479_v1 = vmov 1   ;;  %v4480_v2 = vmov 3   ;;  %v4481_v3 = vmov 5   ;;  %v4482_v4 = vmov 2   ;;  %p377_p10 = scmp.lt.s32.totalorder %s4623_s21, 1 }
  0x18   : > { %4363 = vset.pattern.permute.xlu0 %v4479_v1  ;;  %4365 = vset.pattern.permute.xlu1 %v4480_v2  ;;  %v4483_v5 = vmov 4   ;;  %v4484_v6 = vmov 6   ;;  %v4485_v7 = vmov 7   ;;  %v4486_v8 = vmov 8   ;;  %s8351_s0 = sld [smem:[#allocation115_spill]]  ;;  %s8335_s22 = smov 127  }
  0x19   : > { %4367 = vset.pattern.permute.xlu2 %v4481_v3  ;;  %v4487_v9 = vmov 9   ;;  %v4488_v10 = vmov 10   ;;  %v4489_v11 = vmov 11   ;;  %v4490_v12 = vmov 14   ;;  %s378_s12 = scalar_select %p377_p10, %s4623_s21, 1 }
  0x1a   : > { %v4491_v13 = vmov 12   ;;  %v4492_v14 = vmov 13   ;;  %v4493_v15 = vmov 19   ;;  %v4494_v16 = vmov 15   ;;  %s8327_s24 = smov 126   ;;  %s8337_s25 = smov 125  }
  0x1b   : > { %v4495_v17 = vmov 16   ;;  %v4496_v18 = vmov 17   ;;  %v4497_v19 = vmov 18   ;;  %v8233_v20 = vmov 0   ;;  %s4260_s13 = smul.u32 9, %s378_s12  ;;  %s8339_s29 = smov 124  }
  0x1c   : > { %v4499_v21 = vmov 21   ;;  %v4500_v22 = vmov 23   ;;  %v4501_v23 = vmov 22   ;;  %v4503_v34 = vmov 24   ;;  %s8284_s30 = smov 96   ;;  %s4508_s12 = smov 95  }
  0x1d   : > { %v4653_v0 = vld [vmem:[%s8350_s1] sm:$0xff]  ;;  %s8235_s14 = smov 93   ;;  %s8243_s15 = smov 92   ;;  %vm471_vm0 = vcmask 1039360   ;;  %vm8333_vm1 = vcmask 1031168   ;;  %vm587_vm2 = vcmask 1022976  }
  0x1e   : > { %419 = vperm.xlu0 %4363, %v4653_v0   ;;  %552 = vperm.xlu1 %4365, %v4653_v0   ;;  %s4685_s16 = scalar_lea.vmem %s8351_s0, %s4260_s13  ;;  %s8232_s13 = smov 94   ;;  %vm645_vm3 = vcmask 1014784   ;;  %vm703_vm4 = vcmask 785408   ;;  %vm761_vm5 = vcmask 777216   ;;  %vm819_vm6 = vcmask 769024  }
  0x1f   : > { %668 = vperm.xlu2 %4367, %v4653_v0   ;;  %v4688_v24 = vld [vmem:[%s4685_s16] sm:$0xff]  ;;  %vm877_vm7 = vcmask 760832   ;;  %vm8334_vm8 = vcmask 752640   ;;  %vm8332_vm9 = vcmask 523264   ;;  %vm8331_vm10 = vcmask 515072   ;;  %s8511_s2 = sld [smem:[#allocation117_spill]] }
  0x20   : > { %v4691_v25 = vperm.slane %v4688_v24, 4  ;;  %v4694_v26 = vperm.slane %v4688_v24, 3  ;;  %v4697_v27 = vperm.slane %v4688_v24, 2  ;;  %v4713_v33 = vperm.slane %v4688_v24, 5  ;;  %s4523_s0 = smov 74   ;;  %s4528_s1 = smov 106  }
  0x21   : > { %v4729_v40 = vperm.slane %v4688_v24, 0  ;;  %v4743_v45 = vperm.slane %v4688_v24, 6  ;;  %v4746_v46 = vperm.slane %v4688_v24, 1  ;;  %vm1109_vm11 = vcmask 506880  }
  0x22   : > { %vm1167_vm12 = vcmask 498688   ;;  %vm1225_vm13 = vcmask 490496   ;;  %vm1283_vm14 = vcmask 261120   ;;  %vm1341_vm15 = vcmask 252928  }
  0x26   : > { %4364 = vset.pattern.permute.xlu0 %v4482_v4  ;;  %4366 = vset.pattern.permute.xlu1 %v4483_v5 }
  0x27   : > { %494 = vperm.xlu0 %4364, %v4653_v0   ;;  %610 = vperm.xlu1 %4366, %v4653_v0  }
  0x28   : > { %4368 = vset.pattern.permute.xlu2 %v4484_v6 }
  0x29   : > { %726 = vperm.xlu2 %4368, %v4653_v0  }
  0x2f   : > { %4369 = vset.pattern.permute.xlu1 %v4485_v7  ;;  %4371 = vset.pattern.permute.xlu0 %v4487_v9 }
  0x30   : > { %784 = vperm.xlu1 %4369, %v4653_v0   ;;  %900 = vperm.xlu0 %4371, %v4653_v0  }
  0x31   : > { %4370 = vset.pattern.permute.xlu2 %v4486_v8 }
  0x32   : > { %842 = vperm.xlu2 %4370, %v4653_v0  }
  0x38   : > { %4372 = vset.pattern.permute.xlu1 %v4488_v10  ;;  %4376 = vset.pattern.permute.xlu0 %v4490_v12 }
  0x39   : > { %958 = vperm.xlu1 %4372, %v4653_v0   ;;  %1190 = vperm.xlu0 %4376, %v4653_v0  }
  0x3a   : > { %4373 = vset.pattern.permute.xlu2 %v4489_v11 }
  0x3b   : > { %1016 = vperm.xlu2 %4373, %v4653_v0  }
  0x41   : > { %4374 = vset.pattern.permute.xlu1 %v4491_v13  ;;  %4381 = vset.pattern.permute.xlu0 %v4493_v15 }
  0x42   : > { %1074 = vperm.xlu1 %4374, %v4653_v0   ;;  %1480 = vperm.xlu0 %4381, %v4653_v0  }
  0x43   : > { %4375 = vset.pattern.permute.xlu2 %v4492_v14 }
  0x44   : > { %1132 = vperm.xlu2 %4375, %v4653_v0  }
  0x4a   : > { %4377 = vset.pattern.permute.xlu1 %v4494_v16  ;;  %4386 = vset.pattern.permute.xlu0 %v4503_v34 }
  0x4b   : > { %1248 = vperm.xlu1 %4377, %v4653_v0  }
  0x4c   : > { %4378 = vset.pattern.permute.xlu2 %v4495_v17 }
  0x4d   : > { %1306 = vperm.xlu2 %4378, %v4653_v0  }
  0x53   : > { %4379 = vset.pattern.permute.xlu1 %v4496_v18 }
  0x54   : > { %1364 = vperm.xlu1 %4379, %v4653_v0  }
  0x55   : > { %4380 = vset.pattern.permute.xlu2 %v4497_v19 }
  0x56   : > { %1422 = vperm.xlu2 %4380, %v4653_v0  }
  0x5c   : > { %4382 = vset.pattern.permute.xlu1 %v8233_v20 }
  0x5d   : > { %385 = vperm.xlu1 %4382, %v4653_v0  }
  0x5e   : > { %4383 = vset.pattern.permute.xlu2 %v4499_v21 }
  0x5f   : > { %1573 = vperm.xlu2 %4383, %v4653_v0  }
  0x65   : > { %4385 = vset.pattern.permute.xlu1 %v4500_v22 }
  0x66   : > { %1704 = vperm.xlu1 %4385, %v4653_v0  }
  0x67   : > { %4384 = vset.pattern.permute.xlu2 %v4501_v23 }
  0x68   : > { %1647 = vperm.xlu2 %4384, %v4653_v0  }
  0x6e   : > { %4414 = vset.pattern.permute.xlu1 %v8233_v20 }
  0x79   : > { %v4709_v32 = vpop.permute.xlu2 %668 }
  0x7a   : > { %v673_v8 = vmul.f32 %v4709_v32, %v4697_v27  ;;  %v674_v11 = vmul.f32 %v4709_v32, %v4694_v26  ;;  %v675_v12 = vmul.f32 %v4709_v32, %v4691_v25  ;;  %v676_v13 = vmul.f32 %v4709_v32, %v4713_v33 }
  0x83   : > { %v4726_v39 = vpop.permute.xlu2 %726 }
  0x84   : > { %v731_v22 = vmul.f32 %v4726_v39, %v4697_v27  ;;  %v732_v23 = vmul.f32 %v4726_v39, %v4694_v26  ;;  %v734_v34 = vmul.f32 %v4726_v39, %v4713_v33 }
  0x8c   : > { %v4748_v47 = vpop.permute.xlu2 %842 }
  0x90   : > { %v4699_v28 = vpop.permute.xlu0 %419  ;;  %v4740_v44 = vpop.permute.xlu1 %552 }
  0x91   : > { %v443_v29 = vmul.f32 %v4691_v25, %v4699_v28  ;;  %v442_v30 = vmul.f32 %v4694_v26, %v4699_v28  ;;  %v441_v31 = vmul.f32 %v4697_v27, %v4699_v28  ;;  %v444_v36 = vmul.f32 %v4713_v33, %v4699_v28 }
  0x92   : > { %v439_v43 = vmul.f32 %v4729_v40, %v4699_v28  ;;  %v557_v48 = vmul.f32 %v4740_v44, %v4697_v27  ;;  %v445_v49 = vmul.f32 %v4743_v45, %v4699_v28  ;;  %v440_v50 = vmul.f32 %v4746_v46, %v4699_v28 }
  0x93   : > { %463 = vrot.lane.b32.xlu0 %v443_v29, %s8335_s22  ;;  %461 = vrot.lane.b32.xlu2 %v442_v30, %s8335_s22  ;;  %v559_v51 = vmul.f32 %v4740_v44, %v4691_v25  ;;  %v560_v52 = vmul.f32 %v4740_v44, %v4713_v33  ;;  %v558_v53 = vmul.f32 %v4740_v44, %v4694_v26 }
  0x94   : > { %459 = vrot.lane.b32.xlu1 %v441_v31, %s8335_s22  ;;  %v555_v4 = vmul.f32 %v4740_v44, %v4729_v40  ;;  %v556_v6 = vmul.f32 %v4740_v44, %v4746_v46  ;;  %v561_v7 = vmul.f32 %v4740_v44, %v4743_v45  ;;  %v733_v29 = vmul.f32 %v4726_v39, %v4691_v25 }
  0x95   : > { %v4765_v54 = vpop.permute.xlu2 %1016 }
  0x99   : > { %v4715_v35 = vpop.permute.xlu0 %494  ;;  %v4770_v55 = vpop.permute.xlu1 %610 }
  0x9a   : > { %v501_v37 = vmul.f32 %v4715_v35, %v4691_v25  ;;  %v499_v38 = vmul.f32 %v4715_v35, %v4697_v27  ;;  %v500_v41 = vmul.f32 %v4715_v35, %v4694_v26  ;;  %v502_v42 = vmul.f32 %v4715_v35, %v4713_v33 }
  0x9b   : > { %v497_v56 = vmul.f32 %v4715_v35, %v4729_v40  ;;  %v498_v57 = vmul.f32 %v4715_v35, %v4746_v46  ;;  %v503_v60 = vmul.f32 %v4715_v35, %v4743_v45  ;;  %v615_v61 = vmul.f32 %v4770_v55, %v4697_v27 }
  0x9c   : > { %465 = vrot.lane.b32.xlu1 %v444_v36, %s8335_s22  ;;  %521 = vrot.lane.b32.xlu2 %v501_v37, %s8327_s24  ;;  %v616_v62 = vmul.f32 %v4770_v55, %v4694_v26  ;;  %v617_v1 = vmul.f32 %v4770_v55, %v4691_v25  ;;  %v618_v2 = vmul.f32 %v4770_v55, %v4713_v33 }
  0x9d   : > { %517 = vrot.lane.b32.xlu0 %v499_v38, %s8327_s24  ;;  %v613_v15 = vmul.f32 %v4770_v55, %v4729_v40  ;;  %v614_v16 = vmul.f32 %v4770_v55, %v4746_v46  ;;  %v619_v17 = vmul.f32 %v4770_v55, %v4743_v45  ;;  %v671_v37 = vmul.f32 %v4709_v32, %v4729_v40 }
  0x9e   : > { %v4776_v58 = vpop.permute.xlu2 %1132  ;;  %v672_v38 = vmul.f32 %v4709_v32, %v4746_v46 }
  0xa2   : > { %v4781_v59 = vpop.permute.xlu1 %784  ;;  %v4842_v19 = vpop.permute.xlu0 %900 }
  0xa3   : > { %v909_v20 = vmul.f32 %v4842_v19, %v4743_v45 }
  0xa4   : > { %519 = vrot.lane.b32.xlu1 %v500_v41, %s8327_s24  ;;  %455 = vrot.lane.b32.xlu2 %v439_v43, %s8335_s22  ;;  %v789_v43 = vmul.f32 %v4781_v59, %v4697_v27 }
  0xa5   : > { %523 = vrot.lane.b32.xlu0 %v502_v42, %s8327_s24  ;;  %v677_v42 = vmul.f32 %v4709_v32, %v4743_v45 }
  0xa7   : > { %v4792_v63 = vpop.permute.xlu2 %1306 }
  0xa8   : > { %8352 = vst [vmem:[#allocation9_spill] sm:$0xff] %v4792_v63 }
  0xab   : > { %v4798_v3 = vpop.permute.xlu1 %958  ;;  %v4857_v31 = vpop.permute.xlu0 %1190 }
  0xac   : > { %467 = vrot.lane.b32.xlu1 %v445_v49, %s8335_s22  ;;  %575 = vrot.lane.b32.xlu2 %v557_v48, %s8337_s25  ;;  %v790_v48 = vmul.f32 %v4781_v59, %v4694_v26 }
  0xad   : > { %457 = vrot.lane.b32.xlu0 %v440_v50, %s8335_s22 }
  0xb0   : > { %v4805_v5 = vpop.permute.xlu2 %1422 }
  0xb1   : > { %8353 = vst [vmem:[#allocation10_spill] sm:$0xff] %v4805_v5 }
  0xb4   : > { %579 = vrot.lane.b32.xlu1 %v559_v51, %s8337_s25  ;;  %581 = vrot.lane.b32.xlu2 %v560_v52, %s8337_s25  ;;  %v4815_v9 = vpop.permute.xlu1 %1074  ;;  %v4878_v49 = vpop.permute.xlu0 %1480  ;;  %v791_v52 = vmul.f32 %v4781_v59, %v4691_v25 }
  0xb5   : > { %577 = vrot.lane.b32.xlu0 %v558_v53, %s8337_s25  ;;  %8356 = vst [vmem:[#allocation13_spill] sm:$0xff] %v4878_v49  ;;  %v792_v53 = vmul.f32 %v4781_v59, %v4713_v33 }
  0xb9   : > { %v4818_v10 = vpop.permute.xlu2 %1573 }
  0xbc   : > { %513 = vrot.lane.b32.xlu1 %v497_v56, %s8327_s24  ;;  %515 = vrot.lane.b32.xlu2 %v498_v57, %s8327_s24  ;;  %v729_v56 = vmul.f32 %v4726_v39, %v4729_v40 }
  0xbd   : > { %1761 = vperm.xlu0 %4386, %v4653_v0   ;;  %v4829_v14 = vpop.permute.xlu1 %1248 }
  0xbe   : > { %8354 = vst [vmem:[#allocation11_spill] sm:$0xff] %v4829_v14 }
  0xc2   : > { %v4837_v18 = vpop.permute.xlu2 %1647 }
  0xc3   : > { %8355 = vst [vmem:[#allocation12_spill] sm:$0xff] %v4837_v18 }
  0xc4   : > { %525 = vrot.lane.b32.xlu1 %v503_v60, %s8327_s24  ;;  %633 = vrot.lane.b32.xlu2 %v615_v61, %s8339_s29 }
  0xc5   : > { %635 = vrot.lane.b32.xlu0 %v616_v62, %s8339_s29  ;;  %v730_v62 = vmul.f32 %v4726_v39, %v4746_v46 }
  0xc6   : > { %v4844_v21 = vpop.permute.xlu1 %1364 }
  0xcc   : > { %637 = vrot.lane.b32.xlu1 %v617_v1, %s8339_s29  ;;  %639 = vrot.lane.b32.xlu2 %v618_v2, %s8339_s29  ;;  %v735_v1 = vmul.f32 %v4726_v39, %v4743_v45  ;;  %v847_v2 = vmul.f32 %v4748_v47, %v4697_v27 }
  0xcd   : > { %571 = vrot.lane.b32.xlu0 %v555_v4, %s8337_s25 }
  0xcf   : > { %v4861_v36 = vpop.permute.xlu1 %385 }
  0xd4   : > { %573 = vrot.lane.b32.xlu1 %v556_v6, %s8337_s25  ;;  %583 = vrot.lane.b32.xlu2 %v561_v7, %s8337_s25 }
  0xd5   : > { %691 = vrot.lane.b32.xlu0 %v673_v8, %s8284_s30  ;;  %v848_v8 = vmul.f32 %v4748_v47, %v4694_v26 }
  0xd8   : > { %v4882_v50 = vpop.permute.xlu1 %1704 }
  0xd9   : > { %8357 = vst [vmem:[#allocation14_spill] sm:$0xff] %v4882_v50 }
  0xdc   : > { %693 = vrot.lane.b32.xlu1 %v674_v11, %s8284_s30  ;;  %695 = vrot.lane.b32.xlu2 %v675_v12, %s8284_s30  ;;  %v849_v11 = vmul.f32 %v4748_v47, %v4691_v25  ;;  %v850_v12 = vmul.f32 %v4748_v47, %v4713_v33 }
  0xdd   : > { %697 = vrot.lane.b32.xlu0 %v676_v13, %s8284_s30 }
  0xe4   : > { %629 = vrot.lane.b32.xlu1 %v613_v15, %s8339_s29  ;;  %631 = vrot.lane.b32.xlu2 %v614_v16, %s8339_s29 }
  0xe5   : > { %641 = vrot.lane.b32.xlu0 %v619_v17, %s8339_s29  ;;  %v787_v17 = vmul.f32 %v4781_v59, %v4729_v40 }
  0xec   : > { %749 = vrot.lane.b32.xlu1 %v731_v22, %s4508_s12  ;;  %751 = vrot.lane.b32.xlu2 %v732_v23, %s4508_s12  ;;  %v788_v22 = vmul.f32 %v4781_v59, %v4746_v46  ;;  %v793_v23 = vmul.f32 %v4781_v59, %v4743_v45 }
  0xed   : > { %753 = vrot.lane.b32.xlu0 %v733_v29, %s4508_s12  ;;  %v4855_v30 = vpop.permute.xlu2 %461 }
  0xf4   : > { %755 = vrot.lane.b32.xlu1 %v734_v34, %s4508_s12  ;;  %687 = vrot.lane.b32.xlu2 %v671_v37, %s8284_s30 }
  0xf5   : > { %689 = vrot.lane.b32.xlu0 %v672_v38, %s8284_s30  ;;  %v905_v38 = vmul.f32 %v4842_v19, %v4697_v27 }
  0xf6   : > { %v4870_v41 = vpop.permute.xlu2 %521 }
  0xfc   : > { %699 = vrot.lane.b32.xlu1 %v677_v42, %s8284_s30  ;;  %807 = vrot.lane.b32.xlu2 %v789_v43, %s8232_s13  ;;  %v906_v42 = vmul.f32 %v4842_v19, %v4694_v26  ;;  %v907_v43 = vmul.f32 %v4842_v19, %v4691_v25 }
  0xfd   : > { %809 = vrot.lane.b32.xlu0 %v790_v48, %s8232_s13 }
  0xfe   : > { %v4885_v51 = vpop.permute.xlu2 %455 }
 0x104   : > { %811 = vrot.lane.b32.xlu1 %v791_v52, %s8232_s13  ;;  %813 = vrot.lane.b32.xlu2 %v792_v53, %s8232_s13 }
 0x105   : > { %745 = vrot.lane.b32.xlu0 %v729_v56, %s4508_s12  ;;  %v4896_v57 = vpop.permute.xlu0 %463  ;;  %v908_v56 = vmul.f32 %v4842_v19, %v4713_v33 }
 0x106   : > { %v4898_v60 = vpop.permute.xlu1 %459  ;;  %v4900_v61 = vpop.permute.xlu2 %575 }
 0x10c   : > { %747 = vrot.lane.b32.xlu1 %v730_v62, %s4508_s12  ;;  %757 = vrot.lane.b32.xlu2 %v735_v1, %s4508_s12  ;;  %v845_v62 = vmul.f32 %v4748_v47, %v4729_v40  ;;  %v846_v1 = vmul.f32 %v4748_v47, %v4746_v46 }
 0x10d   : > { %865 = vrot.lane.b32.xlu0 %v847_v2, %s8235_s14 }
 0x10e   : > { %v4911_v4 = vpop.permute.xlu1 %465  ;;  %v4913_v6 = vpop.permute.xlu2 %581 }
 0x10f   : > { %v4915_v7 = vpop.permute.xlu0 %517 }
 0x114   : > { %867 = vrot.lane.b32.xlu1 %v848_v8, %s8235_s14  ;;  %869 = vrot.lane.b32.xlu2 %v849_v11, %s8235_s14 }
 0x115   : > { %871 = vrot.lane.b32.xlu0 %v850_v12, %s8235_s14  ;;  %v851_v12 = vmul.f32 %v4748_v47, %v4743_v45 }
 0x116   : > { %v4926_v13 = vpop.permute.xlu1 %519  ;;  %v4928_v15 = vpop.permute.xlu2 %515 }
 0x117   : > { %v4930_v16 = vpop.permute.xlu0 %523 }
 0x11c   : > { %803 = vrot.lane.b32.xlu1 %v787_v17, %s8232_s13  ;;  %805 = vrot.lane.b32.xlu2 %v788_v22, %s8232_s13  ;;  %v963_v17 = vmul.f32 %v4798_v3, %v4697_v27  ;;  %v964_v22 = vmul.f32 %v4798_v3, %v4694_v26 }
 0x11d   : > { %815 = vrot.lane.b32.xlu0 %v793_v23, %s8232_s13  ;;  %s8250_s13 = smov 64  }
 0x11e   : > { %v4941_v29 = vpop.permute.xlu1 %467  ;;  %v4943_v34 = vpop.permute.xlu2 %633 }
 0x11f   : > { %v4945_v37 = vpop.permute.xlu0 %457 }
 0x124   : > { %923 = vrot.lane.b32.xlu1 %v905_v38, %s8243_s15  ;;  %925 = vrot.lane.b32.xlu2 %v906_v42, %s8243_s15 }
 0x125   : > { %927 = vrot.lane.b32.xlu0 %v907_v43, %s8243_s15  ;;  %v965_v43 = vmul.f32 %v4798_v3, %v4691_v25 }
 0x126   : > { %v4956_v48 = vpop.permute.xlu1 %579  ;;  %v4958_v52 = vpop.permute.xlu2 %639 }
 0x127   : > { %8358 = vst [vmem:[#allocation15_spill] sm:$0xff] %v4958_v52  ;;  %v4960_v53 = vpop.permute.xlu0 %577  ;;  %v962_v52 = vmul.f32 %v4798_v3, %v4746_v46 }
 0x12c   : > { %929 = vrot.lane.b32.xlu1 %v908_v56, %s8243_s15  ;;  %861 = vrot.lane.b32.xlu2 %v845_v62, %s8235_s14  ;;  %v966_v56 = vmul.f32 %v4798_v3, %v4713_v33  ;;  %v903_v62 = vmul.f32 %v4842_v19, %v4729_v40 }
 0x12d   : > { %863 = vrot.lane.b32.xlu0 %v846_v1, %s8235_s14 }
 0x12e   : > { %v4971_v2 = vpop.permute.xlu1 %513  ;;  %v4973_v8 = vpop.permute.xlu2 %583 }
 0x12f   : > { %v4975_v11 = vpop.permute.xlu0 %1761 }
 0x134   : > { %873 = vrot.lane.b32.xlu1 %v851_v12, %s8235_s14  ;;  %981 = vrot.lane.b32.xlu2 %v963_v17, %s8250_s13  ;;  %s8258_s14 = smov 63  }
 0x135   : > { %983 = vrot.lane.b32.xlu0 %v964_v22, %s8250_s13  ;;  %v904_v22 = vmul.f32 %v4842_v19, %v4746_v46 }
 0x136   : > { %v4986_v23 = vpop.permute.xlu1 %525  ;;  %v4988_v38 = vpop.permute.xlu2 %695 }
 0x137   : > { %8359 = vst [vmem:[#allocation16_spill] sm:$0xff] %v4988_v38  ;;  %v4990_v42 = vpop.permute.xlu0 %635  ;;  %v1021_v38 = vmul.f32 %v4765_v54, %v4697_v27 }
 0x13c   : > { %985 = vrot.lane.b32.xlu1 %v965_v43, %s8250_s13  ;;  %987 = vrot.lane.b32.xlu2 %v966_v56, %s8250_s13 }
 0x13d   : > { %919 = vrot.lane.b32.xlu0 %v903_v62, %s8243_s15 }
 0x13e   : > { %v5001_v1 = vpop.permute.xlu1 %637  ;;  %v5003_v12 = vpop.permute.xlu2 %631 }
 0x13f   : > { %8360 = vst [vmem:[#allocation17_spill] sm:$0xff] %v5001_v1  ;;  %v5005_v17 = vpop.permute.xlu0 %571  ;;  %v967_v1 = vmul.f32 %v4798_v3, %v4743_v45 }
 0x140   : > { %8361 = vst [vmem:[#allocation18_spill] sm:$0xff] %v5003_v12  ;;  %v1022_v12 = vmul.f32 %v4765_v54, %v4694_v26 }
 0x141   : > { %8362 = vst [vmem:[#allocation19_spill] sm:$0xff] %v5005_v17  ;;  %v1023_v17 = vmul.f32 %v4765_v54, %v4691_v25 }
 0x144   : > { %921 = vrot.lane.b32.xlu1 %v904_v22, %s8243_s15  ;;  %931 = vrot.lane.b32.xlu2 %v909_v20, %s8243_s15  ;;  %v1024_v22 = vmul.f32 %v4765_v54, %v4713_v33  ;;  %s8263_s15 = smov 62  }
 0x145   : > { %1039 = vrot.lane.b32.xlu0 %v1021_v38, %s8258_s14 }
 0x146   : > { %v5016_v43 = vpop.permute.xlu1 %573  ;;  %v5018_v56 = vpop.permute.xlu2 %751 }
 0x147   : > { %8363 = vst [vmem:[#allocation20_spill] sm:$0xff] %v5018_v56  ;;  %v5020_v62 = vpop.permute.xlu0 %691 }
 0x148   : > { %8364 = vst [vmem:[#allocation21_spill] sm:$0xff] %v5020_v62  ;;  %v961_v62 = vmul.f32 %v4798_v3, %v4729_v40 }
 0x14c   : > { %1041 = vrot.lane.b32.xlu1 %v1022_v12, %s8258_s14  ;;  %1043 = vrot.lane.b32.xlu2 %v1023_v17, %s8258_s14 }
 0x14d   : > { %1045 = vrot.lane.b32.xlu0 %v1024_v22, %s8258_s14 }
 0x14e   : > { %v5031_v20 = vpop.permute.xlu1 %693  ;;  %v5033_v38 = vpop.permute.xlu2 %687 }
 0x14f   : > { %8365 = vst [vmem:[#allocation22_spill] sm:$0xff] %v5031_v20  ;;  %v5035_v56 = vpop.permute.xlu0 %697  ;;  %v1081_v20 = vmul.f32 %v4815_v9, %v4691_v25 }
 0x150   : > { %8366 = vst [vmem:[#allocation23_spill] sm:$0xff] %v5033_v38  ;;  %v1079_v38 = vmul.f32 %v4815_v9, %v4697_v27 }
 0x151   : > { %8367 = vst [vmem:[#allocation24_spill] sm:$0xff] %v5035_v56  ;;  %v1080_v56 = vmul.f32 %v4815_v9, %v4694_v26 }
 0x154   : > { %977 = vrot.lane.b32.xlu1 %v961_v62, %s8250_s13  ;;  %979 = vrot.lane.b32.xlu2 %v962_v52, %s8250_s13 }
 0x155   : > { %989 = vrot.lane.b32.xlu0 %v967_v1, %s8250_s13  ;;  %s8271_s13 = smov 61  }
 0x156   : > { %v5046_v12 = vpop.permute.xlu1 %629  ;;  %v5048_v17 = vpop.permute.xlu2 %807 }
 0x157   : > { %8368 = vst [vmem:[#allocation25_spill] sm:$0xff] %v5046_v12  ;;  %v5050_v22 = vpop.permute.xlu0 %641  ;;  %v1020_v12 = vmul.f32 %v4765_v54, %v4746_v46 }
 0x158   : > { %8369 = vst [vmem:[#allocation26_spill] sm:$0xff] %v5048_v17  ;;  %v1082_v17 = vmul.f32 %v4815_v9, %v4713_v33 }
 0x159   : > { %8370 = vst [vmem:[#allocation27_spill] sm:$0xff] %v5050_v22  ;;  %v1019_v22 = vmul.f32 %v4765_v54, %v4729_v40 }
 0x15c   : > { %1097 = vrot.lane.b32.xlu1 %v1079_v38, %s8263_s15  ;;  %1099 = vrot.lane.b32.xlu2 %v1080_v56, %s8263_s15 }
 0x15d   : > { %1101 = vrot.lane.b32.xlu0 %v1081_v20, %s8263_s15 }
 0x15e   : > { %v5061_v52 = vpop.permute.xlu1 %749  ;;  %v5063_v1 = vpop.permute.xlu2 %813 }
 0x15f   : > { %8371 = vst [vmem:[#allocation28_spill] sm:$0xff] %v5061_v52  ;;  %v5065_v62 = vpop.permute.xlu0 %753  ;;  %v1138_v52 = vmul.f32 %v4776_v58, %v4694_v26 }
 0x160   : > { %8372 = vst [vmem:[#allocation29_spill] sm:$0xff] %v5063_v1  ;;  %v1025_v1 = vmul.f32 %v4765_v54, %v4743_v45 }
 0x161   : > { %8373 = vst [vmem:[#allocation30_spill] sm:$0xff] %v5065_v62  ;;  %v1137_v62 = vmul.f32 %v4776_v58, %v4697_v27 }
 0x164   : > { %1103 = vrot.lane.b32.xlu1 %v1082_v17, %s8263_s15  ;;  %1035 = vrot.lane.b32.xlu2 %v1019_v22, %s8258_s14 }
 0x165   : > { %1037 = vrot.lane.b32.xlu0 %v1020_v12, %s8258_s14 }
 0x166   : > { %v5076_v56 = vpop.permute.xlu1 %755  ;;  %v5078_v20 = vpop.permute.xlu2 %757 }
 0x167   : > { %8374 = vst [vmem:[#allocation31_spill] sm:$0xff] %v5076_v56  ;;  %v5080_v38 = vpop.permute.xlu0 %689  ;;  %v1139_v56 = vmul.f32 %v4776_v58, %v4691_v25 }
 0x168   : > { %8375 = vst [vmem:[#allocation32_spill] sm:$0xff] %v5078_v20  ;;  %v5098_v20 = vperm.slane %v4688_v24, 7 }
 0x16c   : > { %1047 = vrot.lane.b32.xlu1 %v1025_v1, %s8258_s14  ;;  %1155 = vrot.lane.b32.xlu2 %v1137_v62, %s8271_s13  ;;  %v1140_v1 = vmul.f32 %v4776_v58, %v4713_v33  ;;  %v446_v62 = vmul.f32 %v5098_v20, %v4699_v28  ;;  %v1083_v28 = vmul.f32 %v4815_v9, %v4743_v45  ;;  %s8279_s14 = smov 60  }
 0x16d   : > { %1157 = vrot.lane.b32.xlu0 %v1138_v52, %s8271_s13 }
 0x16e   : > { %v5091_v12 = vpop.permute.xlu1 %699  ;;  %v5093_v17 = vpop.permute.xlu2 %869 }
 0x16f   : > { %8376 = vst [vmem:[#allocation33_spill] sm:$0xff] %v5091_v12  ;;  %v5095_v22 = vpop.permute.xlu0 %809  ;;  %v1078_v12 = vmul.f32 %v4815_v9, %v4746_v46 }
 0x170   : > { %8377 = vst [vmem:[#allocation34_spill] sm:$0xff] %v5093_v17 }
 0x171   : > { %8378 = vst [vmem:[#allocation35_spill] sm:$0xff] %v5095_v22  ;;  %v1077_v22 = vmul.f32 %v4815_v9, %v4729_v40 }
 0x174   : > { %1159 = vrot.lane.b32.xlu1 %v1139_v56, %s8271_s13  ;;  %1161 = vrot.lane.b32.xlu2 %v1140_v1, %s8271_s13 }
 0x175   : > { %469 = vrot.lane.b32.xlu0 %v446_v62, %s8335_s22 }
 0x176   : > { %v5109_v52 = vpop.permute.xlu1 %811  ;;  %v5111_v17 = vpop.permute.xlu2 %805 }
 0x177   : > { %8379 = vst [vmem:[#allocation36_spill] sm:$0xff] %v5109_v52  ;;  %v5113_v24 = vpop.permute.xlu0 %745  ;;  %v1197_v52 = vmul.f32 %v4857_v31, %v4691_v25 }
 0x178   : > { %8380 = vst [vmem:[#allocation37_spill] sm:$0xff] %v5111_v17  ;;  %v1195_v17 = vmul.f32 %v4857_v31, %v4697_v27 }
 0x179   : > { %8381 = vst [vmem:[#allocation38_spill] sm:$0xff] %v5113_v24  ;;  %v1196_v24 = vmul.f32 %v4857_v31, %v4694_v26 }
 0x17c   : > { %1093 = vrot.lane.b32.xlu1 %v1077_v22, %s8263_s15  ;;  %1095 = vrot.lane.b32.xlu2 %v1078_v12, %s8263_s15 }
 0x17d   : > { %1105 = vrot.lane.b32.xlu0 %v1083_v28, %s8263_s15  ;;  %s8297_s15 = smov 32  }
 0x17e   : > { %v5124_v56 = vpop.permute.xlu1 %747  ;;  %v5126_v1 = vpop.permute.xlu2 %925 }
 0x17f   : > { %8382 = vst [vmem:[#allocation39_spill] sm:$0xff] %v5124_v56  ;;  %v5128_v62 = vpop.permute.xlu0 %865  ;;  %v1135_v56 = vmul.f32 %v4776_v58, %v4729_v40 }
 0x180   : > { %8383 = vst [vmem:[#allocation40_spill] sm:$0xff] %v5126_v1  ;;  %v1198_v1 = vmul.f32 %v4857_v31, %v4713_v33 }
 0x181   : > { %8384 = vst [vmem:[#allocation41_spill] sm:$0xff] %v5128_v62  ;;  %v504_v62 = vmul.f32 %v4715_v35, %v5098_v20  ;;  %v1141_v35 = vmul.f32 %v4776_v58, %v4743_v45 }
 0x184   : > { %1213 = vrot.lane.b32.xlu1 %v1195_v17, %s8279_s14  ;;  %1215 = vrot.lane.b32.xlu2 %v1196_v24, %s8279_s14 }
 0x185   : > { %1217 = vrot.lane.b32.xlu0 %v1197_v52, %s8279_s14 }
 0x186   : > { %v5139_v12 = vpop.permute.xlu1 %867  ;;  %v5141_v22 = vpop.permute.xlu2 %861 }
 0x187   : > { %8385 = vst [vmem:[#allocation42_spill] sm:$0xff] %v5141_v22  ;;  %v5143_v28 = vpop.permute.xlu0 %871  ;;  %v1136_v22 = vmul.f32 %v4776_v58, %v4746_v46 }
 0x188   : > { %8386 = vst [vmem:[#allocation43_spill] sm:$0xff] %v5143_v28  ;;  %v1253_v28 = vmul.f32 %v4829_v14, %v4697_v27 }
 0x18c   : > { %1219 = vrot.lane.b32.xlu1 %v1198_v1, %s8279_s14  ;;  %527 = vrot.lane.b32.xlu2 %v504_v62, %s8327_s24 }
 0x18d   : > { %1151 = vrot.lane.b32.xlu0 %v1135_v56, %s8271_s13 }
 0x18e   : > { %v5154_v17 = vpop.permute.xlu1 %803  ;;  %v5156_v52 = vpop.permute.xlu2 %981 }
 0x18f   : > { %8387 = vst [vmem:[#allocation44_spill] sm:$0xff] %v5154_v17  ;;  %v5158_v24 = vpop.permute.xlu0 %815  ;;  %v1194_v17 = vmul.f32 %v4857_v31, %v4746_v46 }
 0x190   : > { %8388 = vst [vmem:[#allocation45_spill] sm:$0xff] %v5156_v52  ;;  %v1254_v52 = vmul.f32 %v4829_v14, %v4694_v26 }
 0x191   : > { %8389 = vst [vmem:[#allocation46_spill] sm:$0xff] %v5158_v24  ;;  %v1255_v24 = vmul.f32 %v4829_v14, %v4691_v25 }
 0x194   : > { %1153 = vrot.lane.b32.xlu1 %v1136_v22, %s8271_s13  ;;  %1163 = vrot.lane.b32.xlu2 %v1141_v35, %s8271_s13  ;;  %v1256_v22 = vmul.f32 %v4829_v14, %v4713_v33  ;;  %s8296_s13 = smov 31  }
 0x195   : > { %1271 = vrot.lane.b32.xlu0 %v1253_v28, %s8297_s15 }
 0x196   : > { %v5169_v56 = vpop.permute.xlu1 %923  ;;  %v5171_v1 = vpop.permute.xlu2 %987 }
 0x197   : > { %8390 = vst [vmem:[#allocation47_spill] sm:$0xff] %v5169_v56  ;;  %v5173_v62 = vpop.permute.xlu0 %927  ;;  %v1193_v56 = vmul.f32 %v4857_v31, %v4729_v40 }
 0x198   : > { %8391 = vst [vmem:[#allocation48_spill] sm:$0xff] %v5171_v1 }
 0x199   : > { %8392 = vst [vmem:[#allocation49_spill] sm:$0xff] %v5173_v62  ;;  %v562_v62 = vmul.f32 %v4740_v44, %v5098_v20  ;;  %v1199_v44 = vmul.f32 %v4857_v31, %v4743_v45 }
 0x19c   : > { %1273 = vrot.lane.b32.xlu1 %v1254_v52, %s8297_s15  ;;  %1275 = vrot.lane.b32.xlu2 %v1255_v24, %s8297_s15 }
 0x19d   : > { %1277 = vrot.lane.b32.xlu0 %v1256_v22, %s8297_s15 }
 0x19e   : > { %v5184_v28 = vpop.permute.xlu1 %929  ;;  %v5186_v35 = vpop.permute.xlu2 %931 }
 0x19f   : > { %8393 = vst [vmem:[#allocation50_spill] sm:$0xff] %v5184_v28  ;;  %v5188_v1 = vpop.permute.xlu0 %863  ;;  %v1312_v28 = vmul.f32 %v4792_v63, %v4694_v26 }
 0x1a0   : > { %8394 = vst [vmem:[#allocation51_spill] sm:$0xff] %v5186_v35  ;;  %v1311_v35 = vmul.f32 %v4792_v63, %v4697_v27 }
 0x1a4   : > { %585 = vrot.lane.b32.xlu1 %v562_v62, %s8337_s25  ;;  %1209 = vrot.lane.b32.xlu2 %v1193_v56, %s8279_s14 }
 0x1a5   : > { %1211 = vrot.lane.b32.xlu0 %v1194_v17, %s8279_s14 }
 0x1a6   : > { %v5199_v52 = vpop.permute.xlu1 %873  ;;  %v5201_v24 = vpop.permute.xlu2 %1043 }
 0x1a7   : > { %8395 = vst [vmem:[#allocation52_spill] sm:$0xff] %v5201_v24  ;;  %v5203_v22 = vpop.permute.xlu0 %983  ;;  %v1313_v24 = vmul.f32 %v4792_v63, %v4691_v25 }
 0x1a8   : > { %8396 = vst [vmem:[#allocation53_spill] sm:$0xff] %v5203_v22  ;;  %v1314_v22 = vmul.f32 %v4792_v63, %v4713_v33 }
 0x1ac   : > { %1221 = vrot.lane.b32.xlu1 %v1199_v44, %s8279_s14  ;;  %1329 = vrot.lane.b32.xlu2 %v1311_v35, %s8296_s13  ;;  %v620_v44 = vmul.f32 %v4770_v55, %v5098_v20  ;;  %v1257_v55 = vmul.f32 %v4829_v14, %v4743_v45  ;;  %s4519_s14 = smov 30  }
 0x1ad   : > { %1331 = vrot.lane.b32.xlu0 %v1312_v28, %s8296_s13 }
 0x1ae   : > { %v5214_v17 = vpop.permute.xlu1 %985  ;;  %v5216_v56 = vpop.permute.xlu2 %979 }
 0x1af   : > { %8397 = vst [vmem:[#allocation54_spill] sm:$0xff] %v5214_v17  ;;  %v5218_v62 = vpop.permute.xlu0 %919  ;;  %v1252_v17 = vmul.f32 %v4829_v14, %v4746_v46 }
 0x1b0   : > { %8398 = vst [vmem:[#allocation55_spill] sm:$0xff] %v5216_v56 }
 0x1b1   : > { %8399 = vst [vmem:[#allocation56_spill] sm:$0xff] %v5218_v62  ;;  %v1251_v62 = vmul.f32 %v4829_v14, %v4729_v40  ;;  %v1371_v14 = vmul.f32 %v4844_v21, %v4691_v25 }
 0x1b4   : > { %1333 = vrot.lane.b32.xlu1 %v1313_v24, %s8296_s13  ;;  %1335 = vrot.lane.b32.xlu2 %v1314_v22, %s8296_s13 }
 0x1b5   : > { %643 = vrot.lane.b32.xlu0 %v620_v44, %s8339_s29 }
 0x1b6   : > { %v5229_v28 = vpop.permute.xlu1 %921  ;;  %v5231_v35 = vpop.permute.xlu2 %1099 }
 0x1b7   : > { %8400 = vst [vmem:[#allocation57_spill] sm:$0xff] %v5231_v35  ;;  %v5233_v56 = vpop.permute.xlu0 %1039  ;;  %v1369_v35 = vmul.f32 %v4844_v21, %v4697_v27 }
 0x1b8   : > { %8401 = vst [vmem:[#allocation58_spill] sm:$0xff] %v5233_v56  ;;  %v1370_v56 = vmul.f32 %v4844_v21, %v4694_v26 }
 0x1bc   : > { %1267 = vrot.lane.b32.xlu1 %v1251_v62, %s8297_s15  ;;  %1269 = vrot.lane.b32.xlu2 %v1252_v17, %s8297_s15 }
 0x1bd   : > { %1279 = vrot.lane.b32.xlu0 %v1257_v55, %s8297_s15  ;;  %s8427_s15 = smov 93  }
 0x1be   : > { %v5244_v24 = vpop.permute.xlu1 %1041  ;;  %v5246_v22 = vpop.permute.xlu2 %1035 }
 0x1bf   : > { %8402 = vst [vmem:[#allocation59_spill] sm:$0xff] %v5244_v24  ;;  %v5248_v44 = vpop.permute.xlu0 %1045  ;;  %v1309_v24 = vmul.f32 %v4792_v63, %v4729_v40 }
 0x1c0   : > { %8403 = vst [vmem:[#allocation60_spill] sm:$0xff] %v5246_v22  ;;  %v1372_v22 = vmul.f32 %v4844_v21, %v4713_v33 }
 0x1c1   : > { %8404 = vst [vmem:[#allocation61_spill] sm:$0xff] %v5248_v44  ;;  %v678_v44 = vmul.f32 %v4709_v32, %v5098_v20  ;;  %v1315_v32 = vmul.f32 %v4792_v63, %v4743_v45 }
 0x1c4   : > { %1387 = vrot.lane.b32.xlu1 %v1369_v35, %s4519_s14  ;;  %1389 = vrot.lane.b32.xlu2 %v1370_v56, %s4519_s14 }
 0x1c5   : > { %1391 = vrot.lane.b32.xlu0 %v1371_v14, %s4519_s14 }
 0x1c6   : > { %v5259_v17 = vpop.permute.xlu1 %977  ;;  %v5261_v62 = vpop.permute.xlu2 %1155 }
 0x1c7   : > { %8405 = vst [vmem:[#allocation62_spill] sm:$0xff] %v5259_v17  ;;  %v5263_v55 = vpop.permute.xlu0 %989 }
 0x1c8   : > { %8406 = vst [vmem:[#allocation63_spill] sm:$0xff] %v5261_v62  ;;  %v1310_v62 = vmul.f32 %v4792_v63, %v4746_v46  ;;  %v1428_v63 = vmul.f32 %v4805_v5, %v4694_v26 }
 0x1c9   : > { %8407 = vst [vmem:[#allocation64_spill] sm:$0xff] %v5263_v55  ;;  %v1427_v55 = vmul.f32 %v4805_v5, %v4697_v27 }
 0x1cc   : > { %1393 = vrot.lane.b32.xlu1 %v1372_v22, %s4519_s14  ;;  %701 = vrot.lane.b32.xlu2 %v678_v44, %s8284_s30  ;;  %s4520_s30 = smov 29   ;;  %v4521_v44 = vmov 20  }
 0x1cd   : > { %1325 = vrot.lane.b32.xlu0 %v1309_v24, %s8296_s13 }
 0x1ce   : > { %v5274_v14 = vpop.permute.xlu1 %1097  ;;  %v5276_v56 = vpop.permute.xlu2 %1161  ;;  %4387 = vset.pattern.permute.xlu0 %v4521_v44 }
 0x1cf   : > { %8408 = vst [vmem:[#allocation65_spill] sm:$0xff] %v5274_v14  ;;  %v5278_v35 = vpop.permute.xlu0 %1101 }
 0x1d0   : > { %8409 = vst [vmem:[#allocation66_spill] sm:$0xff] %v5276_v56 }
 0x1d1   : > { %8410 = vst [vmem:[#allocation67_spill] sm:$0xff] %v5278_v35  ;;  %v1429_v35 = vmul.f32 %v4805_v5, %v4691_v25 }
 0x1d4   : > { %1327 = vrot.lane.b32.xlu1 %v1310_v62, %s8296_s13  ;;  %1337 = vrot.lane.b32.xlu2 %v1315_v32, %s8296_s13  ;;  %v1430_v62 = vmul.f32 %v4805_v5, %v4713_v33  ;;  %s8426_s13 = smov 94  }
 0x1d5   : > { %1445 = vrot.lane.b32.xlu0 %v1427_v55, %s4520_s30 }
 0x1d6   : > { %v5289_v24 = vpop.permute.xlu1 %1103  ;;  %v5291_v22 = vpop.permute.xlu2 %1095 }
 0x1d7   : > { %8411 = vst [vmem:[#allocation68_spill] sm:$0xff] %v5289_v24  ;;  %v5293_v56 = vpop.permute.xlu0 %1037  ;;  %v1368_v24 = vmul.f32 %v4844_v21, %v4746_v46 }
 0x1d8   : > { %8412 = vst [vmem:[#allocation69_spill] sm:$0xff] %v5291_v22  ;;  %v736_v22 = vmul.f32 %v4726_v39, %v5098_v20  ;;  %v1373_v39 = vmul.f32 %v4844_v21, %v4743_v45 }
 0x1d9   : > { %8413 = vst [vmem:[#allocation70_spill] sm:$0xff] %v5293_v56  ;;  %v1367_v56 = vmul.f32 %v4844_v21, %v4729_v40 }
 0x1dc   : > { %1447 = vrot.lane.b32.xlu1 %v1428_v63, %s4520_s30  ;;  %1449 = vrot.lane.b32.xlu2 %v1429_v35, %s4520_s30 }
 0x1dd   : > { %1451 = vrot.lane.b32.xlu0 %v1430_v62, %s4520_s30 }
 0x1de   : > { %v5304_v55 = vpop.permute.xlu1 %1047  ;;  %v5306_v32 = vpop.permute.xlu2 %1215 }
 0x1df   : > { %8414 = vst [vmem:[#allocation71_spill] sm:$0xff] %v5304_v55  ;;  %v5308_v44 = vpop.permute.xlu0 %1157 }
 0x1e0   : > { %8415 = vst [vmem:[#allocation72_spill] sm:$0xff] %v5306_v32  ;;  %v1485_v32 = vmul.f32 %v4878_v49, %v4697_v27 }
 0x1e1   : > { %8416 = vst [vmem:[#allocation73_spill] sm:$0xff] %v5308_v44  ;;  %v1486_v44 = vmul.f32 %v4878_v49, %v4694_v26 }
 0x1e4   : > { %759 = vrot.lane.b32.xlu1 %v736_v22, %s4508_s12  ;;  %1383 = vrot.lane.b32.xlu2 %v1367_v56, %s4519_s14  ;;  %s4522_s12 = smov 28  }
 0x1e5   : > { %1385 = vrot.lane.b32.xlu0 %v1368_v24, %s4519_s14 }
 0x1e6   : > { %v5319_v63 = vpop.permute.xlu1 %1159  ;;  %v5321_v35 = vpop.permute.xlu2 %527 }
 0x1e7   : > { %8417 = vst [vmem:[#allocation74_spill] sm:$0xff] %v5319_v63  ;;  %v5323_v62 = vpop.permute.xlu0 %469  ;;  %v1488_v63 = vmul.f32 %v4878_v49, %v4713_v33 }
 0x1e8   : > { %8418 = vst [vmem:[#allocation75_spill] sm:$0xff] %v5321_v35  ;;  %v1487_v35 = vmul.f32 %v4878_v49, %v4691_v25 }
 0x1e9   : > { %8419 = vst [vmem:[#allocation76_spill] sm:$0xff] %v5323_v62 }
 0x1ec   : > { %1395 = vrot.lane.b32.xlu1 %v1373_v39, %s4519_s14  ;;  %1503 = vrot.lane.b32.xlu2 %v1485_v32, %s4522_s12 }
 0x1ed   : > { %1505 = vrot.lane.b32.xlu0 %v1486_v44, %s4522_s12 }
 0x1ee   : > { %v5334_v56 = vpop.permute.xlu1 %1093  ;;  %v5336_v24 = vpop.permute.xlu2 %1163 }
 0x1ef   : > { %8420 = vst [vmem:[#allocation77_spill] sm:$0xff] %v5334_v56  ;;  %v5338_v22 = vpop.permute.xlu0 %1105  ;;  %v794_v56 = vmul.f32 %v4781_v59, %v5098_v20  ;;  %v1426_v59 = vmul.f32 %v4805_v5, %v4746_v46 }
 0x1f0   : > { %8421 = vst [vmem:[#allocation78_spill] sm:$0xff] %v5336_v24  ;;  %v1425_v24 = vmul.f32 %v4805_v5, %v4729_v40 }
 0x1f1   : > { %8422 = vst [vmem:[#allocation79_spill] sm:$0xff] %v5338_v22 }
 0x1f4   : > { %1507 = vrot.lane.b32.xlu1 %v1487_v35, %s4522_s12  ;;  %1509 = vrot.lane.b32.xlu2 %v1488_v63, %s4522_s12  ;;  %v852_v35 = vmul.f32 %v4748_v47, %v5098_v20  ;;  %v1431_v47 = vmul.f32 %v4805_v5, %v4743_v45  ;;  %v1483_v5 = vmul.f32 %v4878_v49, %v4729_v40 }
 0x1f5   : > { %1539 = vperm.xlu0 %4387, %v4653_v0  }
 0x1f6   : > { %v5347_v32 = vpop.permute.xlu1 %1213  ;;  %v5349_v44 = vpop.permute.xlu2 %1275 }
 0x1f7   : > { %8423 = vst [vmem:[#allocation80_spill] sm:$0xff] %v5347_v32  ;;  %v5351_v39 = vpop.permute.xlu0 %1217  ;;  %v910_v32 = vmul.f32 %v4842_v19, %v5098_v20 }
 0x1f8   : > { %8424 = vst [vmem:[#allocation81_spill] sm:$0xff] %v5349_v44  ;;  %v8430_v44 = vmov 0  }
 0x1f9   : > { %8425 = vst [vmem:[#allocation82_spill] sm:$0xff] %v5351_v39 }
 0x1fc   : > { %817 = vrot.lane.b32.xlu1 %v794_v56, %s8426_s13  ;;  %1441 = vrot.lane.b32.xlu2 %v1425_v24, %s4520_s30  ;;  %v1489_v56 = vmul.f32 %v4878_v49, %v4743_v45  ;;  %v1571_v24 = vld [vmem:[%s4685_s16 + $0x1] sm:$0xff]  ;;  %s8442_s16 = smov 92   ;;  %s8457_s13 = smov 64  }
 0x1fd   : > { %875 = vrot.lane.b32.xlu0 %v852_v35, %s8427_s15  ;;  %v5459_v55 = vperm.slane %v1571_v24, 6  ;;  %s8463_s15 = smov 63  }
 0x1fe   : > { %v5362_v0 = vpop.permute.xlu1 %1219  ;;  %v5364_v63 = vpop.permute.xlu2 %1209  ;;  %4388 = vset.pattern.permute.xlu0 %v8430_v44 }
 0x1ff   : > { %8428 = vst [vmem:[#allocation83_spill] sm:$0xff] %v5362_v0  ;;  %v5367_v39 = vpop.permute.xlu0 %1151  ;;  %v1484_v0 = vmul.f32 %v4878_v49, %v4746_v46 }
 0x200   : > { %8429 = vst [vmem:[#allocation84_spill] sm:$0xff] %v5364_v63 }
 0x201   : > { %8431 = vst [vmem:[#allocation85_spill] sm:$0xff] %v5367_v39  ;;  %v5385_v39 = vperm.slane %v1571_v24, 4 }
 0x202   : > { %8451 = vst [vmem:[#allocation104_spill] sm:$0xff] %v5459_v55 }
 0x204   : > { %1443 = vrot.lane.b32.xlu1 %v1426_v59, %s4520_s30  ;;  %1453 = vrot.lane.b32.xlu2 %v1431_v47, %s4520_s30  ;;  %v1597_v59 = vmul.f32 %v5385_v39, %v4818_v10 }
 0x205   : > { %1511 = vrot.lane.b32.xlu0 %v1489_v56, %s4522_s12 }
 0x206   : > { %v5379_v35 = vpop.permute.xlu1 %1153  ;;  %v5381_v44 = vpop.permute.xlu2 %1329 }
 0x207   : > { %8432 = vst [vmem:[#allocation86_spill] sm:$0xff] %v5379_v35  ;;  %v5383_v63 = vpop.permute.xlu0 %1271  ;;  %v5400_v35 = vperm.slane %v1571_v24, 2 }
 0x208   : > { %8433 = vst [vmem:[#allocation87_spill] sm:$0xff] %v5381_v44  ;;  %v5402_v44 = vperm.slane %v1571_v24, 3 }
 0x209   : > { %8434 = vst [vmem:[#allocation88_spill] sm:$0xff] %v5383_v63  ;;  %v1595_v49 = vmul.f32 %v5400_v35, %v4818_v10 }
 0x20a   : > { %v1653_v19 = vmul.f32 %v4837_v18, %v5402_v44 }
 0x20c   : > { %1499 = vrot.lane.b32.xlu1 %v1483_v5, %s4522_s12  ;;  %1501 = vrot.lane.b32.xlu2 %v1484_v0, %s4522_s12  ;;  %v1596_v5 = vmul.f32 %v5402_v44, %v4818_v10  ;;  %v1652_v0 = vmul.f32 %v4837_v18, %v5400_v35 }
 0x20d   : > { %1617 = vrot.lane.b32.xlu0 %v1597_v59, %s8335_s22 }
 0x20e   : > { %v5396_v47 = vpop.permute.xlu1 %1273  ;;  %v5398_v56 = vpop.permute.xlu2 %1335 }
 0x20f   : > { %8435 = vst [vmem:[#allocation89_spill] sm:$0xff] %v5396_v47  ;;  %v5404_v63 = vpop.permute.xlu0 %1277 }
 0x210   : > { %8436 = vst [vmem:[#allocation90_spill] sm:$0xff] %v5398_v56 }
 0x211   : > { %8437 = vst [vmem:[#allocation91_spill] sm:$0xff] %v5404_v63  ;;  %v5419_v63 = vperm.slane %v1571_v24, 5 }
 0x213   : > { %8440 = vst [vmem:[#allocation94_spill] sm:$0xff] %v5419_v63  ;;  %v1598_v22 = vmul.f32 %v5419_v63, %v4818_v10 }
 0x214   : > { %1613 = vrot.lane.b32.xlu1 %v1595_v49, %s8335_s22  ;;  %1615 = vrot.lane.b32.xlu2 %v1596_v5, %s8335_s22  ;;  %v1655_v49 = vmul.f32 %v4837_v18, %v5419_v63 }
 0x215   : > { %1670 = vrot.lane.b32.xlu0 %v1652_v0, %s8327_s24 }
 0x216   : > { %v5415_v59 = vpop.permute.xlu1 %585  ;;  %v5417_v56 = vpop.permute.xlu2 %1269 }
 0x217   : > { %8438 = vst [vmem:[#allocation92_spill] sm:$0xff] %v5415_v59  ;;  %v5421_v47 = vpop.permute.xlu0 %1211  ;;  %v1654_v59 = vmul.f32 %v4837_v18, %v5385_v39 }
 0x218   : > { %8439 = vst [vmem:[#allocation93_spill] sm:$0xff] %v5417_v56 }
 0x219   : > { %8441 = vst [vmem:[#allocation95_spill] sm:$0xff] %v5421_v47  ;;  %v5438_v47 = vperm.slane %v1571_v24, 1 }
 0x21b   : > { %8446 = vst [vmem:[#allocation99_spill] sm:$0xff] %v5438_v47 }
 0x21c   : > { %1619 = vrot.lane.b32.xlu1 %v1598_v22, %s8335_s22  ;;  %933 = vrot.lane.b32.xlu2 %v910_v32, %s8442_s16  ;;  %v1594_v22 = vmul.f32 %v5438_v47, %v4818_v10 }
 0x21d   : > { %1676 = vrot.lane.b32.xlu0 %v1655_v49, %s8327_s24 }
 0x21e   : > { %v5432_v5 = vpop.permute.xlu1 %1221  ;;  %v5434_v0 = vpop.permute.xlu2 %1389 }
 0x21f   : > { %8443 = vst [vmem:[#allocation96_spill] sm:$0xff] %v5432_v5  ;;  %v5436_v56 = vpop.permute.xlu0 %1331  ;;  %v5453_v5 = vperm.slane %v1571_v24, 0 }
 0x220   : > { %8444 = vst [vmem:[#allocation97_spill] sm:$0xff] %v5434_v0 }
 0x221   : > { %8445 = vst [vmem:[#allocation98_spill] sm:$0xff] %v5436_v56  ;;  %v968_v56 = vmul.f32 %v4798_v3, %v5098_v20  ;;  %v406_v3 = vmul.f32 %v4694_v26, %v4861_v36  ;;  %v404_v26 = vmul.f32 %v4746_v46, %v4861_v36  ;;  %v475_v46 = vsel %vm471_vm0, %v4855_v30, %v4896_v57 }
 0x222   : > { %8449 = vst [vmem:[#allocation102_spill] sm:$0xff] %v5453_v5 }
 0x224   : > { %1672 = vrot.lane.b32.xlu1 %v1653_v19, %s8327_s24  ;;  %1674 = vrot.lane.b32.xlu2 %v1654_v59, %s8327_s24  ;;  %v1026_v19 = vmul.f32 %v4765_v54, %v5098_v20  ;;  %v5465_v59 = vmul.f32 %v4815_v9, %v5098_v20  ;;  %v405_v54 = vmul.f32 %v4697_v27, %v4861_v36 }
 0x225   : > { %1611 = vrot.lane.b32.xlu0 %v1594_v22, %s8335_s22  ;;  %v5469_v22 = vmul.f32 %v4776_v58, %v5098_v20  ;;  %v407_v9 = vmul.f32 %v4691_v25, %v4861_v36  ;;  %v408_v58 = vmul.f32 %v4713_v33, %v4861_v36  ;;  %v5495_v27 = vmul.f32 %v4743_v45, %v4861_v36 }
 0x226   : > { %v5449_v32 = vpop.permute.xlu1 %1333  ;;  %v5451_v49 = vpop.permute.xlu2 %701  ;;  %8452 = vst [vmem:[#allocation105_spill] sm:$0xff] %v5465_v59  ;;  %v1599_v25 = vmul.f32 %v5459_v55, %v4818_v10  ;;  %v1709_v33 = vmul.f32 %v4882_v50, %v5400_v35  ;;  %v533_v59 = vsel %vm8333_vm1, %v4926_v13, %v4870_v41 }
 0x227   : > { %8447 = vst [vmem:[#allocation100_spill] sm:$0xff] %v5449_v32  ;;  %v5455_v0 = vpop.permute.xlu0 %643  ;;  %v1593_v32 = vmul.f32 %v5453_v5, %v4818_v10 }
 0x228   : > { %8448 = vst [vmem:[#allocation101_spill] sm:$0xff] %v5451_v49  ;;  %v5473_v49 = vmul.f32 %v4844_v21, %v5098_v20  ;;  %v403_v21 = vmul.f32 %v4729_v40, %v4861_v36  ;;  %v5506_v40 = vmul.f32 %v4882_v50, %v5385_v39  ;;  %v474_v36 = vsel %vm471_vm0, %v4898_v60, %v4855_v30 }
 0x229   : > { %8450 = vst [vmem:[#allocation103_spill] sm:$0xff] %v5455_v0  ;;  %v5475_v0 = vperm.slane %v1571_v24, 7  ;;  %v1710_v24 = vmul.f32 %v4882_v50, %v5402_v44  ;;  %v473_v30 = vsel %vm471_vm0, %v4945_v37, %v4898_v60  ;;  %v5555_v60 = vmul.f32 %v4882_v50, %v5438_v47 }
 0x22a   : > { %8453 = vst [vmem:[#allocation106_spill] sm:$0xff] %v5469_v22  ;;  %v489_v22 = vadd.f32 %v475_v46, %v406_v3  ;;  %v487_v14 = vadd.f32 %v473_v30, %v404_v26  ;;  %v531_v3 = vsel %vm8333_vm1, %v4928_v15, %v4915_v7  ;;  %v5631_v46 = vmul.f32 %v4975_v11, %v5419_v63  ;;  %v8466_v30 = vld [vmem:[#allocation19_spill] sm:$0xff] }
 0x22b   : > { %8454 = vst [vmem:[#allocation107_spill] sm:$0xff] %v5473_v49  ;;  %v5510_v45 = vmul.f32 %v5475_v0, %v4818_v10  ;;  %v5528_v10 = vmul.f32 %v4882_v50, %v5419_v63  ;;  %v532_v49 = vsel %vm8333_vm1, %v4915_v7, %v4926_v13  ;;  %v592_v13 = vsel %vm587_vm2, %v4956_v48, %v4913_v6  ;;  %v8530_v63 = vld [vmem:[#allocation80_spill] sm:$0xff] }
 0x22c   : > { %8455 = vst [vmem:[#allocation108_spill] sm:$0xff] %v5475_v0  ;;  %991 = vrot.lane.b32.xlu1 %v968_v56, %s8457_s13  ;;  %1609 = vrot.lane.b32.xlu2 %v1593_v32, %s8335_s22  ;;  %v476_v0 = vsel %vm471_vm0, %v4896_v57, %v4911_v4  ;;  %v5551_v57 = vmul.f32 %v4882_v50, %v5453_v5  ;;  %s8549_s13 = smov 61  }
 0x22d   : > { %8456 = vst [vmem:[#allocation109_spill] sm:$0xff] %v5495_v27  ;;  %1729 = vrot.lane.b32.xlu0 %v1710_v24, %s8337_s25  ;;  %v5524_v24 = vmul.f32 %v4837_v18, %v5459_v55  ;;  %v488_v27 = vadd.f32 %v474_v36, %v405_v54  ;;  %v490_v62 = vadd.f32 %v476_v0, %v407_v9 }
 0x22e   : > { %8458 = vst [vmem:[#allocation110_spill] sm:$0xff] %v5510_v45  ;;  %v5518_v56 = vpop.permute.xlu1 %1267  ;;  %v5520_v32 = vpop.permute.xlu2 %1337  ;;  %v472_v0 = vsel %vm471_vm0, %v4885_v51, %v4945_v37  ;;  %v591_v7 = vsel %vm587_vm2, %v4960_v53, %v4956_v48  ;;  %v530_v51 = vsel %vm8333_vm1, %v4971_v2, %v4928_v15  ;;  %v535_v37 = vsel %vm8333_vm1, %v4930_v16, %v4986_v23 }
 0x22f   : > { %8459 = vst [vmem:[#allocation111_spill] sm:$0xff] %v5518_v56  ;;  %v5536_v45 = vpop.permute.xlu0 %1279  ;;  %v5544_v56 = vmul.f32 %v4837_v18, %v5438_v47  ;;  %v546_v17 = vadd.f32 %v532_v49, %v488_v27  ;;  %v486_v9 = vadd.f32 %v472_v0, %v403_v21  ;;  %v545_v48 = vadd.f32 %v531_v3, %v487_v14 }
 0x230   : > { %8460 = vst [vmem:[#allocation112_spill] sm:$0xff] %v5520_v32  ;;  %v5540_v32 = vmul.f32 %v4837_v18, %v5453_v5  ;;  %v5563_v18 = vmul.f32 %v4857_v31, %v5098_v20  ;;  %v477_v31 = vsel %vm471_vm0, %v4911_v4, %v4941_v29  ;;  %v547_v4 = vadd.f32 %v533_v59, %v489_v22 }
 0x231   : > { %8461 = vst [vmem:[#allocation113_spill] sm:$0xff] %v5536_v45  ;;  %v5559_v45 = vmul.f32 %v4882_v50, %v5459_v55  ;;  %v491_v54 = vadd.f32 %v477_v31, %v408_v58  ;;  %v544_v15 = vadd.f32 %v530_v51, %v486_v9  ;;  %v589_v14 = vsel %vm587_vm2, %v5016_v43, %v4900_v61  ;;  %v8469_v51 = vld [vmem:[#allocation21_spill] sm:$0xff]  ;;  %v8478_v50 = vld [vmem:[#allocation31_spill] sm:$0xff] }
 0x232   : > { %8462 = vst [vmem:[#allocation114_spill] sm:$0xff] %v5555_v60  ;;  %v534_v60 = vsel %vm8333_vm1, %v4870_v41, %v4930_v16  ;;  %v590_v41 = vsel %vm587_vm2, %v4900_v61, %v4960_v53  ;;  %v605_v22 = vadd.f32 %v591_v7, %v547_v4  ;;  %v593_v16 = vsel %vm587_vm2, %v4913_v6, %v4973_v8  ;;  %v8464_v6 = vld [vmem:[#allocation17_spill] sm:$0xff]  ;;  %v8465_v61 = vld [vmem:[#allocation15_spill] sm:$0xff] }
 0x233   : > { %v548_v49 = vadd.f32 %v534_v60, %v490_v62  ;;  %v604_v62 = vadd.f32 %v590_v41, %v546_v17  ;;  %v549_v2 = vadd.f32 %v535_v37, %v491_v54  ;;  %v1768_v17 = vmul.f32 %v4975_v11, %v5385_v39  ;;  %v8470_v54 = vld [vmem:[#allocation16_spill] sm:$0xff] }
 0x234   : > { %1621 = vrot.lane.b32.xlu1 %v1599_v25, %s8335_s22  ;;  %1727 = vrot.lane.b32.xlu2 %v1709_v33, %s8337_s25  ;;  %v5617_v58 = vmul.f32 %v4975_v11, %v5400_v35  ;;  %v5621_v21 = vmul.f32 %v4975_v11, %v5402_v44  ;;  %v649_v25 = vsel %vm645_vm3, %v4990_v42, %v8464_v6 }
 0x235   : > { %1049 = vrot.lane.b32.xlu0 %v1026_v19, %s8463_s15  ;;  %v606_v59 = vadd.f32 %v592_v13, %v548_v49  ;;  %v648_v19 = vsel %vm645_vm3, %v4943_v34, %v4990_v42  ;;  %v650_v33 = vsel %vm645_vm3, %v8464_v6, %v8465_v61  ;;  %v5635_v36 = vmul.f32 %v4975_v11, %v5453_v5  ;;  %v8467_v13 = vld [vmem:[#allocation18_spill] sm:$0xff]  ;;  %s8568_s15 = smov 31  }
 0x236   : > { %v5598_v53 = vpop.permute.xlu1 %1387  ;;  %v5600_v26 = vpop.permute.xlu2 %1449  ;;  %v588_v60 = vsel %vm587_vm2, %v8466_v30, %v5016_v43  ;;  %v603_v3 = vadd.f32 %v589_v14, %v545_v48  ;;  %v5642_v42 = vmul.f32 %v4975_v11, %v5438_v47  ;;  %v5646_v31 = vmul.f32 %v4975_v11, %v5459_v55  ;;  %v8468_v49 = vld [vmem:[#allocation22_spill] sm:$0xff]  ;;  %v8471_v48 = vld [vmem:[#allocation24_spill] sm:$0xff]  ;;  %v8531_v47 = vld [vmem:[#allocation75_spill] sm:$0xff] }
 0x237   : > { %v5602_v27 = vpop.permute.xlu0 %1391  ;;  %v662_v0 = vadd.f32 %v648_v19, %v604_v62  ;;  %v647_v41 = vsel %vm645_vm3, %v8467_v13, %v4943_v34  ;;  %v607_v7 = vadd.f32 %v593_v16, %v549_v2  ;;  %v663_v43 = vadd.f32 %v649_v25, %v605_v22  ;;  %v8473_v62 = vld [vmem:[#allocation27_spill] sm:$0xff]  ;;  %v8474_v14 = vld [vmem:[#allocation20_spill] sm:$0xff] }
 0x238   : > { %v664_v4 = vadd.f32 %v650_v33, %v606_v59  ;;  %v706_v37 = vsel %vm703_vm4, %v8469_v51, %v8468_v49  ;;  %v707_v9 = vsel %vm703_vm4, %v8468_v49, %v8470_v54  ;;  %v602_v34 = vadd.f32 %v588_v60, %v544_v15  ;;  %v8475_v19 = vld [vmem:[#allocation28_spill] sm:$0xff]  ;;  %v8476_v15 = vld [vmem:[#allocation30_spill] sm:$0xff] }
 0x239   : > { %v651_v22 = vsel %vm645_vm3, %v8465_v61, %v8473_v62  ;;  %v765_v6 = vsel %vm761_vm5, %v8474_v14, %v8476_v15  ;;  %v661_v25 = vadd.f32 %v647_v41, %v603_v3  ;;  %v720_v30 = vadd.f32 %v706_v37, %v662_v0  ;;  %v8479_v0 = vld [vmem:[#allocation23_spill] sm:$0xff] }
 0x23a   : > { %v721_v60 = vadd.f32 %v707_v9, %v663_v43  ;;  %v705_v61 = vsel %vm703_vm4, %v5080_v38, %v8469_v51  ;;  %v665_v55 = vadd.f32 %v651_v22, %v607_v7  ;;  %v766_v3 = vsel %vm761_vm5, %v8476_v15, %v8478_v50  ;;  %v8480_v37 = vld [vmem:[#allocation39_spill] sm:$0xff]  ;;  %v8484_v22 = vld [vmem:[#allocation36_spill] sm:$0xff]  ;;  %v8486_v15 = vld [vmem:[#allocation38_spill] sm:$0xff] }
 0x23b   : > { %v704_v43 = vsel %vm703_vm4, %v8479_v0, %v5080_v38  ;;  %v763_v51 = vsel %vm761_vm5, %v8480_v37, %v8475_v19  ;;  %v719_v9 = vadd.f32 %v705_v61, %v661_v25 }
 0x23c   : > { %1731 = vrot.lane.b32.xlu1 %v5506_v40, %s8337_s25  ;;  %1733 = vrot.lane.b32.xlu2 %v5528_v10, %s8337_s25  ;;  %v708_v40 = vsel %vm703_vm4, %v8470_v54, %v8471_v48  ;;  %v8472_v10 = vld [vmem:[#allocation25_spill] sm:$0xff] }
 0x23d   : > { %1678 = vrot.lane.b32.xlu0 %v5524_v24, %s8327_s24  ;;  %v646_v59 = vsel %vm645_vm3, %v8472_v10, %v8467_v13  ;;  %v764_v24 = vsel %vm761_vm5, %v8475_v19, %v8474_v14  ;;  %v8477_v13 = vld [vmem:[#allocation33_spill] sm:$0xff]  ;;  %v722_v54 = vadd.f32 %v708_v40, %v664_v4  ;;  %v779_v14 = vadd.f32 %v765_v6, %v721_v60  ;;  %v8482_v4 = vld [vmem:[#allocation26_spill] sm:$0xff]  ;;  %v8483_v40 = vld [vmem:[#allocation32_spill] sm:$0xff] }
 0x23e   : > { %v5672_v16 = vpop.permute.xlu1 %1393  ;;  %v5674_v2 = vpop.permute.xlu2 %1383  ;;  %v709_v49 = vsel %vm703_vm4, %v8471_v48, %v8477_v13  ;;  %v660_v10 = vadd.f32 %v646_v59, %v602_v34  ;;  %v778_v41 = vadd.f32 %v764_v24, %v720_v30  ;;  %v8481_v48 = vld [vmem:[#allocation35_spill] sm:$0xff]  ;;  %v767_v59 = vsel %vm761_vm5, %v8478_v50, %v8483_v40  ;;  %v8485_v19 = vld [vmem:[#allocation29_spill] sm:$0xff]  ;;  %v8488_v60 = vld [vmem:[#allocation34_spill] sm:$0xff] }
 0x23f   : > { %v5682_v33 = vpop.permute.xlu0 %1325  ;;  %v723_v5 = vadd.f32 %v709_v49, %v665_v55  ;;  %v822_v7 = vsel %vm819_vm6, %v8482_v4, %v8481_v48  ;;  %v780_v34 = vadd.f32 %v766_v3, %v722_v54  ;;  %v823_v38 = vsel %vm819_vm6, %v8481_v48, %v8484_v22  ;;  %v8487_v30 = vld [vmem:[#allocation41_spill] sm:$0xff]  ;;  %v8492_v48 = vld [vmem:[#allocation46_spill] sm:$0xff] }
 0x240   : > { %v718_v55 = vadd.f32 %v704_v43, %v660_v10  ;;  %v824_v24 = vsel %vm819_vm6, %v8484_v22, %v8485_v19  ;;  %v762_v6 = vsel %vm761_vm5, %v8486_v15, %v8480_v37  ;;  %v777_v50 = vadd.f32 %v763_v51, %v719_v9  ;;  %v8489_v10 = vld [vmem:[#allocation37_spill] sm:$0xff] }
 0x241   : > { %v836_v25 = vadd.f32 %v822_v7, %v778_v41  ;;  %v837_v54 = vadd.f32 %v823_v38, %v779_v14  ;;  %v821_v3 = vsel %vm819_vm6, %v8489_v10, %v8482_v4  ;;  %v781_v0 = vadd.f32 %v767_v59, %v723_v5  ;;  %v8493_v4 = vld [vmem:[#allocation40_spill] sm:$0xff]  ;;  %v8494_v38 = vld [vmem:[#allocation47_spill] sm:$0xff] }
 0x242   : > { %v838_v37 = vadd.f32 %v824_v24, %v780_v34  ;;  %v776_v51 = vadd.f32 %v762_v6, %v718_v55  ;;  %v825_v14 = vsel %vm819_vm6, %v8485_v19, %v8492_v48  ;;  %v938_v15 = vsel %vm8334_vm8, %v8494_v38, %v8493_v4  ;;  %v8495_v19 = vld [vmem:[#allocation49_spill] sm:$0xff] }
 0x243   : > { %v879_v34 = vsel %vm877_vm7, %v5188_v1, %v8487_v30  ;;  %v839_v24 = vadd.f32 %v825_v14, %v781_v0  ;;  %v939_v6 = vsel %vm8334_vm8, %v8493_v4, %v8495_v19  ;;  %v8502_v4 = vld [vmem:[#allocation48_spill] sm:$0xff] }
 0x244   : > { %1666 = vrot.lane.b32.xlu1 %v5540_v32, %s8327_s24  ;;  %1668 = vrot.lane.b32.xlu2 %v5544_v56, %s8327_s24  ;;  %v880_v32 = vsel %vm877_vm7, %v8487_v30, %v5139_v12  ;;  %v881_v56 = vsel %vm877_vm7, %v5139_v12, %v8488_v60  ;;  %v8491_v12 = vld [vmem:[#allocation44_spill] sm:$0xff]  ;;  %s8515_s24 = smov 62  }
 0x245   : > { %1788 = vrot.lane.b32.xlu0 %v1768_v17, %s8339_s29  ;;  %v8490_v17 = vld [vmem:[#allocation43_spill] sm:$0xff]  ;;  %v820_v9 = vsel %vm819_vm6, %v8491_v12, %v8489_v10  ;;  %v894_v7 = vadd.f32 %v880_v32, %v836_v25  ;;  %v895_v22 = vadd.f32 %v881_v56, %v837_v54  ;;  %v8496_v25 = vld [vmem:[#allocation50_spill] sm:$0xff]  ;;  %v937_v54 = vsel %vm8334_vm8, %v5229_v28, %v8494_v38 }
 0x246   : > { %v5725_v61 = vpop.permute.xlu1 %1327  ;;  %v5727_v49 = vpop.permute.xlu2 %1503  ;;  %v882_v41 = vsel %vm877_vm7, %v8488_v60, %v8490_v17  ;;  %v835_v60 = vadd.f32 %v821_v3, %v777_v50  ;;  %v883_v59 = vsel %vm877_vm7, %v8490_v17, %v5199_v52  ;;  %v834_v55 = vadd.f32 %v820_v9, %v776_v51  ;;  %v8497_v56 = vld [vmem:[#allocation42_spill] sm:$0xff]  ;;  %v8498_v17 = vld [vmem:[#allocation53_spill] sm:$0xff]  ;;  %v8500_v51 = vld [vmem:[#allocation51_spill] sm:$0xff] }
 0x247   : > { %v5735_v43 = vpop.permute.xlu0 %1445  ;;  %v896_v5 = vadd.f32 %v882_v41, %v838_v37  ;;  %v940_v50 = vsel %vm8334_vm8, %v8495_v19, %v8496_v25  ;;  %v952_v32 = vadd.f32 %v938_v15, %v894_v7  ;;  %v878_v30 = vsel %vm877_vm7, %v8497_v56, %v5188_v1  ;;  %v8499_v41 = vld [vmem:[#allocation45_spill] sm:$0xff]  ;;  %v8506_v19 = vld [vmem:[#allocation52_spill] sm:$0xff]  ;;  %v8508_v56 = vld [vmem:[#allocation55_spill] sm:$0xff] }
 0x248   : > { %v893_v10 = vadd.f32 %v879_v34, %v835_v60  ;;  %v897_v3 = vadd.f32 %v883_v59, %v839_v24  ;;  %v996_v0 = vsel %vm8332_vm9, %v8499_v41, %v8498_v17  ;;  %v953_v1 = vadd.f32 %v939_v6, %v895_v22  ;;  %v8504_v34 = vld [vmem:[#allocation59_spill] sm:$0xff]  ;;  %v8505_v59 = vld [vmem:[#allocation58_spill] sm:$0xff] }
 0x249   : > { %v954_v37 = vadd.f32 %v940_v50, %v896_v5  ;;  %v941_v12 = vsel %vm8334_vm8, %v8496_v25, %v8500_v51  ;;  %v892_v7 = vadd.f32 %v878_v30, %v834_v55  ;;  %v1010_v5 = vadd.f32 %v996_v0, %v952_v32  ;;  %v8507_v25 = vld [vmem:[#allocation61_spill] sm:$0xff]  ;;  %v8510_v0 = vld [vmem:[#allocation64_spill] sm:$0xff] }
 0x24a   : > { %v951_v15 = vadd.f32 %v937_v54, %v893_v10  ;;  %v1054_v24 = vsel %vm8331_vm10, %v8505_v59, %v8504_v34  ;;  %v1055_v55 = vsel %vm8331_vm10, %v8504_v34, %v8506_v19  ;;  %v1056_v50 = vsel %vm8331_vm10, %v8506_v19, %v8507_v25  ;;  %v8512_v34 = vld [vmem:[#allocation57_spill] sm:$0xff] }
 0x24b   : > { %v955_v54 = vadd.f32 %v941_v12, %v897_v3  ;;  %v995_v10 = vsel %vm8332_vm9, %v8508_v56, %v8499_v41  ;;  %v8513_v19 = vld [vmem:[#allocation65_spill] sm:$0xff] }
 0x24c   : > { %1784 = vrot.lane.b32.xlu1 %v5617_v58, %s8339_s29  ;;  %1786 = vrot.lane.b32.xlu2 %v5621_v21, %s8339_s29  ;;  %v8501_v58 = vld [vmem:[#allocation54_spill] sm:$0xff]  ;;  %v1112_v3 = vsel %vm1109_vm11, %v8513_v19, %v8512_v34 }
 0x24d   : > { %1723 = vrot.lane.b32.xlu0 %v5551_v57, %s8337_s25  ;;  %v997_v21 = vsel %vm8332_vm9, %v8498_v17, %v8501_v58  ;;  %v998_v38 = vsel %vm8332_vm9, %v8501_v58, %v8502_v4  ;;  %v8503_v57 = vld [vmem:[#allocation56_spill] sm:$0xff]  ;;  %v999_v58 = vsel %vm8332_vm9, %v8502_v4, %v8510_v0 }
 0x24e   : > { %v5779_v9 = vpop.permute.xlu1 %1447  ;;  %v5781_v14 = vpop.permute.xlu2 %1509  ;;  %v936_v22 = vsel %vm8334_vm8, %v8503_v57, %v5229_v28  ;;  %v1011_v6 = vadd.f32 %v997_v21, %v953_v1  ;;  %v8509_v28 = vld [vmem:[#allocation62_spill] sm:$0xff]  ;;  %v1012_v32 = vadd.f32 %v998_v38, %v954_v37  ;;  %v1817_v1 = vld [vmem:[%s8511_s2] sm:$0xff]  ;;  %v1068_v21 = vadd.f32 %v1054_v24, %v1010_v5  ;;  %s4526_s2 = smov 90  }
 0x24f   : > { %v5789_v60 = vpop.permute.xlu0 %1451  ;;  %v994_v30 = vsel %vm8332_vm9, %v8509_v28, %v8508_v56  ;;  %v950_v17 = vadd.f32 %v936_v22, %v892_v7  ;;  %v1009_v37 = vadd.f32 %v995_v10, %v951_v15  ;;  %v8514_v28 = vld [vmem:[#allocation67_spill] sm:$0xff]  ;;  %v8516_v7 = vld [vmem:[#allocation105_spill] sm:$0xff]  ;;  %v1013_v4 = vadd.f32 %v999_v58, %v955_v54  ;;  %v8517_v22 = vld [vmem:[#allocation68_spill] sm:$0xff] }
 0x250   : > { %v1069_v57 = vadd.f32 %v1055_v55, %v1011_v6  ;;  %v1070_v12 = vadd.f32 %v1056_v50, %v1012_v32  ;;  %v1113_v41 = vsel %vm1109_vm11, %v8512_v34, %v8514_v28  ;;  %v1114_v5 = vsel %vm1109_vm11, %v8514_v28, %v8517_v22  ;;  %v8518_v24 = vld [vmem:[#allocation70_spill] sm:$0xff]  ;;  %v8519_v15 = vld [vmem:[#allocation60_spill] sm:$0xff]  ;;  %v8523_v58 = vld [vmem:[#allocation73_spill] sm:$0xff] }
 0x251   : > { %v1008_v38 = vadd.f32 %v994_v30, %v950_v17  ;;  %v1052_v55 = vsel %vm8331_vm10, %v8519_v15, %v8518_v24  ;;  %v8520_v6 = vld [vmem:[#allocation76_spill] sm:$0xff]  ;;  %v1126_v56 = vadd.f32 %v1112_v3, %v1068_v21  ;;  %v8521_v30 = vld [vmem:[#allocation71_spill] sm:$0xff]  ;;  %v8526_v3 = vld [vmem:[#allocation66_spill] sm:$0xff]  ;;  %vm1515_vm9 = vcmask 228352  }
 0x252   : > { %v478_v50 = vsel %vm471_vm0, %v4941_v29, %v8520_v6  ;;  %v1057_v54 = vsel %vm8331_vm10, %v8507_v25, %v8521_v30  ;;  %v1127_v17 = vadd.f32 %v1113_v41, %v1069_v57  ;;  %v8524_v34 = vld [vmem:[#allocation63_spill] sm:$0xff]  ;;  %v1128_v25 = vadd.f32 %v1114_v5, %v1070_v12  ;;  %v8528_v41 = vld [vmem:[#allocation109_spill] sm:$0xff]  ;;  %v8529_v0 = vld [vmem:[#allocation72_spill] sm:$0xff] }
 0x253   : > { %v1170_v29 = vsel %vm1167_vm12, %v8524_v34, %v8523_v58  ;;  %v492_v15 = vadd.f32 %v478_v50, %v8528_v41  ;;  %v1071_v30 = vadd.f32 %v1057_v54, %v1013_v4  ;;  %v536_v12 = vsel %vm8333_vm1, %v4986_v23, %v8531_v47  ;;  %v8533_v5 = vld [vmem:[#allocation82_spill] sm:$0xff]  ;;  %v8534_v4 = vld [vmem:[#allocation83_spill] sm:$0xff]  ;;  %v8536_v54 = vld [vmem:[#allocation88_spill] sm:$0xff] }
 0x254   : > { %1790 = vrot.lane.b32.xlu1 %v5631_v46, %s8339_s29  ;;  %1107 = vrot.lane.b32.xlu2 %v8516_v7, %s8515_s24  ;;  %v1053_v46 = vsel %vm8331_vm10, %v8518_v24, %v8505_v59  ;;  %v5852_v7 = vadd.f32 %v1052_v55, %v1008_v38  ;;  %v8527_v24 = vld [vmem:[#allocation69_spill] sm:$0xff]  ;;  %v1184_v51 = vadd.f32 %v1170_v29, %v1126_v56  ;;  %v8532_v38 = vld [vmem:[#allocation79_spill] sm:$0xff]  ;;  %v8537_v23 = vld [vmem:[#allocation114_spill] sm:$0xff]  ;;  %vm1399_vm10 = vcmask 244736   ;;  %s8540_s24 = smov 60  }
 0x255   : > { %1820 = vperm.xlu0 %4388, %v1817_v1   ;;  %v8525_v1 = vld [vmem:[#allocation74_spill] sm:$0xff]  ;;  %v1111_v57 = vsel %vm1109_vm11, %v8527_v24, %v8513_v19  ;;  %v1067_v6 = vadd.f32 %v1053_v46, %v1009_v37  ;;  %v1115_v19 = vsel %vm1109_vm11, %v8517_v22, %v8532_v38  ;;  %v1229_v37 = vsel %vm1225_vm13, %v8529_v0, %v8533_v5  ;;  %v8535_v46 = vld [vmem:[#allocation89_spill] sm:$0xff]  ;;  %v8539_v22 = vld [vmem:[#allocation91_spill] sm:$0xff] }
 0x256   : > { %v5837_v32 = vpop.permute.xlu1 %759  ;;  %v5839_v10 = vpop.permute.xlu2 %1441  ;;  %v1171_v21 = vsel %vm1167_vm12, %v8523_v58, %v8525_v1  ;;  %v1172_v59 = vsel %vm1167_vm12, %v8525_v1, %v8526_v3  ;;  %v1228_v58 = vsel %vm1225_vm13, %v8530_v63, %v8529_v0  ;;  %v1230_v55 = vsel %vm1225_vm13, %v8533_v5, %v8534_v4  ;;  %v8538_v47 = vld [vmem:[#allocation81_spill] sm:$0xff]  ;;  %v8542_v41 = vld [vmem:[#allocation87_spill] sm:$0xff]  ;;  %v8543_v5 = vld [vmem:[#allocation100_spill] sm:$0xff] }
 0x257   : > { %8522 = vst [vmem:[#allocation17_spill] sm:$0xff] %v5839_v10  ;;  %v5850_v28 = vpop.permute.xlu0 %1385  ;;  %v1185_v1 = vadd.f32 %v1171_v21, %v1127_v17  ;;  %v1186_v10 = vadd.f32 %v1172_v59, %v1128_v25  ;;  %v550_v50 = vadd.f32 %v536_v12, %v492_v15  ;;  %v1242_v56 = vadd.f32 %v1228_v58, %v1184_v51  ;;  %v8541_v25 = vld [vmem:[#allocation98_spill] sm:$0xff] }
 0x258   : > { %v1286_v17 = vsel %vm1283_vm14, %v8536_v54, %v8535_v46  ;;  %v1287_v0 = vsel %vm1283_vm14, %v8535_v46, %v8538_v47  ;;  %v1288_v29 = vsel %vm1283_vm14, %v8538_v47, %v8539_v22  ;;  %v1129_v51 = vadd.f32 %v1115_v19, %v1071_v30  ;;  %v8545_v19 = vld [vmem:[#allocation97_spill] sm:$0xff] }
 0x259   : > { %v1243_v21 = vadd.f32 %v1229_v37, %v1185_v1  ;;  %v1244_v59 = vadd.f32 %v1230_v55, %v1186_v10  ;;  %v1300_v12 = vadd.f32 %v1286_v17, %v1242_v56  ;;  %v1345_v46 = vsel %vm1341_vm15, %v8541_v25, %v8543_v5  ;;  %v8546_v56 = vld [vmem:[#allocation92_spill] sm:$0xff] }
 0x25a   : > { %vm1457_vm1 = vcmask 236544   ;;  %v1402_v37 = vsel %vm1399_vm10, %v5598_v53, %v8545_v19  ;;  %v594_v17 = vsel %vm587_vm2, %v4973_v8, %v8546_v56  ;;  %v8548_v8 = vld [vmem:[#allocation103_spill] sm:$0xff] }
 0x25b   : > { %v1301_v10 = vadd.f32 %v1287_v0, %v1243_v21  ;;  %v1302_v1 = vadd.f32 %v1288_v29, %v1244_v59  ;;  %v1404_v0 = vsel %vm1399_vm10, %v5602_v27, %v5672_v16  ;;  %v8547_v29 = vld [vmem:[#allocation78_spill] sm:$0xff]  ;;  %v1460_v38 = vsel %vm1457_vm1, %v5735_v43, %v5779_v9 }
 0x25c   : > { %1725 = vrot.lane.b32.xlu1 %v8537_v23, %s8337_s25  ;;  %1735 = vrot.lane.b32.xlu2 %v5559_v45, %s8337_s25  ;;  %v1344_v45 = vsel %vm1341_vm15, %v8542_v41, %v8541_v25  ;;  %v8544_v23 = vld [vmem:[#allocation90_spill] sm:$0xff]  ;;  %v1403_v25 = vsel %vm1399_vm10, %v8545_v19, %v5602_v27  ;;  %v1173_v21 = vsel %vm1167_vm12, %v8526_v3, %v8547_v29 }
 0x25d   : > { %1223 = vrot.lane.b32.xlu0 %v5563_v18, %s8540_s24  ;;  %v1346_v18 = vsel %vm1341_vm15, %v8543_v5, %v8544_v23  ;;  %v1358_v47 = vadd.f32 %v1344_v45, %v1300_v12  ;;  %v1359_v59 = vadd.f32 %v1345_v46, %v1301_v10  ;;  %v652_v45 = vsel %vm645_vm3, %v8473_v62, %v8548_v8  ;;  %v8550_v10 = vld [vmem:[#allocation106_spill] sm:$0xff]  ;;  %v8551_v62 = vld [vmem:[#allocation77_spill] sm:$0xff]  ;;  %s8343_s24 = smov 107  }
 0x25e   : > { %v5891_v15 = vpop.permute.xlu1 %1395  ;;  %v5893_v58 = vpop.permute.xlu2 %1453  ;;  %v1360_v5 = vadd.f32 %v1346_v18, %v1302_v1  ;;  %v1461_v19 = vsel %vm1457_vm1, %v5779_v9, %v5600_v26  ;;  %v1462_v27 = vsel %vm1457_vm1, %v5600_v26, %v5789_v60  ;;  %v608_v3 = vadd.f32 %v594_v17, %v550_v50  ;;  %v8553_v26 = vld [vmem:[#allocation96_spill] sm:$0xff]  ;;  %v8554_v8 = vld [vmem:[#allocation86_spill] sm:$0xff] }
 0x25f   : > { %v1506_v30 = vpop.permute.xlu0 %1505  ;;  %v1416_v12 = vadd.f32 %v1402_v37, %v1358_v47  ;;  %v1417_v46 = vadd.f32 %v1403_v25, %v1359_v59  ;;  %v1125_v1 = vadd.f32 %v1111_v57, %v1067_v6  ;;  %v1110_v37 = vsel %vm1109_vm11, %v8551_v62, %v8527_v24  ;;  %v8552_v47 = vld [vmem:[#allocation107_spill] sm:$0xff] }
 0x260   : > { %v1518_v55 = vsel %vm1515_vm9, %v5727_v49, %v1506_v30  ;;  %v1418_v18 = vadd.f32 %v1404_v0, %v1360_v5  ;;  %v1187_v56 = vadd.f32 %v1173_v21, %v1129_v51  ;;  %v1231_v50 = vsel %vm1225_vm13, %v8534_v4, %v8553_v26 }
 0x261   : > { %v1474_v9 = vadd.f32 %v1460_v38, %v1416_v12  ;;  %v666_v17 = vadd.f32 %v652_v45, %v608_v3  ;;  %v1475_v25 = vadd.f32 %v1461_v19, %v1417_v46  ;;  %v1169_v45 = vsel %vm1167_vm12, %v8554_v8, %v8524_v34  ;;  %v8555_v12 = vld [vmem:[#allocation113_spill] sm:$0xff] }
 0x262   : > { %v1476_v0 = vadd.f32 %v1462_v27, %v1418_v18  ;;  %v1289_v19 = vsel %vm1283_vm14, %v8539_v22, %v8555_v12  ;;  %v8556_v27 = vld [vmem:[#allocation85_spill] sm:$0xff]  ;;  %v1245_v3 = vadd.f32 %v1231_v50, %v1187_v56  ;;  %v1183_v62 = vadd.f32 %v1169_v45, %v1125_v1 }
 0x263   : > { %v8558_v18 = vld [vmem:[#allocation101_spill] sm:$0xff] }
 0x264   : > { %1165 = vrot.lane.b32.xlu1 %v8550_v10, %s8549_s13  ;;  %1780 = vrot.lane.b32.xlu2 %v5635_v36, %s8339_s29  ;;  %v1532_v36 = vadd.f32 %v1518_v55, %v1474_v9  ;;  %v710_v22 = vsel %vm703_vm4, %v8477_v13, %v8558_v18  ;;  %v1303_v56 = vadd.f32 %v1289_v19, %v1245_v3  ;;  %v8560_v13 = vld [vmem:[#allocation110_spill] sm:$0xff]  ;;  %s4530_s13 = smov 108  }
 0x265   : > { %1397 = vrot.lane.b32.xlu0 %v8552_v47, %s4519_s14  ;;  %s8567_s14 = smov 32  }
 0x266   : > { %v1508_v59 = vpop.permute.xlu1 %1507  ;;  %v5942_v5 = vpop.permute.xlu2 %1501 }
 0x267   : > { %v1519_v57 = vsel %vm1515_vm9, %v1506_v30, %v1508_v59  ;;  %v1520_v24 = vsel %vm1515_vm9, %v1508_v59, %v5781_v14  ;;  %v5947_v6 = vpop.permute.xlu0 %1539  ;;  %v5952_v38 = vsel %vm1515_vm9, %v5942_v5, %v5727_v49  ;;  %v1124_v30 = vadd.f32 %v1110_v37, %v5852_v7  ;;  %v8557_v7 = vld [vmem:[#allocation95_spill] sm:$0xff]  ;;  %v8564_v59 = vld [vmem:[#allocation112_spill] sm:$0xff] }
 0x268   : > { %v1533_v4 = vadd.f32 %v1519_v57, %v1475_v25  ;;  %v1534_v51 = vadd.f32 %v1520_v24, %v1476_v0  ;;  %v1560_v21 = vmul.f32 %v5402_v44, %v5947_v6  ;;  %v1559_v55 = vmul.f32 %v5400_v35, %v5947_v6  ;;  %v8563_v0 = vld [vmem:[#allocation111_spill] sm:$0xff] }
 0x269   : > { %v1561_v49 = vmul.f32 %v5385_v39, %v5947_v6  ;;  %v1168_v44 = vsel %vm1167_vm12, %v8556_v27, %v8554_v8  ;;  %v1227_v34 = vsel %vm1225_vm13, %v8557_v7, %v8530_v63  ;;  %v768_v39 = vsel %vm761_vm5, %v8483_v40, %v5837_v32  ;;  %v8559_v63 = vld [vmem:[#allocation84_spill] sm:$0xff] }
 0x26a   : > { %v5970_v46 = vadd.f32 %v1560_v21, %v1533_v4  ;;  %v5972_v35 = vadd.f32 %v1559_v55, %v1532_v36  ;;  %v724_v37 = vadd.f32 %v710_v22, %v666_v17  ;;  %v1226_v9 = vsel %vm1225_vm13, %v8559_v63, %v8557_v7  ;;  %v8561_v17 = vld [vmem:[#allocation11_spill] sm:$0xff] }
 0x26b   : > { %v5983_v10 = vadd.f32 %v1561_v49, %v1534_v51  ;;  %v1182_v47 = vadd.f32 %v1168_v44, %v1124_v30  ;;  %v1241_v40 = vadd.f32 %v1227_v34, %v1183_v62  ;;  %v1258_v25 = vmul.f32 %v8561_v17, %v5098_v20 }
 0x26c   : > { %1782 = vrot.lane.b32.xlu1 %v5642_v42, %s8339_s29  ;;  %1792 = vrot.lane.b32.xlu2 %v5646_v31, %s8339_s29  ;;  %v782_v32 = vadd.f32 %v768_v39, %v724_v37  ;;  %v8562_v42 = vld [vmem:[#allocation93_spill] sm:$0xff]  ;;  %v1347_v36 = vsel %vm1341_vm15, %v8544_v23, %v8564_v59  ;;  %v1405_v57 = vsel %vm1399_vm10, %v5672_v16, %v5891_v15 }
 0x26d   : > { %1623 = vrot.lane.b32.xlu0 %v8560_v13, %s8335_s22  ;;  %v1284_v31 = vsel %vm1283_vm14, %v8563_v0, %v8562_v42  ;;  %v1240_v51 = vadd.f32 %v1226_v9, %v1182_v47  ;;  %v1361_v21 = vadd.f32 %v1347_v36, %v1303_v56  ;;  %v1285_v8 = vsel %vm1283_vm14, %v8562_v42, %v8536_v54  ;;  %v8571_v56 = vld [vmem:[#allocation51_spill] sm:$0xff]  ;;  %v8572_v9 = vld [vmem:[#allocation94_spill] sm:$0xff]  ;;  %v8574_v0 = vld [vmem:[#allocation13_spill] sm:$0xff] }
 0x26e   : > { %v818_v50 = vpop.permute.xlu1 %817  ;;  %v5994_v1 = vpop.permute.xlu2 %1615  ;;  %v1342_v23 = vsel %vm1341_vm15, %v5682_v33, %v5725_v61  ;;  %v1343_v16 = vsel %vm1341_vm15, %v5725_v61, %v8542_v41  ;;  %v1299_v19 = vadd.f32 %v1285_v8, %v1241_v40  ;;  %v1401_v54 = vsel %vm1399_vm10, %v5850_v28, %v5598_v53  ;;  %v8566_v61 = vld [vmem:[#allocation108_spill] sm:$0xff] }
 0x26f   : > { %v826_v24 = vsel %vm819_vm6, %v8492_v48, %v818_v50  ;;  %v876_v4 = vpop.permute.xlu0 %875  ;;  %v8565_v48 = vld [vmem:[#allocation9_spill] sm:$0xff]  ;;  %v1298_v49 = vadd.f32 %v1284_v31, %v1240_v51  ;;  %v1419_v27 = vadd.f32 %v1405_v57, %v1361_v21  ;;  %v1463_v33 = vsel %vm1457_vm1, %v5789_v60, %v5893_v58 }
 0x270   : > { %v840_v55 = vadd.f32 %v826_v24, %v782_v32  ;;  %v884_v30 = vsel %vm877_vm7, %v5199_v52, %v876_v4  ;;  %v1316_v45 = vmul.f32 %v8565_v48, %v5098_v20  ;;  %v1400_v52 = vsel %vm1399_vm10, %v5674_v2, %v5850_v28  ;;  %v8569_v28 = vld [vmem:[#allocation99_spill] sm:$0xff]  ;;  %v8570_v60 = vld [vmem:[#allocation17_spill] sm:$0xff] }
 0x271   : > { %v1771_v41 = vmul.f32 %v4975_v11, %v8566_v61  ;;  %v1356_v3 = vadd.f32 %v1342_v23, %v1298_v49  ;;  %v1357_v7 = vadd.f32 %v1343_v16, %v1299_v19  ;;  %v1477_v18 = vadd.f32 %v1463_v33, %v1419_v27 }
 0x272   : > { %v898_v44 = vadd.f32 %v884_v30, %v840_v55  ;;  %v1558_v39 = vmul.f32 %v8569_v28, %v5947_v6  ;;  %v1562_v13 = vmul.f32 %v8572_v9, %v5947_v6  ;;  %v1490_v31 = vmul.f32 %v8574_v0, %v5098_v20  ;;  %v8576_v30 = vld [vmem:[#allocation12_spill] sm:$0xff] }
 0x273   : > { %v1414_v2 = vadd.f32 %v1400_v52, %v1356_v3  ;;  %v1415_v34 = vadd.f32 %v1401_v54, %v1357_v7  ;;  %v1657_v8 = vmul.f32 %v8576_v30, %v8566_v61  ;;  %vm8579_vm6 = vcmask 1031168   ;;  %v8580_v28 = vld [vmem:[#allocation64_spill] sm:$0xff] }
 0x274   : > { %1281 = vrot.lane.b32.xlu1 %v1258_v25, %s8567_s14  ;;  %1339 = vrot.lane.b32.xlu2 %v1316_v45, %s8568_s15  ;;  %vm8581_vm7 = vcmask 523264   ;;  %s8342_s15 = smov 91   ;;  %s8344_s14 = smov 109  }
 0x275   : > { %1794 = vrot.lane.b32.xlu0 %v1771_v41, %s8339_s29  ;;  %s4524_s29 = smov 88  }
 0x276   : > { %v1444_v22 = vpop.permute.xlu1 %1443  ;;  %v934_v53 = vpop.permute.xlu2 %933 }
 0x277   : > { %v1458_v62 = vsel %vm1457_vm1, %v8570_v60, %v1444_v22  ;;  %v1459_v11 = vsel %vm1457_vm1, %v1444_v22, %v5735_v43  ;;  %v6042_v37 = vpop.permute.xlu0 %1511  ;;  %v942_v63 = vsel %vm8334_vm8, %v8571_v56, %v934_v53  ;;  %v8573_v43 = vld [vmem:[#allocation10_spill] sm:$0xff]  ;;  %vm8582_vm8 = vmmov %vm8579_vm6 }
 0x278   : > { %v1472_v47 = vadd.f32 %v1458_v62, %v1414_v2  ;;  %v1473_v40 = vadd.f32 %v1459_v11, %v1415_v34  ;;  %v1521_v32 = vsel %vm1515_vm9, %v5781_v14, %v6042_v37  ;;  %v956_v50 = vadd.f32 %v942_v63, %v898_v44  ;;  %v8575_v14 = vld [vmem:[#allocation102_spill] sm:$0xff] }
 0x279   : > { %v1535_v17 = vadd.f32 %v1521_v32, %v1477_v18  ;;  %v1432_v42 = vmul.f32 %v8573_v43, %v5098_v20  ;;  %v1557_v51 = vmul.f32 %v8575_v14, %v5947_v6  ;;  %v8577_v20 = vld [vmem:[#allocation14_spill] sm:$0xff] }
 0x27a   : > { %v1531_v25 = vadd.f32 %v5952_v38, %v1473_v40  ;;  %v1714_v23 = vmul.f32 %v8577_v20, %v8566_v61 }
 0x27b   : > { %v1569_v36 = vadd.f32 %v1562_v13, %v1535_v17 }
 0x27c   : > { %1455 = vrot.lane.b32.xlu1 %v1432_v42, %s4520_s30  ;;  %1513 = vrot.lane.b32.xlu2 %v1490_v31, %s4522_s12  ;;  %v1565_v57 = vadd.f32 %v1558_v39, %v1531_v25  ;;  %s8578_s30 = smov 126   ;;  %s8590_s12 = smov 96  }
 0x27e   : > { %v1500_v24 = vpop.permute.xlu1 %1499  ;;  %v1675_v4 = vpop.permute.xlu2 %1674 }
 0x27f   : > { %v1516_v38 = vsel %vm1515_vm9, %v1500_v24, %v5942_v5  ;;  %v1618_v21 = vpop.permute.xlu0 %1617 }
 0x280   : > { %v1530_v55 = vadd.f32 %v1516_v38, %v1472_v47 }
 0x282   : > { %v1564_v16 = vadd.f32 %v1557_v51, %v1530_v55 }
 0x284   : > { %1680 = vrot.lane.b32.xlu1 %v1657_v8, %s8578_s30  ;;  %1737 = vrot.lane.b32.xlu2 %v1714_v23, %s8337_s25  ;;  %s4533_s25 = smov 52  }
 0x286   : > { %v1614_v48 = vpop.permute.xlu1 %1613  ;;  %v1610_v45 = vpop.permute.xlu2 %1609 }
 0x287   : > { %v1671_v19 = vpop.permute.xlu0 %1670  ;;  %v1627_v31 = vsel %vm471_vm0, %v1614_v48, %v5994_v1 }
 0x288   : > { %v1641_v38 = vadd.f32 %v1627_v31, %v5972_v35 }
 0x28e   : > { %v1620_v49 = vpop.permute.xlu1 %1619  ;;  %v6068_v27 = vpop.permute.xlu2 %1727 }
 0x28f   : > { %v1629_v5 = vsel %vm471_vm0, %v1618_v21, %v1620_v49  ;;  %v1677_v44 = vpop.permute.xlu0 %1676 }
 0x290   : > { %v1643_v52 = vadd.f32 %v1629_v5, %v5983_v10  ;;  %v1686_v54 = vsel %vm8579_vm6, %v1675_v4, %v1677_v44 }
 0x292   : > { %v6073_v33 = vadd.f32 %v1686_v54, %v1643_v52 }
 0x296   : > { %v1673_v61 = vpop.permute.xlu1 %1672  ;;  %v1734_v41 = vpop.permute.xlu2 %1733 }
 0x297   : > { %v1612_v3 = vpop.permute.xlu0 %1611 }
 0x298   : > { %v1625_v7 = vsel %vm471_vm0, %v1610_v45, %v1612_v3  ;;  %v1626_v2 = vsel %vm471_vm0, %v1612_v3, %v1614_v48 }
 0x299   : > { %v6077_v34 = vadd.f32 %v1625_v7, %v1564_v16  ;;  %v1640_v18 = vadd.f32 %v1626_v2, %v1565_v57 }
 0x29e   : > { %v992_v22 = vpop.permute.xlu1 %991  ;;  %v1669_v53 = vpop.permute.xlu2 %1668 }
 0x29f   : > { %v1000_v39 = vsel %vm8581_vm7, %v8580_v28, %v992_v22  ;;  %v1730_v10 = vpop.permute.xlu0 %1729  ;;  %v1683_v60 = vsel %vm8582_vm8, %v1669_v53, %v1671_v19  ;;  %vm8583_vm8 = vmmov %vm8579_vm6 }
 0x2a0   : > { %v1014_v62 = vadd.f32 %v1000_v39, %v956_v50  ;;  %v1697_v11 = vadd.f32 %v1683_v60, %v1640_v18  ;;  %v1628_v50 = vsel %vm471_vm0, %v5994_v1, %v1618_v21  ;;  %vm8584_vm7 = vmmov %vm8579_vm6  ;;  %v1741_v55 = vsel %vm587_vm2, %v6068_v27, %v1730_v10 }
 0x2a1   : > { %v1685_v24 = vsel %vm8584_vm7, %v1673_v61, %v1675_v4  ;;  %v1642_v51 = vadd.f32 %v1628_v50, %v5970_v46  ;;  %vm2800_vm7 = vcmask 883712  }
 0x2a3   : > { %v1699_v21 = vadd.f32 %v1685_v24, %v1642_v51 }
 0x2a6   : > { %v6082_v56 = vpop.permute.xlu1 %1621  ;;  %v1787_v47 = vpop.permute.xlu2 %1786 }
 0x2a7   : > { %v1630_v63 = vsel %vm471_vm0, %v1620_v49, %v6082_v56  ;;  %v1050_v9 = vpop.permute.xlu0 %1049 }
 0x2a8   : > { %v1644_v13 = vadd.f32 %v1630_v63, %v1569_v36  ;;  %v1684_v36 = vsel %vm8583_vm8, %v1671_v19, %v1673_v61  ;;  %vm8586_vm8 = vcmask 515072  }
 0x2a9   : > { %v1698_v8 = vadd.f32 %v1684_v36, %v1641_v38 }
 0x2ab   : > { %v1755_v16 = vadd.f32 %v1741_v55, %v1698_v8 }
 0x2ae   : > { %v1732_v40 = vpop.permute.xlu1 %1731  ;;  %v1108_v0 = vpop.permute.xlu2 %1107 }
 0x2af   : > { %v6086_v32 = vpop.permute.xlu0 %1678  ;;  %v1742_v30 = vsel %vm587_vm2, %v1730_v10, %v1732_v40  ;;  %v1743_v2 = vsel %vm587_vm2, %v1732_v40, %v1734_v41  ;;  %v8585_v10 = vld [vmem:[#allocation71_spill] sm:$0xff] }
 0x2b0   : > { %v1687_v17 = vsel %vm8579_vm6, %v1677_v44, %v6086_v32  ;;  %v1756_v4 = vadd.f32 %v1742_v30, %v1699_v21  ;;  %v1058_v60 = vsel %vm8586_vm8, %v8585_v10, %v1050_v9  ;;  %v1757_v63 = vadd.f32 %v1743_v2, %v6073_v33 }
 0x2b1   : > { %v1701_v25 = vadd.f32 %v1687_v17, %v1644_v13  ;;  %v1072_v31 = vadd.f32 %v1058_v60, %v1014_v62  ;;  %v8588_v60 = vld [vmem:[#allocation104_spill] sm:$0xff]  ;;  %vm2781_vm8 = vcmask 891904  }
 0x2b6   : > { %v1667_v43 = vpop.permute.xlu1 %1666  ;;  %v6101_v20 = vpop.permute.xlu2 %1735 }
 0x2b7   : > { %v1789_v42 = vpop.permute.xlu0 %1788  ;;  %v1744_v18 = vsel %vm587_vm2, %v1734_v41, %v6101_v20  ;;  %v1682_v22 = vsel %vm8579_vm6, %v1667_v43, %v1669_v53  ;;  %v8587_v41 = vld [vmem:[#allocation79_spill] sm:$0xff] }
 0x2b8   : > { %v1799_v1 = vsel %vm645_vm3, %v1787_v47, %v1789_v42  ;;  %v1758_v13 = vadd.f32 %v1744_v18, %v1701_v25  ;;  %v1116_v53 = vsel %vm1109_vm11, %v8587_v41, %v1108_v0  ;;  %v1696_v43 = vadd.f32 %v1682_v22, %v6077_v34 }
 0x2b9   : > { %v1813_v48 = vadd.f32 %v1799_v1, %v1756_v4  ;;  %v1130_v51 = vadd.f32 %v1116_v53, %v1072_v31  ;;  %vm2875_vm11 = vcmask 744448  }
 0x2be   : > { %v1785_v57 = vpop.permute.xlu1 %1784  ;;  %v1781_v52 = vpop.permute.xlu2 %1780 }
 0x2bf   : > { %v1724_v14 = vpop.permute.xlu0 %1723  ;;  %v1798_v23 = vsel %vm645_vm3, %v1785_v57, %v1787_v47 }
 0x2c0   : > { %v1812_v45 = vadd.f32 %v1798_v23, %v1755_v16 }
 0x2c6   : > { %v1791_v46 = vpop.permute.xlu1 %1790  ;;  %v6120_v3 = vpop.permute.xlu2 %1792 }
 0x2c7   : > { %v6105_v19 = vpop.permute.xlu0 %1820  ;;  %v1800_v28 = vsel %vm645_vm3, %v1789_v42, %v1791_v46  ;;  %v1801_v39 = vsel %vm645_vm3, %v1791_v46, %v6120_v3 }
 0x2c8   : > { %v6108_v35 = vadd.f32 %v6105_v19, %v1812_v45  ;;  %v6111_v49 = vadd.f32 %v6105_v19, %v1813_v48  ;;  %v1814_v42 = vadd.f32 %v1800_v28, %v1757_v63  ;;  %v1815_v50 = vadd.f32 %v1801_v39, %v1758_v13 }
 0x2c9   : > { %v1563_v63 = vmul.f32 %v8588_v60, %v5947_v6  ;;  %v2104_v60 = vld [vmem:[%s8223_s3 + $0x558] sm:$0xff] }
 0x2ca   : > { %v1832_v5 = vmax.f32 %v6108_v35, 0.0  ;;  %v1833_v44 = vmax.f32 %v6111_v49, 0.0  ;;  %v6146_v34 = vadd.f32 %v6105_v19, %v1814_v42  ;;  %v2068_v49 = vld [vmem:[%s8223_s3 + $0x438] sm:$0xff] }
 0x2cc   : > { %v4389_v54 = vpack.i.bf16 %v1833_v44, %v1832_v5  ;;  %v1834_v21 = vmax.f32 %v6146_v34, 0.0  ;;  %v1975_v34 = vld [vmem:[%s8223_s3 + $0x150] sm:$0xff] }
 0x2ce   : > { %v1726_v61 = vpop.permute.xlu1 %1725  ;;  %4390 = vrot.lane.b32.xlu1 %v4389_v54, %s8335_s22  ;;  %v1340_v62 = vpop.permute.xlu2 %1339 }
 0x2cf   : > { %v1224_v47 = vpop.permute.xlu0 %1223  ;;  %v1739_v17 = vsel %vm587_vm2, %v1724_v14, %v1726_v61  ;;  %v1740_v40 = vsel %vm587_vm2, %v1726_v61, %v6068_v27  ;;  %v6143_v27 = vadd.f32 %v6105_v19, %v1815_v50 }
 0x2d0   : > { %v1753_v36 = vadd.f32 %v1739_v17, %v1696_v43  ;;  %v1754_v24 = vadd.f32 %v1740_v40, %v1697_v11  ;;  %v1232_v23 = vsel %vm1225_vm13, %v8553_v26, %v1224_v47  ;;  %v1348_v26 = vsel %vm1341_vm15, %v8564_v59, %v1340_v62 }
 0x2d1   : > { %vm2838_vm13 = vcmask 867328   ;;  %vm2951_vm15 = vcmask 605184  }
 0x2d6   : > { %v1166_v7 = vpop.permute.xlu1 %1165  ;;  %v1514_v61 = vpop.permute.xlu2 %1513 }
 0x2d7   : > { %v1174_v33 = vsel %vm1167_vm12, %v8547_v29, %v1166_v7  ;;  %v1835_v29 = vmax.f32 %v6143_v27, 0.0  ;;  %v1398_v8 = vpop.permute.xlu0 %1397  ;;  %v1522_v39 = vsel %vm1515_vm9, %v6042_v37, %v1514_v61  ;;  %v2020_v61 = vld [vmem:[%s8223_s3 + $0x2b8] sm:$0xff]  ;;  %v2245_v27 = vld [vmem:[%s8223_s3 + $0x9c0] sm:$0xff]  ;;  %vm2913_vm9 = vcmask 728064  }
 0x2d8   : > { %v1188_v55 = vadd.f32 %v1174_v33, %v1130_v51  ;;  %v1406_v7 = vsel %vm1399_vm10, %v5891_v15, %v1398_v8  ;;  %vm8589_vm10 = vmmov %vm8579_vm6  ;;  %v2074_v33 = vld [vmem:[%s8223_s3 + $0x468] sm:$0xff]  ;;  %vm8597_vm12 = vcmask 752640   ;;  %vm2894_vm6 = vcmask 736256  }
 0x2d9   : > { %2310 = vmatpush.msra.mxu2 %v2074_v33  ;;  %v2095_v33 = vld [vmem:[%s8223_s3 + $0x510] sm:$0xff] }
 0x2da   : > { %v1246_v45 = vadd.f32 %v1232_v23, %v1188_v55  ;;  %v2119_v23 = vld [vmem:[%s8223_s3 + $0x5d0] sm:$0xff] }
 0x2de   : > { %v1783_v9 = vpop.permute.xlu1 %1782  ;;  %v1738_v47 = vpop.permute.xlu2 %1737 }
 0x2df   : > { %v1796_v25 = vsel %vm645_vm3, %v1781_v52, %v1783_v9  ;;  %v1797_v14 = vsel %vm645_vm3, %v1783_v9, %v1785_v57  ;;  %v1624_v2 = vpop.permute.xlu0 %1623  ;;  %v1745_v53 = vsel %vm587_vm2, %v6101_v20, %v1738_v47  ;;  %v2038_v47 = vld [vmem:[%s8223_s3 + $0x348] sm:$0xff] }
 0x2e0   : > { %v1811_v0 = vadd.f32 %v1797_v14, %v1754_v24  ;;  %v1810_v38 = vadd.f32 %v1796_v25, %v1753_v36  ;;  %v1631_v13 = vsel %vm471_vm0, %v6082_v56, %v1624_v2  ;;  %v2071_v25 = vld [vmem:[%s8223_s3 + $0x450] sm:$0xff]  ;;  %v1969_v2 = vld [vmem:[%s8223_s3 + $0x120] sm:$0xff] }
 0x2e1   : > { %2311 = vmatpush.msra.mxu2 %v2071_v25  ;;  %v2236_v25 = vld [vmem:[%s8223_s3 + $0x978] sm:$0xff] }
 0x2e2   : > { %v6149_v11 = vadd.f32 %v6105_v19, %v1811_v0  ;;  %v6152_v30 = vadd.f32 %v6105_v19, %v1810_v38  ;;  %v2065_v0 = vld [vmem:[%s8223_s3 + $0x420] sm:$0xff]  ;;  %v2122_v38 = vld [vmem:[%s8223_s3 + $0x5e8] sm:$0xff] }
 0x2e3   : > { %2312 = vmatpush.msra.mxu2 %v2068_v49  ;;  %2330 = vmatpush.msra.mxu3 %v2122_v38  ;;  %v2002_v49 = vld [vmem:[%s8223_s3 + $0x228] sm:$0xff]  ;;  %v2089_v38 = vld [vmem:[%s8223_s3 + $0x4e0] sm:$0xff] }
 0x2e4   : > { %v1831_v57 = vmax.f32 %v6149_v11, 0.0  ;;  %v1830_v1 = vmax.f32 %v6152_v30, 0.0  ;;  %v2116_v30 = vld [vmem:[%s8223_s3 + $0x5b8] sm:$0xff] }
 0x2e5   : > { %2313 = vmatpush.msra.mxu2 %v2065_v0  ;;  %2331 = vmatpush.msra.mxu3 %v2119_v23  ;;  %v1999_v0 = vld [vmem:[%s8223_s3 + $0x210] sm:$0xff]  ;;  %v2086_v23 = vld [vmem:[%s8223_s3 + $0x4c8] sm:$0xff] }
 0x2e6   : > { %v4399_v16 = vpack.i.bf16 %v1835_v29, %v1831_v57  ;;  %v4394_v4 = vpack.i.bf16 %v1830_v1, %v1834_v21  ;;  %v1282_v48 = vpop.permute.xlu1 %1281 }
 0x2e7   : > { %v1290_v46 = vsel %vm1283_vm14, %v8555_v12, %v1282_v48  ;;  %v1795_v41 = vpop.permute.xlu0 %1794  ;;  %2332 = vmatpush.msra.mxu3 %v2116_v30  ;;  %v2083_v30 = vld [vmem:[%s8223_s3 + $0x4b0] sm:$0xff]  ;;  %vm2819_vm14 = vcmask 875520  }
 0x2e8   : > { %v1304_v52 = vadd.f32 %v1290_v46, %v1246_v45  ;;  %4400 = vrot.lane.b32.xlu0 %v4399_v16, %s8335_s22  ;;  %4395 = vrot.lane.b32.xlu2 %v4394_v4, %s8335_s22  ;;  %v1802_v43 = vsel %vm645_vm3, %v6120_v3, %v1795_v41  ;;  %v1978_v16 = vld [vmem:[%s8223_s3 + $0x168] sm:$0xff]  ;;  %v2029_v41 = vld [vmem:[%s8223_s3 + $0x300] sm:$0xff] }
 0x2e9   : > { %v2062_v46 = vld [vmem:[%s8223_s3 + $0x408] sm:$0xff]  ;;  %2270 = vmatpush.msra.mxu0 %v1978_v16  ;;  %v2227_v16 = vld [vmem:[%s8223_s3 + $0x930] sm:$0xff] }
 0x2ea   : > { %v1362_v54 = vadd.f32 %v1348_v26, %v1304_v52  ;;  %v2026_v52 = vld [vmem:[%s8223_s3 + $0x2e8] sm:$0xff]  ;;  %2314 = vmatpush.msra.mxu2 %v2062_v46  ;;  %v1972_v26 = vld [vmem:[%s8223_s3 + $0x138] sm:$0xff]  ;;  %v1945_v46 = vld [vmem:[%s8223_s3 + $0x60] sm:$0xff] }
 0x2eb   : > { %2290 = vmatpush.msra.mxu1 %v2026_v52  ;;  %2271 = vmatpush.msra.mxu0 %v1975_v34  ;;  %v1993_v52 = vld [vmem:[%s8223_s3 + $0x1e0] sm:$0xff]  ;;  %v2224_v34 = vld [vmem:[%s8223_s3 + $0x918] sm:$0xff] }
 0x2ec   : > { %v1420_v22 = vadd.f32 %v1406_v7, %v1362_v54  ;;  %v2056_v54 = vld [vmem:[%s8223_s3 + $0x3d8] sm:$0xff]  ;;  %v2110_v7 = vld [vmem:[%s8223_s3 + $0x588] sm:$0xff] }
 0x2ed   : > { %2272 = vmatpush.msra.mxu0 %v1972_v26  ;;  %v1939_v26 = vld [vmem:[%s8223_s3 + $0x30] sm:$0xff] }
 0x2ee   : > { %v1456_v18 = vpop.permute.xlu1 %1455 }
 0x2ef   : > { %v1464_v28 = vsel %vm1457_vm1, %v5893_v58, %v1456_v18  ;;  %v2053_v18 = vld [vmem:[%s8223_s3 + $0x3c0] sm:$0xff]  ;;  %2273 = vmatpush.msra.mxu0 %v1969_v2  ;;  %vm2260_vm1 = vcmask 1046528   ;;  %v1936_v2 = vld [vmem:[%s8223_s3 + $0x18] sm:$0xff] }
 0x2f0   : > { %v1478_v12 = vadd.f32 %v1464_v28, %v1420_v22  ;;  %v2017_v22 = vld [vmem:[%s8223_s3 + $0x2a0] sm:$0xff]  ;;  %v2107_v28 = vld [vmem:[%s8223_s3 + $0x570] sm:$0xff] }
 0x2f2   : > { %v1536_v10 = vadd.f32 %v1522_v39, %v1478_v12  ;;  %v1966_v12 = vld [vmem:[%s8223_s3 + $0x108] sm:$0xff] }
 0x2f3   : > { %v2050_v39 = vld [vmem:[%s8223_s3 + $0x3a8] sm:$0xff]  ;;  %2274 = vmatpush.msra.mxu0 %v1966_v12  ;;  %v1981_v12 = vld [vmem:[%s8223_s3 + $0x180] sm:$0xff] }
 0x2f4   : > { %v1570_v59 = vadd.f32 %v1563_v63, %v1536_v10  ;;  %v2014_v10 = vld [vmem:[%s8223_s3 + $0x288] sm:$0xff]  ;;  %v2047_v63 = vld [vmem:[%s8223_s3 + $0x390] sm:$0xff] }
 0x2f6   : > { %v1681_v15 = vpop.permute.xlu1 %1680  ;;  %v1645_v17 = vadd.f32 %v1631_v13, %v1570_v59  ;;  %v2044_v59 = vld [vmem:[%s8223_s3 + $0x378] sm:$0xff]  ;;  %v2041_v13 = vld [vmem:[%s8223_s3 + $0x360] sm:$0xff] }
 0x2f7   : > { %v1688_v40 = vsel %vm8589_vm10, %v6086_v32, %v1681_v15  ;;  %v2035_v15 = vld [vmem:[%s8223_s3 + $0x330] sm:$0xff]  ;;  %vm2762_vm10 = vcmask 900096  }
 0x2f8   : > { %v1702_v58 = vadd.f32 %v1688_v40, %v1645_v17  ;;  %v2032_v17 = vld [vmem:[%s8223_s3 + $0x318] sm:$0xff] }
 0x2fa   : > { %v1759_v37 = vadd.f32 %v1745_v53, %v1702_v58 }
 0x2fc   : > { %v1816_v6 = vadd.f32 %v1802_v43, %v1759_v37  ;;  %v2254_v37 = vld [vmem:[%s8223_s3 + $0xa08] sm:$0x7f] }
 0x2fe   : > { %v6191_v42 = vadd.f32 %v6105_v19, %v1816_v6  ;;  %v2251_v6 = vld [vmem:[%s8223_s3 + $0x9f0] sm:$0xff] }
 0x300   : > { %v1836_v56 = vmax.f32 %v6191_v42, 0.0  ;;  %v2248_v42 = vld [vmem:[%s8223_s3 + $0x9d8] sm:$0xff] }
 0x302   : > { %1870 = vrot.lane.b32.xlu1 %v1836_v56, %s8335_s22  ;;  %s4532_s22 = smov 110  }
 0x340   : > { %v4391_v32 = vpop.permute.xlu1 %4390 }
 0x341   : > { %v4393_v50 = vunpack.i.h.bf16 %v4391_v32  ;;  %v4392_v31 = vunpack.i.l.bf16 %v4391_v32  ;;  %v2101_v32 = vld [vmem:[%s8223_s3 + $0x540] sm:$0xff] }
 0x342   : > { %v4396_v36 = vpop.permute.xlu2 %4395 }
 0x343   : > { %v1874_v20 = vsel %vm471_vm0, %v4392_v31, %v4393_v50  ;;  %v4397_v24 = vunpack.i.l.bf16 %v4396_v36 }
 0x344   : > { %v6201_v3 = vmax.f32 %v1832_v5, %v1874_v20  ;;  %v4398_v5 = vunpack.i.h.bf16 %v4396_v36  ;;  %v2008_v36 = vld [vmem:[%s8223_s3 + $0x258] sm:$0xff]  ;;  %v2098_v20 = vld [vmem:[%s8223_s3 + $0x528] sm:$0xff] }
 0x345   : > { %v1875_v9 = vsel %vm471_vm0, %v4393_v50, %v4397_v24  ;;  %v2242_v50 = vld [vmem:[%s8223_s3 + $0x9a8] sm:$0xff] }
 0x346   : > { %v6205_v19 = vmax.f32 %v1833_v44, %v1875_v9  ;;  %v1957_v9 = vld [vmem:[%s8223_s3 + $0xc0] sm:$0xff] }
 0x348   : > { %v4404_v51 = vpack.i.bf16 %v6205_v19, %v6201_v3 }
 0x34a   : > { %4405 = vrot.lane.b32.xlu2 %v4404_v51, %s8590_s12  ;;  %v2005_v51 = vld [vmem:[%s8223_s3 + $0x240] sm:$0xff] }
 0x35a   : > { %v6216_v35 = vpop.permute.xlu0 %4400 }
 0x35b   : > { %v4403_v44 = vunpack.i.h.bf16 %v6216_v35  ;;  %v4402_v14 = vunpack.i.l.bf16 %v6216_v35  ;;  %v1954_v35 = vld [vmem:[%s8223_s3 + $0xa8] sm:$0xff] }
 0x35d   : > { %v1872_v62 = vsel %vm471_vm0, %v4398_v5, %v4402_v14  ;;  %v1873_v55 = vsel %vm471_vm0, %v4402_v14, %v4392_v31  ;;  %v1876_v8 = vsel %vm471_vm0, %v4397_v24, %v4403_v44  ;;  %v1960_v31 = vld [vmem:[%s8223_s3 + $0xd8] sm:$0xff]  ;;  %v2239_v24 = vld [vmem:[%s8223_s3 + $0x990] sm:$0xff] }
 0x35e   : > { %v6242_v4 = vmax.f32 %v1830_v1, %v1872_v62  ;;  %v6246_v48 = vmax.f32 %v1831_v57, %v1873_v55  ;;  %v6250_v45 = vmax.f32 %v1834_v21, %v1876_v8  ;;  %v2059_v57 = vld [vmem:[%s8223_s3 + $0x3f0] sm:$0xff]  ;;  %v2113_v1 = vld [vmem:[%s8223_s3 + $0x5a0] sm:$0xff]  ;;  %v2092_v5 = vld [vmem:[%s8223_s3 + $0x4f8] sm:$0xff] }
 0x35f   : > { %v2023_v21 = vld [vmem:[%s8223_s3 + $0x2d0] sm:$0xff]  ;;  %2315 = vmatpush.msra.mxu2 %v2059_v57  ;;  %2333 = vmatpush.msra.mxu3 %v2113_v1  ;;  %v2230_v62 = vld [vmem:[%s8223_s3 + $0x948] sm:$0xff]  ;;  %v1948_v55 = vld [vmem:[%s8223_s3 + $0x78] sm:$0xff] }
 0x360   : > { %1907 = vrot.lane.b32.xlu1 %v6250_v45, %s8590_s12  ;;  %v4409_v11 = vpack.i.bf16 %v6246_v48, %v6242_v4  ;;  %2291 = vmatpush.msra.mxu1 %v2023_v21  ;;  %v1951_v14 = vld [vmem:[%s8223_s3 + $0x90] sm:$0xff]  ;;  %v1996_v8 = vld [vmem:[%s8223_s3 + $0x1f8] sm:$0xff]  ;;  %v1990_v57 = vld [vmem:[%s8223_s3 + $0x1c8] sm:$0xff] }
 0x361   : > { %2316 = vmatpush.msra.mxu2 %v2056_v54  ;;  %2334 = vmatpush.msra.mxu3 %v2110_v7  ;;  %v2080_v21 = vld [vmem:[%s8223_s3 + $0x498] sm:$0xff]  ;;  %v2221_v1 = vld [vmem:[%s8223_s3 + $0x900] sm:$0xff]  ;;  %v1987_v54 = vld [vmem:[%s8223_s3 + $0x1b0] sm:$0xff] }
 0x362   : > { %4410 = vrot.lane.b32.xlu0 %v4409_v11, %s8590_s12  ;;  %2292 = vmatpush.msra.mxu1 %v2020_v61  ;;  %v1942_v11 = vld [vmem:[%s8223_s3 + $0x48] sm:$0xff]  ;;  %v2077_v61 = vld [vmem:[%s8223_s3 + $0x480] sm:$0xff]  ;;  %v1979_v7 = vld [vmem:[%s8223_s3 + $0x170] sm:$0xff] }
 0x363   : > { %2317 = vmatpush.msra.mxu2 %v2053_v18  ;;  %2335 = vmatpush.msra.mxu3 %v2107_v28  ;;  %v1984_v18 = vld [vmem:[%s8223_s3 + $0x198] sm:$0xff]  ;;  %v1933_v28 = vld [vmem:[%s8223_s3] sm:$0xff] }
 0x364   : > { %2293 = vmatpush.msra.mxu1 %v2017_v22  ;;  %v1976_v22 = vld [vmem:[%s8223_s3 + $0x158] sm:$0xff] }
 0x365   : > { %2318 = vmatpush.msra.mxu2 %v2050_v39  ;;  %2336 = vmatpush.msra.mxu3 %v2104_v60  ;;  %v2170_v39 = vld [vmem:[%s8223_s3 + $0x768] sm:$0xff]  ;;  %v1973_v60 = vld [vmem:[%s8223_s3 + $0x140] sm:$0xff] }
 0x366   : > { %2294 = vmatpush.msra.mxu1 %v2014_v10  ;;  %v2218_v10 = vld [vmem:[%s8223_s3 + $0x8e8] sm:$0xff] }
 0x367   : > { %2319 = vmatpush.msra.mxu2 %v2047_v63  ;;  %2337 = vmatpush.msra.mxu3 %v2101_v32  ;;  %v2167_v63 = vld [vmem:[%s8223_s3 + $0x750] sm:$0xff] }
 0x369   : > { %2320 = vmatpush.msra.mxu2 %v2044_v59  ;;  %2338 = vmatpush.msra.mxu3 %v2098_v20  ;;  %v2215_v59 = vld [vmem:[%s8223_s3 + $0x8d0] sm:$0xff]  ;;  %v2200_v20 = vld [vmem:[%s8223_s3 + $0x858] sm:$0xff] }
 0x36b   : > { %2321 = vmatpush.msra.mxu2 %v2041_v13  ;;  %2339 = vmatpush.msra.mxu3 %v2095_v33  ;;  %v1970_v13 = vld [vmem:[%s8223_s3 + $0x128] sm:$0xff]  ;;  %v2197_v33 = vld [vmem:[%s8223_s3 + $0x840] sm:$0xff] }
 0x36d   : > { %2322 = vmatpush.msra.mxu2 %v2038_v47  ;;  %2340 = vmatpush.msra.mxu3 %v2092_v5  ;;  %v2164_v47 = vld [vmem:[%s8223_s3 + $0x738] sm:$0xff]  ;;  %v2146_v5 = vld [vmem:[%s8223_s3 + $0x6a8] sm:$0xff] }
 0x36f   : > { %2323 = vmatpush.msra.mxu2 %v2035_v15  ;;  %2341 = vmatpush.msra.mxu3 %v2089_v38  ;;  %v2212_v15 = vld [vmem:[%s8223_s3 + $0x8b8] sm:$0xff]  ;;  %v2191_v38 = vld [vmem:[%s8223_s3 + $0x810] sm:$0xff] }
 0x371   : > { %2324 = vmatpush.msra.mxu2 %v2032_v17  ;;  %2342 = vmatpush.msra.mxu3 %v2086_v23  ;;  %v1967_v17 = vld [vmem:[%s8223_s3 + $0x110] sm:$0xff]  ;;  %v2188_v23 = vld [vmem:[%s8223_s3 + $0x7f8] sm:$0xff] }
 0x373   : > { %2325 = vmatpush.msra.mxu2 %v2029_v41  ;;  %2343 = vmatpush.msra.mxu3 %v2083_v30  ;;  %v2209_v41 = vld [vmem:[%s8223_s3 + $0x8a0] sm:$0xff] }
 0x374   : > { %v1871_v40 = vpop.permute.xlu1 %1870  ;;  %v2185_v30 = vld [vmem:[%s8223_s3 + $0x7e0] sm:$0xff] }
 0x375   : > { %v1877_v58 = vsel %vm471_vm0, %v4403_v44, %v1871_v40  ;;  %v6340_v53 = vmax.f32 %v1836_v56, %v1871_v40  ;;  %4108 = vmatpush.msk.msrb.mxu2 %vm2260_vm1, %v2254_v37  ;;  %v2011_v56 = vld [vmem:[%s8223_s3 + $0x270] sm:$0xff]  ;;  %v2233_v44 = vld [vmem:[%s8223_s3 + $0x960] sm:$0xff]  ;;  %2344 = vmatpush.msra.mxu3 %v2080_v21  ;;  %v2158_v37 = vld [vmem:[%s8223_s3 + $0x708] sm:$0xff] }
 0x376   : > { %v6347_v43 = vmax.f32 %v1835_v29, %v1877_v58  ;;  %v1963_v29 = vld [vmem:[%s8223_s3 + $0xf0] sm:$0xff]  ;;  %2295 = vmatpush.msra.mxu1 %v2011_v56  ;;  %v2161_v40 = vld [vmem:[%s8223_s3 + $0x720] sm:$0xff]  ;;  %v1964_v58 = vld [vmem:[%s8223_s3 + $0xf8] sm:$0xff] }
 0x377   : > { %1911 = vrot.lane.b32.xlu2 %v6340_v53, %s8590_s12  ;;  %2395 = vmatpush.msrb.mxu2 %v2251_v6  ;;  %v2206_v6 = vld [vmem:[%s8223_s3 + $0x888] sm:$0xff]  ;;  %v2009_v21 = vld [vmem:[%s8223_s3 + $0x260] sm:$0xff] }
 0x378   : > { %1909 = vrot.lane.b32.xlu0 %v6347_v43, %s8590_s12  ;;  %2275 = vmatpush.msra.mxu0 %v1963_v29  ;;  %v2203_v29 = vld [vmem:[%s8223_s3 + $0x870] sm:$0xff]  ;;  %v1958_v56 = vld [vmem:[%s8223_s3 + $0xc8] sm:$0xff]  ;;  %s8341_s12 = smov 89  }
 0x379   : > { %2396 = vmatpush.msrb.mxu2 %v2248_v42  ;;  %2296 = vmatpush.msra.mxu1 %v2008_v36  ;;  %v1961_v42 = vld [vmem:[%s8223_s3 + $0xe0] sm:$0xff] }
 0x37a   : > { %2276 = vmatpush.msra.mxu0 %v1960_v31  ;;  %2345 = vmatpush.msra.mxu3 %v2077_v61  ;;  %v2131_v61 = vld [vmem:[%s8223_s3 + $0x630] sm:$0xff] }
 0x37b   : > { %2397 = vmatpush.msrb.mxu2 %v2245_v27  ;;  %2297 = vmatpush.msra.mxu1 %v2005_v51  ;;  %v2155_v27 = vld [vmem:[%s8223_s3 + $0x6f0] sm:$0xff] }
 0x37c   : > { %2277 = vmatpush.msra.mxu0 %v1957_v9  ;;  %2410 = vmatpush.msrb.mxu3 %v1979_v7  ;;  %v2149_v9 = vld [vmem:[%s8223_s3 + $0x6c0] sm:$0xff]  ;;  %v2006_v7 = vld [vmem:[%s8223_s3 + $0x248] sm:$0xff] }
 0x37d   : > { %2398 = vmatpush.msrb.mxu2 %v2242_v50  ;;  %2298 = vmatpush.msra.mxu1 %v2002_v49  ;;  %v2152_v50 = vld [vmem:[%s8223_s3 + $0x6d8] sm:$0xff] }
 0x37e   : > { %2278 = vmatpush.msra.mxu0 %v1954_v35  ;;  %2411 = vmatpush.msrb.mxu3 %v1976_v22  ;;  %v2027_v35 = vld [vmem:[%s8223_s3 + $0x2f0] sm:$0xff]  ;;  %v1952_v49 = vld [vmem:[%s8223_s3 + $0x98] sm:$0xff] }
 0x37f   : > { %2399 = vmatpush.msrb.mxu2 %v2239_v24  ;;  %2299 = vmatpush.msra.mxu1 %v1999_v0  ;;  %v1955_v24 = vld [vmem:[%s8223_s3 + $0xb0] sm:$0xff]  ;;  %v2128_v22 = vld [vmem:[%s8223_s3 + $0x618] sm:$0xff] }
 0x380   : > { %2279 = vmatpush.msra.mxu0 %v1951_v14  ;;  %2412 = vmatpush.msrb.mxu3 %v1973_v60  ;;  %v1949_v14 = vld [vmem:[%s8223_s3 + $0x80] sm:$0xff]  ;;  %v2143_v0 = vld [vmem:[%s8223_s3 + $0x690] sm:$0xff]  ;;  %v2000_v60 = vld [vmem:[%s8223_s3 + $0x218] sm:$0xff] }
 0x381   : > { %2400 = vmatpush.msrb.mxu2 %v2236_v25  ;;  %2300 = vmatpush.msra.mxu1 %v1996_v8  ;;  %v2140_v8 = vld [vmem:[%s8223_s3 + $0x678] sm:$0xff] }
 0x382   : > { %2280 = vmatpush.msra.mxu0 %v1948_v55  ;;  %2413 = vmatpush.msrb.mxu3 %v1970_v13  ;;  %v1946_v55 = vld [vmem:[%s8223_s3 + $0x68] sm:$0xff]  ;;  %v1991_v13 = vld [vmem:[%s8223_s3 + $0x1d0] sm:$0xff] }
 0x383   : > { %2401 = vmatpush.msrb.mxu2 %v2233_v44  ;;  %2301 = vmatpush.msra.mxu1 %v1993_v52  ;;  %v2024_v44 = vld [vmem:[%s8223_s3 + $0x2d8] sm:$0xff]  ;;  %v2137_v52 = vld [vmem:[%s8223_s3 + $0x660] sm:$0xff] }
 0x384   : > { %2281 = vmatpush.msra.mxu0 %v1945_v46  ;;  %2414 = vmatpush.msrb.mxu3 %v1967_v17  ;;  %v1943_v46 = vld [vmem:[%s8223_s3 + $0x50] sm:$0xff]  ;;  %v1982_v17 = vld [vmem:[%s8223_s3 + $0x188] sm:$0xff] }
 0x385   : > { %2402 = vmatpush.msrb.mxu2 %v2230_v62  ;;  %2302 = vmatpush.msra.mxu1 %v1990_v57  ;;  %v2021_v62 = vld [vmem:[%s8223_s3 + $0x2c0] sm:$0xff]  ;;  %v2012_v57 = vld [vmem:[%s8223_s3 + $0x278] sm:$0xff] }
 0x386   : > { %2282 = vmatpush.msra.mxu0 %v1942_v11  ;;  %2415 = vmatpush.msrb.mxu3 %v1964_v58  ;;  %v1940_v11 = vld [vmem:[%s8223_s3 + $0x38] sm:$0xff] }
 0x387   : > { %2403 = vmatpush.msrb.mxu2 %v2227_v16  ;;  %2303 = vmatpush.msra.mxu1 %v1987_v54  ;;  %v2018_v16 = vld [vmem:[%s8223_s3 + $0x2a8] sm:$0xff]  ;;  %v1937_v54 = vld [vmem:[%s8223_s3 + $0x20] sm:$0xff] }
 0x388   : > { %2283 = vmatpush.msra.mxu0 %v1939_v26  ;;  %2416 = vmatpush.msrb.mxu3 %v1961_v42  ;;  %v2182_v26 = vld [vmem:[%s8223_s3 + $0x7c8] sm:$0xff] }
 0x389   : > { %2404 = vmatpush.msrb.mxu2 %v2224_v34  ;;  %2304 = vmatpush.msra.mxu1 %v1984_v18  ;;  %v2015_v34 = vld [vmem:[%s8223_s3 + $0x290] sm:$0xff]  ;;  %v1934_v18 = vld [vmem:[%s8223_s3 + $0x8] sm:$0xff] }
 0x38a   : > { %2284 = vmatpush.msra.mxu0 %v1936_v2  ;;  %2417 = vmatpush.msrb.mxu3 %v1958_v56  ;;  %v2179_v2 = vld [vmem:[%s8223_s3 + $0x7b0] sm:$0xff] }
 0x38b   : > { %2405 = vmatpush.msrb.mxu2 %v2221_v1  ;;  %2305 = vmatpush.msra.mxu1 %v1981_v12  ;;  %v2134_v1 = vld [vmem:[%s8223_s3 + $0x648] sm:$0xff]  ;;  %v2003_v12 = vld [vmem:[%s8223_s3 + $0x230] sm:$0xff] }
 0x38c   : > { %2285 = vmatpush.msra.mxu0 %v1933_v28  ;;  %2418 = vmatpush.msrb.mxu3 %v1955_v24  ;;  %v2176_v28 = vld [vmem:[%s8223_s3 + $0x798] sm:$0xff] }
 0x38d   : > { %2370 = vmatpush.msrb.mxu1 %v2218_v10  ;;  %v2173_v10 = vld [vmem:[%s8223_s3 + $0x780] sm:$0xff] }
 0x38e   : > { %2350 = vmatpush.msrb.mxu0 %v2170_v39  ;;  %2419 = vmatpush.msrb.mxu3 %v1952_v49  ;;  %v2125_v39 = vld [vmem:[%s8223_s3 + $0x600] sm:$0xff]  ;;  %v2162_v49 = vld [vmem:[%s8223_s3 + $0x728] sm:$0xff] }
 0x38f   : > { %2371 = vmatpush.msrb.mxu1 %v2215_v59  ;;  %v1994_v59 = vld [vmem:[%s8223_s3 + $0x1e8] sm:$0xff] }
 0x390   : > { %2351 = vmatpush.msrb.mxu0 %v2167_v63  ;;  %2420 = vmatpush.msrb.mxu3 %v1949_v14  ;;  %v1997_v63 = vld [vmem:[%s8223_s3 + $0x200] sm:$0xff]  ;;  %v2159_v14 = vld [vmem:[%s8223_s3 + $0x710] sm:$0xff] }
 0x391   : > { %2372 = vmatpush.msrb.mxu1 %v2212_v15  ;;  %v1985_v15 = vld [vmem:[%s8223_s3 + $0x1a0] sm:$0xff] }
 0x392   : > { %2352 = vmatpush.msrb.mxu0 %v2164_v47  ;;  %2421 = vmatpush.msrb.mxu3 %v1946_v55  ;;  %v1988_v47 = vld [vmem:[%s8223_s3 + $0x1b8] sm:$0xff] }
 0x393   : > { %2373 = vmatpush.msrb.mxu1 %v2209_v41  ;;  %v2156_v55 = vld [vmem:[%s8223_s3 + $0x6f8] sm:$0xff] }
 0x394   : > { %2353 = vmatpush.msrb.mxu0 %v2161_v40  ;;  %2422 = vmatpush.msrb.mxu3 %v1943_v46  ;;  %v2153_v46 = vld [vmem:[%s8223_s3 + $0x6e0] sm:$0xff] }
 0x395   : > { %2374 = vmatpush.msrb.mxu1 %v2206_v6 }
 0x396   : > { %2354 = vmatpush.msrb.mxu0 %v2158_v37  ;;  %2423 = vmatpush.msrb.mxu3 %v1940_v11  ;;  %v2219_v37 = vld [vmem:[%s8223_s3 + $0x8f0] sm:$0xff]  ;;  %v2150_v11 = vld [vmem:[%s8223_s3 + $0x6c8] sm:$0xff] }
 0x397   : > { %2375 = vmatpush.msrb.mxu1 %v2203_v29  ;;  %v2216_v29 = vld [vmem:[%s8223_s3 + $0x8d8] sm:$0xff] }
 0x398   : > { %2355 = vmatpush.msrb.mxu0 %v2155_v27  ;;  %2424 = vmatpush.msrb.mxu3 %v1937_v54  ;;  %v2192_v54 = vld [vmem:[%s8223_s3 + $0x818] sm:$0xff] }
 0x399   : > { %2376 = vmatpush.msrb.mxu1 %v2200_v20 }
 0x39a   : > { %2356 = vmatpush.msrb.mxu0 %v2152_v50  ;;  %2425 = vmatpush.msrb.mxu3 %v1934_v18  ;;  %v2189_v18 = vld [vmem:[%s8223_s3 + $0x800] sm:$0xff] }
 0x39b   : > { %2377 = vmatpush.msrb.mxu1 %v2197_v33  ;;  %v2075_v33 = vld [vmem:[%s8223_s3 + $0x470] sm:$0xff] }
 0x39c   : > { %2357 = vmatpush.msrb.mxu0 %v2149_v9 }
 0x39e   : > { %2358 = vmatpush.msrb.mxu0 %v2146_v5  ;;  %v2207_v5 = vld [vmem:[%s8223_s3 + $0x890] sm:$0xff] }
 0x3a0   : > { %2359 = vmatpush.msrb.mxu0 %v2143_v0  ;;  %v2204_v0 = vld [vmem:[%s8223_s3 + $0x878] sm:$0xff] }
 0x3a2   : > { %2360 = vmatpush.msrb.mxu0 %v2140_v8  ;;  %v2201_v8 = vld [vmem:[%s8223_s3 + $0x860] sm:$0xff] }
 0x3a4   : > { %v6540_v32 = vpop.permute.xlu2 %4405  ;;  %2361 = vmatpush.msrb.mxu0 %v2137_v52  ;;  %v2198_v52 = vld [vmem:[%s8223_s3 + $0x848] sm:$0xff] }
 0x3a5   : > { %v4408_v31 = vunpack.i.h.bf16 %v6540_v32  ;;  %v4407_v36 = vunpack.i.l.bf16 %v6540_v32  ;;  %v2165_v32 = vld [vmem:[%s8223_s3 + $0x740] sm:$0xff] }
 0x3a6   : > { %2362 = vmatpush.msrb.mxu0 %v2134_v1  ;;  %v2105_v1 = vld [vmem:[%s8223_s3 + $0x560] sm:$0xff] }
 0x3a7   : > { %v1915_v51 = vsel %vm703_vm4, %v4407_v36, %v4408_v31 }
 0x3a8   : > { %v6565_v25 = vmax.f32 %v6201_v3, %v1915_v51  ;;  %v2194_v3 = vld [vmem:[%s8223_s3 + $0x828] sm:$0xff]  ;;  %2363 = vmatpush.msrb.mxu0 %v2131_v61 }
 0x3a9   : > { %2378 = vmatpush.msrb.mxu1 %v2194_v3  ;;  %v2069_v3 = vld [vmem:[%s8223_s3 + $0x440] sm:$0xff]  ;;  %v2054_v61 = vld [vmem:[%s8223_s3 + $0x3c8] sm:$0xff] }
 0x3aa   : > { %2326 = vmatmul.f32.vlgmr.msra.gmra.mxu2 %v6565_v25  ;;  %2364 = vmatpush.msrb.mxu0 %v2128_v22  ;;  %v2051_v22 = vld [vmem:[%s8223_s3 + $0x3b0] sm:$0xff] }
 0x3ab   : > { %2430 = vmatpush.msra.mxu2 %v2027_v35  ;;  %2379 = vmatpush.msrb.mxu1 %v2191_v38  ;;  %v2123_v35 = vld [vmem:[%s8223_s3 + $0x5f0] sm:$0xff]  ;;  %v2066_v38 = vld [vmem:[%s8223_s3 + $0x428] sm:$0xff] }
 0x3ac   : > { %2365 = vmatpush.msrb.mxu0 %v2125_v39  ;;  %v2141_v39 = vld [vmem:[%s8223_s3 + $0x680] sm:$0xff] }
 0x3ad   : > { %2431 = vmatpush.msra.mxu2 %v2024_v44  ;;  %2380 = vmatpush.msrb.mxu1 %v2188_v23  ;;  %v2117_v44 = vld [vmem:[%s8223_s3 + $0x5c0] sm:$0xff]  ;;  %v2063_v23 = vld [vmem:[%s8223_s3 + $0x410] sm:$0xff] }
 0x3af   : > { %2432 = vmatpush.msra.mxu2 %v2021_v62  ;;  %2381 = vmatpush.msrb.mxu1 %v2185_v30  ;;  %v2114_v62 = vld [vmem:[%s8223_s3 + $0x5a8] sm:$0xff]  ;;  %v2060_v30 = vld [vmem:[%s8223_s3 + $0x3f8] sm:$0xff] }
 0x3b1   : > { %2433 = vmatpush.msra.mxu2 %v2018_v16  ;;  %2382 = vmatpush.msrb.mxu1 %v2182_v26  ;;  %v2111_v16 = vld [vmem:[%s8223_s3 + $0x590] sm:$0xff] }
 0x3b2   : > { %v2147_v26 = vld [vmem:[%s8223_s3 + $0x6b0] sm:$0xff] }
 0x3b3   : > { %2434 = vmatpush.msra.mxu2 %v2015_v34  ;;  %2383 = vmatpush.msrb.mxu1 %v2179_v2  ;;  %v2108_v34 = vld [vmem:[%s8223_s3 + $0x578] sm:$0xff] }
 0x3b4   : > { %v2144_v2 = vld [vmem:[%s8223_s3 + $0x698] sm:$0xff] }
 0x3b5   : > { %2435 = vmatpush.msra.mxu2 %v2012_v57  ;;  %2384 = vmatpush.msrb.mxu1 %v2176_v28  ;;  %v2195_v57 = vld [vmem:[%s8223_s3 + $0x830] sm:$0xff] }
 0x3b6   : > { %v2099_v28 = vld [vmem:[%s8223_s3 + $0x530] sm:$0xff] }
 0x3b7   : > { %2436 = vmatpush.msra.mxu2 %v2009_v21  ;;  %2385 = vmatpush.msrb.mxu1 %v2173_v10  ;;  %v2057_v21 = vld [vmem:[%s8223_s3 + $0x3e0] sm:$0xff]  ;;  %v2186_v10 = vld [vmem:[%s8223_s3 + $0x7e8] sm:$0xff] }
 0x3b9   : > { %2437 = vmatpush.msra.mxu2 %v2006_v7  ;;  %v2102_v7 = vld [vmem:[%s8223_s3 + $0x548] sm:$0xff] }
 0x3bb   : > { %2438 = vmatpush.msra.mxu2 %v2003_v12 }
 0x3bd   : > { %2439 = vmatpush.msra.mxu2 %v2000_v60 }
 0x3bf   : > { %2440 = vmatpush.msra.mxu2 %v1997_v63 }
 0x3c1   : > { %2441 = vmatpush.msra.mxu2 %v1994_v59  ;;  %v2048_v59 = vld [vmem:[%s8223_s3 + $0x398] sm:$0xff] }
 0x3c3   : > { %2442 = vmatpush.msra.mxu2 %v1991_v13  ;;  %v2096_v13 = vld [vmem:[%s8223_s3 + $0x518] sm:$0xff] }
 0x3c5   : > { %2443 = vmatpush.msra.mxu2 %v1988_v47 }
 0x3c7   : > { %2444 = vmatpush.msra.mxu2 %v1985_v15 }
 0x3c9   : > { %2445 = vmatpush.msra.mxu2 %v1982_v17  ;;  %v2138_v17 = vld [vmem:[%s8223_s3 + $0x668] sm:$0xff] }
 0x3d1   : > { %v6685_v40 = vpop.permute.xlu2 %1911 }
 0x3d2   : > { %v6689_v41 = vmax.f32 %v6340_v53, %v6685_v40  ;;  %v6691_v58 = vpop.permute.xlu1 %1907  ;;  %v2171_v53 = vld [vmem:[%s8223_s3 + $0x770] sm:$0xff] }
 0x3d3   : > { %v1916_v6 = vsel %vm703_vm4, %v4408_v31, %v6691_v58  ;;  %v2213_v31 = vld [vmem:[%s8223_s3 + $0x8c0] sm:$0xff] }
 0x3d4   : > { %v6701_v42 = vmax.f32 %v6205_v19, %v1916_v6  ;;  %v4411_v27 = vpop.permute.xlu0 %4410  ;;  %4109 = vmatmul.msk.f32.vlgmr.msrb.gmra.mxu2 %vm761_vm5, %v6689_v41  ;;  %v2168_v19 = vld [vmem:[%s8223_s3 + $0x758] sm:$0xff]  ;;  %v2042_v6 = vld [vmem:[%s8223_s3 + $0x368] sm:$0xff] }
 0x3d5   : > { %v4413_v56 = vunpack.i.h.bf16 %v4411_v27  ;;  %v4412_v50 = vunpack.i.l.bf16 %v4411_v27  ;;  %2510 = vmatpush.msrb.mxu2 %v2219_v37  ;;  %v2180_v37 = vld [vmem:[%s8223_s3 + $0x7b8] sm:$0xff]  ;;  %v2090_v27 = vld [vmem:[%s8223_s3 + $0x4e8] sm:$0xff] }
 0x3d6   : > { %2346 = vmatmul.f32.vlgmr.msra.gmra.mxu3 %v6701_v42 }
 0x3d7   : > { %2490 = vmatpush.msra.mxu3 %v2171_v53  ;;  %2511 = vmatpush.msrb.mxu2 %v2216_v29  ;;  %v1913_v20 = vsel %vm703_vm4, %v4412_v50, %v4413_v56  ;;  %v1914_v24 = vsel %vm703_vm4, %v4413_v56, %v4407_v36  ;;  %v2120_v36 = vld [vmem:[%s8223_s3 + $0x5d8] sm:$0xff]  ;;  %v2177_v29 = vld [vmem:[%s8223_s3 + $0x7a0] sm:$0xff]  ;;  %v2039_v56 = vld [vmem:[%s8223_s3 + $0x350] sm:$0xff] }
 0x3d8   : > { %v6723_v9 = vmax.f32 %v6242_v4, %v1913_v20  ;;  %v6726_v51 = vmax.f32 %v6246_v48, %v1914_v24  ;;  %v2210_v4 = vld [vmem:[%s8223_s3 + $0x8a8] sm:$0xff]  ;;  %v2072_v48 = vld [vmem:[%s8223_s3 + $0x458] sm:$0xff]  ;;  %v2087_v50 = vld [vmem:[%s8223_s3 + $0x4d0] sm:$0xff] }
 0x3d9   : > { %2491 = vmatpush.msra.mxu3 %v2168_v19  ;;  %2512 = vmatpush.msrb.mxu2 %v2213_v31  ;;  %v2132_v53 = vld [vmem:[%s8223_s3 + $0x638] sm:$0xff]  ;;  %v2129_v19 = vld [vmem:[%s8223_s3 + $0x620] sm:$0xff]  ;;  %v2174_v31 = vld [vmem:[%s8223_s3 + $0x788] sm:$0xff] }
 0x3da   : > { %2286 = vmatmul.f32.vlgmr.msra.gmra.mxu0 %v6723_v9  ;;  %2306 = vmatmul.f32.vlgmr.msra.gmra.mxu1 %v6726_v51  ;;  %v2036_v20 = vld [vmem:[%s8223_s3 + $0x338] sm:$0xff] }
 0x3db   : > { %2450 = vmatpush.msra.mxu0 %v2075_v33  ;;  %2470 = vmatpush.msra.mxu1 %v2123_v35  ;;  %v2124_v24 = vld [vmem:[%s8223_s3 + $0x5f8] sm:$0xff]  ;;  %v2126_v35 = vld [vmem:[%s8223_s3 + $0x608] sm:$0xff] }
 0x3dc   : > { %2492 = vmatpush.msra.mxu3 %v2165_v32  ;;  %2513 = vmatpush.msrb.mxu2 %v2210_v4  ;;  %v2084_v33 = vld [vmem:[%s8223_s3 + $0x4b8] sm:$0xff]  ;;  %v2033_v32 = vld [vmem:[%s8223_s3 + $0x320] sm:$0xff] }
 0x3dd   : > { %2446 = vmatmul.f32.vlgmr.msra.gmra.mxu2 %v6726_v51  ;;  %2451 = vmatpush.msra.mxu0 %v2072_v48  ;;  %v2121_v4 = vld [vmem:[%s8223_s3 + $0x5e0] sm:$0xff]  ;;  %v2028_v48 = vld [vmem:[%s8223_s3 + $0x2f8] sm:$0xff] }
 0x3de   : > { %2471 = vmatpush.msra.mxu1 %v2120_v36  ;;  %2493 = vmatpush.msra.mxu3 %v2162_v49  ;;  %v2081_v36 = vld [vmem:[%s8223_s3 + $0x4a0] sm:$0xff]  ;;  %v2118_v49 = vld [vmem:[%s8223_s3 + $0x5c8] sm:$0xff] }
 0x3df   : > { %2514 = vmatpush.msrb.mxu2 %v2207_v5  ;;  %2426 = vmatmul.f32.vlgmr.msrb.gmra.mxu3 %v6723_v9  ;;  %v2030_v5 = vld [vmem:[%s8223_s3 + $0x308] sm:$0xff] }
 0x3e0   : > { %2452 = vmatpush.msra.mxu0 %v2069_v3  ;;  %2472 = vmatpush.msra.mxu1 %v2117_v44  ;;  %v2025_v3 = vld [vmem:[%s8223_s3 + $0x2e0] sm:$0xff]  ;;  %v2078_v44 = vld [vmem:[%s8223_s3 + $0x488] sm:$0xff] }
 0x3e1   : > { %2494 = vmatpush.msra.mxu3 %v2159_v14  ;;  %2515 = vmatpush.msrb.mxu2 %v2204_v0  ;;  %v2255_v14 = vld [vmem:[%s8223_s3 + $0xa10] sm:$0x7f]  ;;  %v1980_v0 = vld [vmem:[%s8223_s3 + $0x178] sm:$0xff] }
 0x3e2   : > { %2453 = vmatpush.msra.mxu0 %v2066_v38  ;;  %2473 = vmatpush.msra.mxu1 %v2114_v62  ;;  %v2022_v38 = vld [vmem:[%s8223_s3 + $0x2c8] sm:$0xff]  ;;  %v2115_v62 = vld [vmem:[%s8223_s3 + $0x5b0] sm:$0xff] }
 0x3e3   : > { %2495 = vmatpush.msra.mxu3 %v2156_v55  ;;  %2516 = vmatpush.msrb.mxu2 %v2201_v8  ;;  %v2252_v55 = vld [vmem:[%s8223_s3 + $0x9f8] sm:$0xff]  ;;  %v1977_v8 = vld [vmem:[%s8223_s3 + $0x160] sm:$0xff] }
 0x3e4   : > { %2454 = vmatpush.msra.mxu0 %v2063_v23  ;;  %2474 = vmatpush.msra.mxu1 %v2111_v16  ;;  %v2019_v23 = vld [vmem:[%s8223_s3 + $0x2b0] sm:$0xff]  ;;  %v2112_v16 = vld [vmem:[%s8223_s3 + $0x598] sm:$0xff] }
 0x3e5   : > { %2496 = vmatpush.msra.mxu3 %v2153_v46  ;;  %2517 = vmatpush.msrb.mxu2 %v2198_v52  ;;  %v2249_v46 = vld [vmem:[%s8223_s3 + $0x9e0] sm:$0xff]  ;;  %v1974_v52 = vld [vmem:[%s8223_s3 + $0x148] sm:$0xff] }
 0x3e6   : > { %2455 = vmatpush.msra.mxu0 %v2060_v30  ;;  %2475 = vmatpush.msra.mxu1 %v2108_v34  ;;  %v2016_v30 = vld [vmem:[%s8223_s3 + $0x298] sm:$0xff]  ;;  %v2109_v34 = vld [vmem:[%s8223_s3 + $0x580] sm:$0xff] }
 0x3e7   : > { %2497 = vmatpush.msra.mxu3 %v2150_v11  ;;  %2518 = vmatpush.msrb.mxu2 %v2195_v57  ;;  %v2246_v11 = vld [vmem:[%s8223_s3 + $0x9c8] sm:$0xff]  ;;  %v1971_v57 = vld [vmem:[%s8223_s3 + $0x130] sm:$0xff] }
 0x3e8   : > { %2456 = vmatpush.msra.mxu0 %v2057_v21  ;;  %2476 = vmatpush.msra.mxu1 %v2105_v1  ;;  %v2013_v21 = vld [vmem:[%s8223_s3 + $0x280] sm:$0xff]  ;;  %v2106_v1 = vld [vmem:[%s8223_s3 + $0x568] sm:$0xff] }
 0x3e9   : > { %2498 = vmatpush.msra.mxu3 %v2147_v26  ;;  %2519 = vmatpush.msrb.mxu2 %v2192_v54  ;;  %v2243_v26 = vld [vmem:[%s8223_s3 + $0x9b0] sm:$0xff]  ;;  %v1968_v54 = vld [vmem:[%s8223_s3 + $0x118] sm:$0xff] }
 0x3ea   : > { %2457 = vmatpush.msra.mxu0 %v2054_v61  ;;  %2477 = vmatpush.msra.mxu1 %v2102_v7  ;;  %v1910_v12 = vpop.permute.xlu0 %1909  ;;  %v2010_v61 = vld [vmem:[%s8223_s3 + $0x268] sm:$0xff]  ;;  %v2103_v7 = vld [vmem:[%s8223_s3 + $0x550] sm:$0xff] }
 0x3eb   : > { %2499 = vmatpush.msra.mxu3 %v2144_v2  ;;  %2520 = vmatpush.msrb.mxu2 %v2189_v18  ;;  %v1917_v60 = vsel %vm703_vm4, %v6691_v58, %v1910_v12  ;;  %v1918_v63 = vsel %vm703_vm4, %v1910_v12, %v6685_v40  ;;  %v2183_v40 = vld [vmem:[%s8223_s3 + $0x7d0] sm:$0xff]  ;;  %v2240_v2 = vld [vmem:[%s8223_s3 + $0x998] sm:$0xff]  ;;  %v1965_v18 = vld [vmem:[%s8223_s3 + $0x100] sm:$0xff]  ;;  %vm2692_vm4 = vcmask 703488  }
 0x3ec   : > { %v6851_v47 = vmax.f32 %v6250_v45, %v1917_v60  ;;  %v6854_v15 = vmax.f32 %v6347_v43, %v1918_v63  ;;  %2458 = vmatpush.msra.mxu0 %v2051_v22  ;;  %2478 = vmatpush.msra.mxu1 %v2099_v28  ;;  %v2045_v45 = vld [vmem:[%s8223_s3 + $0x380] sm:$0xff]  ;;  %v2135_v58 = vld [vmem:[%s8223_s3 + $0x650] sm:$0xff]  ;;  %v2100_v28 = vld [vmem:[%s8223_s3 + $0x538] sm:$0xff] }
 0x3ed   : > { %2500 = vmatpush.msra.mxu3 %v2141_v39  ;;  %2521 = vmatpush.msrb.mxu2 %v2186_v10  ;;  %v2093_v43 = vld [vmem:[%s8223_s3 + $0x500] sm:$0xff]  ;;  %v2007_v22 = vld [vmem:[%s8223_s3 + $0x250] sm:$0xff]  ;;  %v1962_v39 = vld [vmem:[%s8223_s3 + $0xe8] sm:$0xff] }
 0x3ee   : > { %2459 = vmatpush.msra.mxu0 %v2048_v59  ;;  %2479 = vmatpush.msra.mxu1 %v2096_v13  ;;  %v2237_v12 = vld [vmem:[%s8223_s3 + $0x980] sm:$0xff]  ;;  %v2004_v10 = vld [vmem:[%s8223_s3 + $0x238] sm:$0xff]  ;;  %v2234_v63 = vld [vmem:[%s8223_s3 + $0x968] sm:$0xff] }
 0x3ef   : > { %2501 = vmatpush.msra.mxu3 %v2138_v17  ;;  %2522 = vmatpush.msrb.mxu2 %v2183_v40  ;;  %v2097_v60 = vld [vmem:[%s8223_s3 + $0x520] sm:$0xff]  ;;  %v1959_v59 = vld [vmem:[%s8223_s3 + $0xd0] sm:$0xff]  ;;  %v2094_v17 = vld [vmem:[%s8223_s3 + $0x508] sm:$0xff] }
 0x3f0   : > { %2366 = vmatmul.f32.vlgmr.msrb.gmra.mxu0 %v6851_v47  ;;  %2386 = vmatmul.f32.vlgmr.msrb.gmra.mxu1 %v6854_v15  ;;  %v2001_v13 = vld [vmem:[%s8223_s3 + $0x220] sm:$0xff]  ;;  %v2231_v40 = vld [vmem:[%s8223_s3 + $0x950] sm:$0xff] }
 0x3f1   : > { %2460 = vmatpush.msra.mxu0 %v2045_v45  ;;  %2480 = vmatpush.msra.mxu1 %v2093_v43  ;;  %v1956_v45 = vld [vmem:[%s8223_s3 + $0xb8] sm:$0xff]  ;;  %v1998_v43 = vld [vmem:[%s8223_s3 + $0x208] sm:$0xff] }
 0x3f2   : > { %2502 = vmatpush.msra.mxu3 %v2135_v58  ;;  %2523 = vmatpush.msrb.mxu2 %v2180_v37  ;;  %v2091_v58 = vld [vmem:[%s8223_s3 + $0x4f0] sm:$0xff]  ;;  %v2228_v37 = vld [vmem:[%s8223_s3 + $0x938] sm:$0xff] }
 0x3f3   : > { %2461 = vmatpush.msra.mxu0 %v2042_v6  ;;  %2481 = vmatpush.msra.mxu1 %v2090_v27  ;;  %v1953_v6 = vld [vmem:[%s8223_s3 + $0xa0] sm:$0xff]  ;;  %v1995_v27 = vld [vmem:[%s8223_s3 + $0x1f0] sm:$0xff] }
 0x3f4   : > { %2503 = vmatpush.msra.mxu3 %v2132_v53  ;;  %2524 = vmatpush.msrb.mxu2 %v2177_v29  ;;  %v2088_v53 = vld [vmem:[%s8223_s3 + $0x4d8] sm:$0xff]  ;;  %v2225_v29 = vld [vmem:[%s8223_s3 + $0x920] sm:$0xff] }
 0x3f5   : > { %2462 = vmatpush.msra.mxu0 %v2039_v56  ;;  %2482 = vmatpush.msra.mxu1 %v2087_v50  ;;  %v1950_v56 = vld [vmem:[%s8223_s3 + $0x88] sm:$0xff]  ;;  %v1992_v50 = vld [vmem:[%s8223_s3 + $0x1d8] sm:$0xff] }
 0x3f6   : > { %2504 = vmatpush.msra.mxu3 %v2129_v19  ;;  %2525 = vmatpush.msrb.mxu2 %v2174_v31  ;;  %v2085_v19 = vld [vmem:[%s8223_s3 + $0x4c0] sm:$0xff]  ;;  %v2222_v31 = vld [vmem:[%s8223_s3 + $0x908] sm:$0xff] }
 0x3f7   : > { %2526 = vmatmul.f32.vlgmr.msrb.gmra.mxu2 %v6854_v15  ;;  %2463 = vmatpush.msra.mxu0 %v2036_v20  ;;  %v1947_v20 = vld [vmem:[%s8223_s3 + $0x70] sm:$0xff] }
 0x3f8   : > { %2610 = vmatpush.msra.mxu2 %v2124_v24  ;;  %2483 = vmatpush.msra.mxu1 %v2084_v33  ;;  %v1989_v24 = vld [vmem:[%s8223_s3 + $0x1c0] sm:$0xff]  ;;  %v2082_v33 = vld [vmem:[%s8223_s3 + $0x4a8] sm:$0xff] }
 0x3f9   : > { %2505 = vmatpush.msra.mxu3 %v2126_v35  ;;  %2464 = vmatpush.msra.mxu0 %v2033_v32  ;;  %v1944_v35 = vld [vmem:[%s8223_s3 + $0x58] sm:$0xff] }
 0x3fa   : > { %2506 = vmatmul.f32.vlgmr.msra.gmra.mxu3 %v6851_v47  ;;  %2611 = vmatpush.msra.mxu2 %v2121_v4  ;;  %v2076_v32 = vld [vmem:[%s8223_s3 + $0x478] sm:$0xff]  ;;  %v1986_v4 = vld [vmem:[%s8223_s3 + $0x1a8] sm:$0xff] }
 0x3fb   : > { %2570 = vmatpush.msrb.mxu3 %v2028_v48  ;;  %2484 = vmatpush.msra.mxu1 %v2081_v36  ;;  %v2079_v48 = vld [vmem:[%s8223_s3 + $0x490] sm:$0xff]  ;;  %v1941_v36 = vld [vmem:[%s8223_s3 + $0x40] sm:$0xff] }
 0x3fc   : > { %2612 = vmatpush.msra.mxu2 %v2118_v49  ;;  %2465 = vmatpush.msra.mxu0 %v2030_v5  ;;  %v2073_v49 = vld [vmem:[%s8223_s3 + $0x460] sm:$0xff]  ;;  %v1983_v5 = vld [vmem:[%s8223_s3 + $0x190] sm:$0xff] }
 0x3fd   : > { %2571 = vmatpush.msrb.mxu3 %v2025_v3  ;;  %2485 = vmatpush.msra.mxu1 %v2078_v44  ;;  %v1938_v3 = vld [vmem:[%s8223_s3 + $0x28] sm:$0xff] }
 0x3fe   : > { %2466 = vmatmul.f32.vlgmr.msra.gmra.mxu0 %v6565_v25  ;;  %2486 = vmatmul.f32.vlgmr.msra.gmra.mxu1 %v6701_v42  ;;  %v2070_v44 = vld [vmem:[%s8223_s3 + $0x448] sm:$0xff] }
 0x3ff   : > { %4110 = vmatpush.msk.msrb.mxu0 %vm2260_vm1, %v2255_v14  ;;  %2550 = vmatpush.msrb.mxu1 %v1980_v0  ;;  %v2220_v14 = vld [vmem:[%s8223_s3 + $0x8f8] sm:$0xff]  ;;  %v1935_v0 = vld [vmem:[%s8223_s3 + $0x10] sm:$0xff] }
 0x400   : > { %2572 = vmatpush.msrb.mxu3 %v2022_v38  ;;  %2613 = vmatpush.msra.mxu2 %v2115_v62  ;;  %v2067_v38 = vld [vmem:[%s8223_s3 + $0x430] sm:$0xff]  ;;  %v2172_v62 = vld [vmem:[%s8223_s3 + $0x778] sm:$0xff] }
 0x401   : > { %2535 = vmatpush.msrb.mxu0 %v2252_v55  ;;  %2551 = vmatpush.msrb.mxu1 %v1977_v8  ;;  %v2064_v55 = vld [vmem:[%s8223_s3 + $0x418] sm:$0xff]  ;;  %v2169_v8 = vld [vmem:[%s8223_s3 + $0x760] sm:$0xff] }
 0x402   : > { %2573 = vmatpush.msrb.mxu3 %v2019_v23  ;;  %2614 = vmatpush.msra.mxu2 %v2112_v16  ;;  %v2061_v23 = vld [vmem:[%s8223_s3 + $0x400] sm:$0xff]  ;;  %v2211_v16 = vld [vmem:[%s8223_s3 + $0x8b0] sm:$0xff] }
 0x403   : > { %2536 = vmatpush.msrb.mxu0 %v2249_v46  ;;  %2552 = vmatpush.msrb.mxu1 %v1974_v52  ;;  %v2058_v46 = vld [vmem:[%s8223_s3 + $0x3e8] sm:$0xff]  ;;  %v2208_v52 = vld [vmem:[%s8223_s3 + $0x898] sm:$0xff] }
 0x404   : > { %2574 = vmatpush.msrb.mxu3 %v2016_v30  ;;  %2615 = vmatpush.msra.mxu2 %v2109_v34  ;;  %v2163_v30 = vld [vmem:[%s8223_s3 + $0x730] sm:$0xff] }
 0x405   : > { %2537 = vmatpush.msrb.mxu0 %v2246_v11  ;;  %2553 = vmatpush.msrb.mxu1 %v1971_v57  ;;  %v2055_v34 = vld [vmem:[%s8223_s3 + $0x3d0] sm:$0xff]  ;;  %v2205_v11 = vld [vmem:[%s8223_s3 + $0x880] sm:$0xff]  ;;  %v2160_v57 = vld [vmem:[%s8223_s3 + $0x718] sm:$0xff] }
 0x406   : > { %2575 = vmatpush.msrb.mxu3 %v2013_v21  ;;  %2616 = vmatpush.msra.mxu2 %v2106_v1  ;;  %v2052_v21 = vld [vmem:[%s8223_s3 + $0x3b8] sm:$0xff]  ;;  %v2202_v1 = vld [vmem:[%s8223_s3 + $0x868] sm:$0xff] }
 0x407   : > { %2538 = vmatpush.msrb.mxu0 %v2243_v26  ;;  %2554 = vmatpush.msrb.mxu1 %v1968_v54  ;;  %v2157_v26 = vld [vmem:[%s8223_s3 + $0x700] sm:$0xff] }
 0x408   : > { %2576 = vmatpush.msrb.mxu3 %v2010_v61  ;;  %2617 = vmatpush.msra.mxu2 %v2103_v7  ;;  %v2049_v54 = vld [vmem:[%s8223_s3 + $0x3a0] sm:$0xff]  ;;  %v2199_v61 = vld [vmem:[%s8223_s3 + $0x850] sm:$0xff]  ;;  %v2154_v7 = vld [vmem:[%s8223_s3 + $0x6e8] sm:$0xff] }
 0x409   : > { %2539 = vmatpush.msrb.mxu0 %v2240_v2  ;;  %2555 = vmatpush.msrb.mxu1 %v1965_v18  ;;  %v2046_v2 = vld [vmem:[%s8223_s3 + $0x388] sm:$0xff]  ;;  %v2196_v18 = vld [vmem:[%s8223_s3 + $0x838] sm:$0xff] }
 0x40a   : > { %2577 = vmatpush.msrb.mxu3 %v2007_v22  ;;  %2618 = vmatpush.msra.mxu2 %v2100_v28  ;;  %v2151_v22 = vld [vmem:[%s8223_s3 + $0x6d0] sm:$0xff] }
 0x40b   : > { %2540 = vmatpush.msrb.mxu0 %v2237_v12  ;;  %2556 = vmatpush.msrb.mxu1 %v1962_v39  ;;  %v2043_v28 = vld [vmem:[%s8223_s3 + $0x370] sm:$0xff]  ;;  %v2193_v12 = vld [vmem:[%s8223_s3 + $0x820] sm:$0xff]  ;;  %v2148_v39 = vld [vmem:[%s8223_s3 + $0x6b8] sm:$0xff] }
 0x40c   : > { %2578 = vmatpush.msrb.mxu3 %v2004_v10  ;;  %2619 = vmatpush.msra.mxu2 %v2097_v60  ;;  %v2040_v10 = vld [vmem:[%s8223_s3 + $0x358] sm:$0xff]  ;;  %v2190_v60 = vld [vmem:[%s8223_s3 + $0x808] sm:$0xff] }
 0x40d   : > { %2541 = vmatpush.msrb.mxu0 %v2234_v63  ;;  %2557 = vmatpush.msrb.mxu1 %v1959_v59  ;;  %v2145_v63 = vld [vmem:[%s8223_s3 + $0x6a0] sm:$0xff] }
 0x40e   : > { %2579 = vmatpush.msrb.mxu3 %v2001_v13  ;;  %2620 = vmatpush.msra.mxu2 %v2094_v17  ;;  %v2037_v59 = vld [vmem:[%s8223_s3 + $0x340] sm:$0xff]  ;;  %v2187_v13 = vld [vmem:[%s8223_s3 + $0x7f0] sm:$0xff]  ;;  %v2142_v17 = vld [vmem:[%s8223_s3 + $0x688] sm:$0xff] }
 0x40f   : > { %2542 = vmatpush.msrb.mxu0 %v2231_v40  ;;  %2558 = vmatpush.msrb.mxu1 %v1956_v45  ;;  %v2034_v40 = vld [vmem:[%s8223_s3 + $0x328] sm:$0xff]  ;;  %v2184_v45 = vld [vmem:[%s8223_s3 + $0x7d8] sm:$0xff] }
 0x410   : > { %2580 = vmatpush.msrb.mxu3 %v1998_v43  ;;  %2621 = vmatpush.msra.mxu2 %v2091_v58  ;;  %v2139_v43 = vld [vmem:[%s8223_s3 + $0x670] sm:$0xff] }
 0x411   : > { %2543 = vmatpush.msrb.mxu0 %v2228_v37  ;;  %2559 = vmatpush.msrb.mxu1 %v1953_v6  ;;  %v2031_v58 = vld [vmem:[%s8223_s3 + $0x310] sm:$0xff]  ;;  %v2181_v37 = vld [vmem:[%s8223_s3 + $0x7c0] sm:$0xff]  ;;  %v2256_v6 = vld [vmem:[%s8223_s3 + $0xa18] sm:$0x7f] }
 0x412   : > { %2581 = vmatpush.msrb.mxu3 %v1995_v27  ;;  %2622 = vmatpush.msra.mxu2 %v2088_v53  ;;  %v2136_v27 = vld [vmem:[%s8223_s3 + $0x658] sm:$0xff]  ;;  %v2178_v53 = vld [vmem:[%s8223_s3 + $0x7a8] sm:$0xff] }
 0x413   : > { %2544 = vmatpush.msrb.mxu0 %v2225_v29  ;;  %2560 = vmatpush.msrb.mxu1 %v1950_v56  ;;  %v2253_v29 = vld [vmem:[%s8223_s3 + $0xa00] sm:$0xff] }
 0x414   : > { %2582 = vmatpush.msrb.mxu3 %v1992_v50  ;;  %2623 = vmatpush.msra.mxu2 %v2085_v19  ;;  %v2133_v56 = vld [vmem:[%s8223_s3 + $0x640] sm:$0xff]  ;;  %v2175_v50 = vld [vmem:[%s8223_s3 + $0x790] sm:$0xff]  ;;  %v2130_v19 = vld [vmem:[%s8223_s3 + $0x628] sm:$0xff] }
 0x415   : > { %2545 = vmatpush.msrb.mxu0 %v2222_v31  ;;  %2561 = vmatpush.msrb.mxu1 %v1947_v20  ;;  %v2247_v31 = vld [vmem:[%s8223_s3 + $0x9d0] sm:$0xff] }
 0x416   : > { %2583 = vmatpush.msrb.mxu3 %v1989_v24  ;;  %2624 = vmatpush.msra.mxu2 %v2082_v33  ;;  %v2127_v20 = vld [vmem:[%s8223_s3 + $0x610] sm:$0xff]  ;;  %v2244_v24 = vld [vmem:[%s8223_s3 + $0x9b8] sm:$0xff]  ;;  %v2241_v33 = vld [vmem:[%s8223_s3 + $0x9a0] sm:$0xff] }
 0x417   : > { %4111 = vmatmul.msk.f32.vlgmr.msrb.gmra.mxu0 %vm761_vm5, %v6689_v41  ;;  %2562 = vmatpush.msrb.mxu1 %v1944_v35  ;;  %v2235_v35 = vld [vmem:[%s8223_s3 + $0x970] sm:$0xff] }
 0x418   : > { %2590 = vmatpush.msra.mxu0 %v2076_v32  ;;  %2584 = vmatpush.msrb.mxu3 %v1986_v4  ;;  %v2232_v32 = vld [vmem:[%s8223_s3 + $0x958] sm:$0xff]  ;;  %v2226_v4 = vld [vmem:[%s8223_s3 + $0x928] sm:$0xff] }
 0x419   : > { %2625 = vmatpush.msra.mxu2 %v2079_v48  ;;  %2563 = vmatpush.msrb.mxu1 %v1941_v36  ;;  %v2223_v48 = vld [vmem:[%s8223_s3 + $0x910] sm:$0xff] }
 0x41a   : > { %2591 = vmatpush.msra.mxu0 %v2073_v49  ;;  %2626 = vmatmul.f32.vlgmr.msra.gmra.mxu2 %v6701_v42  ;;  %v2217_v42 = vld [vmem:[%s8223_s3 + $0x8e0] sm:$0xff] }
 0x41b   : > { %2585 = vmatpush.msrb.mxu3 %v1983_v5  ;;  %2564 = vmatpush.msrb.mxu1 %v1938_v3 }
 0x41c   : > { %2586 = vmatmul.f32.vlgmr.msrb.gmra.mxu3 %v6726_v51  ;;  %2592 = vmatpush.msra.mxu0 %v2070_v44  ;;  %v2214_v51 = vld [vmem:[%s8223_s3 + $0x8c8] sm:$0xff] }
 0x41d   : > { %2650 = vmatpush.msra.mxu3 %v2220_v14  ;;  %2565 = vmatpush.msrb.mxu1 %v1935_v0 }
 0x41e   : > { %2593 = vmatpush.msra.mxu0 %v2067_v38  ;;  %2566 = vmatmul.f32.vlgmr.msrb.gmra.mxu1 %v6723_v9  ;;  %v2166_v9 = vld [vmem:[%s8223_s3 + $0x748] sm:$0xff] }
 0x41f   : > { %2651 = vmatpush.msra.mxu3 %v2217_v42  ;;  %2630 = vmatpush.msra.mxu1 %v2172_v62 }
 0x420   : > { %2594 = vmatpush.msra.mxu0 %v2064_v55 }
 0x421   : > { %2652 = vmatpush.msra.mxu3 %v2214_v51  ;;  %2631 = vmatpush.msra.mxu1 %v2169_v8 }
 0x422   : > { %2595 = vmatpush.msra.mxu0 %v2061_v23 }
 0x423   : > { %2653 = vmatpush.msra.mxu3 %v2211_v16  ;;  %2632 = vmatpush.msra.mxu1 %v2166_v9 }
 0x424   : > { %2596 = vmatpush.msra.mxu0 %v2058_v46 }
 0x425   : > { %2654 = vmatpush.msra.mxu3 %v2208_v52  ;;  %2633 = vmatpush.msra.mxu1 %v2163_v30 }
 0x426   : > { %2597 = vmatpush.msra.mxu0 %v2055_v34 }
 0x427   : > { %2655 = vmatpush.msra.mxu3 %v2205_v11  ;;  %2634 = vmatpush.msra.mxu1 %v2160_v57 }
 0x428   : > { %2598 = vmatpush.msra.mxu0 %v2052_v21 }
 0x429   : > { %2656 = vmatpush.msra.mxu3 %v2202_v1  ;;  %2635 = vmatpush.msra.mxu1 %v2157_v26 }
 0x42a   : > { %2599 = vmatpush.msra.mxu0 %v2049_v54 }
 0x42b   : > { %2657 = vmatpush.msra.mxu3 %v2199_v61  ;;  %2636 = vmatpush.msra.mxu1 %v2154_v7 }
 0x42c   : > { %2600 = vmatpush.msra.mxu0 %v2046_v2 }
 0x42d   : > { %2658 = vmatpush.msra.mxu3 %v2196_v18  ;;  %2637 = vmatpush.msra.mxu1 %v2151_v22  ;;  %v2327_v3 = vpop.f32.mrf.mxu2 }
 0x42e   : > { %2601 = vmatpush.msra.mxu0 %v2043_v28 }
 0x42f   : > { %2659 = vmatpush.msra.mxu3 %v2193_v12  ;;  %2638 = vmatpush.msra.mxu1 %v2148_v39 }
 0x430   : > { %2602 = vmatpush.msra.mxu0 %v2040_v10 }
 0x431   : > { %2660 = vmatpush.msra.mxu3 %v2190_v60  ;;  %2639 = vmatpush.msra.mxu1 %v2145_v63 }
 0x432   : > { %2603 = vmatpush.msra.mxu0 %v2037_v59 }
 0x433   : > { %2661 = vmatpush.msra.mxu3 %v2187_v13  ;;  %2640 = vmatpush.msra.mxu1 %v2142_v17 }
 0x434   : > { %2604 = vmatpush.msra.mxu0 %v2034_v40 }
 0x435   : > { %2662 = vmatpush.msra.mxu3 %v2184_v45  ;;  %2641 = vmatpush.msra.mxu1 %v2139_v43 }
 0x436   : > { %2605 = vmatpush.msra.mxu0 %v2031_v58 }
 0x437   : > { %2663 = vmatpush.msra.mxu3 %v2181_v37  ;;  %2606 = vmatmul.f32.vlgmr.msra.gmra.mxu0 %v6565_v25  ;;  %v2250_v25 = vld [vmem:[%s8223_s3 + $0x9e8] sm:$0xff] }
 0x438   : > { %4112 = vmatpush.msk.msrb.mxu0 %vm2260_vm1, %v2256_v6  ;;  %2642 = vmatpush.msra.mxu1 %v2136_v27  ;;  %vm3122_vm1 = vcmask 424960  }
 0x439   : > { %2664 = vmatpush.msra.mxu3 %v2178_v53 }
 0x43a   : > { %2675 = vmatpush.msrb.mxu0 %v2253_v29  ;;  %2643 = vmatpush.msra.mxu1 %v2133_v56 }
 0x43b   : > { %2665 = vmatpush.msra.mxu3 %v2175_v50 }
 0x43c   : > { %2666 = vmatmul.f32.vlgmr.msra.gmra.mxu3 %v6854_v15  ;;  %2676 = vmatpush.msrb.mxu0 %v2250_v25  ;;  %v2238_v15 = vld [vmem:[%s8223_s3 + $0x988] sm:$0xff] }
 0x43d   : > { %2644 = vmatpush.msra.mxu1 %v2130_v19 }
 0x43e   : > { %2677 = vmatpush.msrb.mxu0 %v2247_v31 }
 0x43f   : > { %2645 = vmatpush.msra.mxu1 %v2127_v20 }
 0x440   : > { %2646 = vmatmul.f32.vlgmr.msra.gmra.mxu1 %v6851_v47  ;;  %2678 = vmatpush.msrb.mxu0 %v2244_v24  ;;  %v2229_v47 = vld [vmem:[%s8223_s3 + $0x940] sm:$0xff] }
 0x442   : > { %2679 = vmatpush.msrb.mxu0 %v2241_v33 }
 0x444   : > { %2680 = vmatpush.msrb.mxu0 %v2238_v15 }
 0x446   : > { %2681 = vmatpush.msrb.mxu0 %v2235_v35 }
 0x448   : > { %2682 = vmatpush.msrb.mxu0 %v2232_v32 }
 0x44a   : > { %2683 = vmatpush.msrb.mxu0 %v2229_v47 }
 0x44c   : > { %2684 = vmatpush.msrb.mxu0 %v2226_v4 }
 0x44e   : > { %2685 = vmatpush.msrb.mxu0 %v2223_v48 }
 0x44f   : > { %4113 = vmatmul.msk.f32.vlgmr.msrb.gmra.mxu0 %vm761_vm5, %v6689_v41  ;;  %vm2932_vm5 = vcmask 719872  }
 0x457   : > { %v2287_v36 = vpop.f32.mrf.mxu0  ;;  %v2307_v49 = vpop.f32.mrf.mxu1 }
 0x458   : > { %v2308_v5 = vadd.f32 %v2307_v49, %v2287_v36  ;;  %v2407_v51 = vpop.f32.mrf.mxu2 }
 0x459   : > { %v2347_v14 = vpop.f32.mrf.mxu3 }
 0x45a   : > { %v2328_v44 = vadd.f32 %v2327_v3, %v2308_v5 }
 0x45c   : > { %v2348_v0 = vadd.f32 %v2347_v14, %v2328_v44 }
 0x460   : > { %v2447_v23 = vpop.f32.mrf.mxu2 }
 0x462   : > { %v2427_v41 = vpop.f32.mrf.mxu3 }
 0x463   : > { %v2448_v9 = vadd.f32 %v2447_v23, %v2427_v41 }
 0x46d   : > { %v2367_v38 = vpop.f32.mrf.mxu0  ;;  %v2387_v62 = vpop.f32.mrf.mxu1 }
 0x46e   : > { %v2368_v42 = vadd.f32 %v2367_v38, %v2348_v0 }
 0x470   : > { %v2388_v55 = vadd.f32 %v2387_v62, %v2368_v42 }
 0x472   : > { %v7297_v8 = vadd.f32 %v2407_v51, %v2388_v55  ;;  %v3183_v51 = vld [vmem:[%s8225_s5] sm:$0xff] }
 0x474   : > { %2945 = vrot.lane.b32.xlu1 %v7297_v8, %s4523_s0  ;;  %2926 = vrot.lane.b32.xlu0 %v7297_v8, %s4524_s29 }
 0x475   : > { %2907 = vrot.lane.b32.xlu2 %v7297_v8, %s8341_s12 }
 0x47a   : > { %v2527_v57 = vpop.f32.mrf.mxu2 }
 0x47b   : > { %v2467_v16 = vpop.f32.mrf.mxu0  ;;  %v2487_v52 = vpop.f32.mrf.mxu1 }
 0x47c   : > { %2888 = vrot.lane.b32.xlu1 %v7297_v8, %s4526_s2  ;;  %2869 = vrot.lane.b32.xlu0 %v7297_v8, %s8342_s15  ;;  %v2468_v46 = vadd.f32 %v2467_v16, %v2448_v9 }
 0x47d   : > { %2851 = vrot.lane.b32.xlu2 %v7297_v8, %s8442_s16  ;;  %v2507_v34 = vpop.f32.mrf.mxu3 }
 0x47e   : > { %v2488_v30 = vadd.f32 %v2487_v52, %v2468_v46 }
 0x480   : > { %v2508_v11 = vadd.f32 %v2507_v34, %v2488_v30 }
 0x482   : > { %v2528_v21 = vadd.f32 %v2527_v57, %v2508_v11 }
 0x485   : > { %2832 = vrot.lane.b32.xlu2 %v7297_v8, %s4528_s1 }
 0x48d   : > { %2813 = vrot.lane.b32.xlu2 %v7297_v8, %s8343_s24 }
 0x494   : > { %v2547_v1 = vpop.f32.mrf.mxu0 }
 0x495   : > { %v7315_v26 = vadd.f32 %v2547_v1, %v2528_v21  ;;  %2794 = vrot.lane.b32.xlu2 %v7297_v8, %s4530_s13 }
 0x497   : > { %2928 = vrot.lane.b32.xlu1 %v7315_v26, %s4524_s29  ;;  %2909 = vrot.lane.b32.xlu0 %v7315_v26, %s8341_s12  ;;  %2697 = vst.msk [vmem:[#allocation4 + $0x8] sm:$0xff] %vm645_vm3, %v7315_v26  ;;  %s8591_s12 = smov 124  }
 0x49b   : > { %v2567_v54 = vpop.f32.mrf.mxu1 }
 0x49d   : > { %2775 = vrot.lane.b32.xlu2 %v7297_v8, %s8344_s14  ;;  %v2627_v22 = vpop.f32.mrf.mxu2 }
 0x49f   : > { %2871 = vrot.lane.b32.xlu1 %v7315_v26, %s8342_s15  ;;  %2853 = vrot.lane.b32.xlu0 %v7315_v26, %s8442_s16  ;;  %s8592_s15 = smov 125   ;;  %v2587_v61 = vpop.f32.mrf.mxu3 }
 0x4a0   : > { %v2588_v2 = vadd.f32 %v2587_v61, %v2567_v54 }
 0x4a5   : > { %2756 = vrot.lane.b32.xlu2 %v7297_v8, %s4532_s22 }
 0x4a7   : > { %3118 = vrot.lane.b32.xlu1 %v7315_v26, %s4533_s25  ;;  %2834 = vrot.lane.b32.xlu0 %v7315_v26, %s4528_s1 }
 0x4ad   : > { %2741 = vrot.lane.b32.xlu2 %v7297_v8, %s8591_s12 }
 0x4af   : > { %2815 = vrot.lane.b32.xlu0 %v7315_v26, %s8343_s24  ;;  %s8593_s24 = smov 127  }
 0x4b4   : > { %v2607_v7 = vpop.f32.mrf.mxu0 }
 0x4b5   : > { %2728 = vrot.lane.b32.xlu2 %v7297_v8, %s8592_s15  ;;  %v2608_v18 = vadd.f32 %v2607_v7, %v2588_v2 }
 0x4b7   : > { %2796 = vrot.lane.b32.xlu0 %v7315_v26, %s4530_s13  ;;  %v2628_v12 = vadd.f32 %v2627_v22, %v2608_v18 }
 0x4bd   : > { %2715 = vrot.lane.b32.xlu2 %v7297_v8, %s8578_s30  ;;  %v2647_v28 = vpop.f32.mrf.mxu1 }
 0x4be   : > { %v2648_v39 = vadd.f32 %v2647_v28, %v2628_v12 }
 0x4bf   : > { %2777 = vrot.lane.b32.xlu0 %v7315_v26, %s8344_s14  ;;  %v2667_v10 = vpop.f32.mrf.mxu3  ;;  %s4534_s14 = smov 53  }
 0x4c0   : > { %v2668_v60 = vadd.f32 %v2667_v10, %v2648_v39 }
 0x4c5   : > { %2702 = vrot.lane.b32.xlu2 %v7297_v8, %s8593_s24 }
 0x4c7   : > { %2758 = vrot.lane.b32.xlu0 %v7315_v26, %s4532_s22 }
 0x4cc   : > { %v2687_v63 = vpop.f32.mrf.mxu0 }
 0x4cd   : > { %v2688_v59 = vadd.f32 %v2687_v63, %v2668_v60  ;;  %2947 = vrot.lane.b32.xlu2 %v7315_v26, %s4523_s0  ;;  %v7524_v63 = vld [vmem:[%s8224_s4] sm:$0xff] }
 0x4cf   : > { %2693 = vst.msk [vmem:[#allocation3 + $0x10] sm:$0xff] %vm2692_vm4, %v2688_v59  ;;  %2743 = vrot.lane.b32.xlu0 %v7315_v26, %s8591_s12  ;;  %v2908_v13 = vpop.permute.xlu2 %2907  ;;  %s4535_s12 = smov 54   ;;  %vm3103_vm4 = vcmask 433152  }
 0x4d5   : > { %2890 = vrot.lane.b32.xlu2 %v7315_v26, %s4526_s2 }
 0x4d6   : > { %v7359_v17 = vld [vmem:[#allocation3 + $0x10] sm:$0xff] }
 0x4d7   : > { %2949 = vrot.lane.b32.xlu1 %v7359_v17, %s4523_s0  ;;  %2730 = vrot.lane.b32.xlu0 %v7315_v26, %s8592_s15  ;;  %v2852_v40 = vpop.permute.xlu2 %2851  ;;  %s8594_s0 = smov 89   ;;  %s4536_s15 = smov 55  }
 0x4dd   : > { %3097 = vrot.lane.b32.xlu2 %v7297_v8, %s4534_s14 }
 0x4df   : > { %2930 = vrot.lane.b32.xlu1 %v7359_v17, %s4524_s29  ;;  %2717 = vrot.lane.b32.xlu0 %v7315_v26, %s8578_s30  ;;  %v2833_v45 = vpop.permute.xlu2 %2832  ;;  %s8595_s30 = smov 91   ;;  %s4537_s29 = smov 56  }
 0x4e5   : > { %3078 = vrot.lane.b32.xlu2 %v7297_v8, %s4535_s12 }
 0x4e6   : > { %v2946_v37 = vpop.permute.xlu1 %2945  ;;  %v2927_v6 = vpop.permute.xlu0 %2926 }
 0x4e7   : > { %2911 = vrot.lane.b32.xlu1 %v7359_v17, %s8594_s0  ;;  %2704 = vrot.lane.b32.xlu0 %v7315_v26, %s8593_s24  ;;  %v2814_v43 = vpop.permute.xlu2 %2813  ;;  %s4540_s0 = smov 72  }
 0x4ed   : > { %3059 = vrot.lane.b32.xlu2 %v7297_v8, %s4536_s15 }
 0x4ee   : > { %v2889_v29 = vpop.permute.xlu1 %2888  ;;  %v2870_v56 = vpop.permute.xlu0 %2869 }
 0x4ef   : > { %2892 = vrot.lane.b32.xlu1 %v7359_v17, %s4526_s2  ;;  %3116 = vrot.lane.b32.xlu0 %v7297_v8, %s4533_s25  ;;  %v2795_v58 = vpop.permute.xlu2 %2794  ;;  %s4538_s2 = smov 70  }
 0x4f5   : > { %2760 = vrot.lane.b32.xlu2 %v7359_v17, %s4532_s22 }
 0x4f7   : > { %2873 = vrot.lane.b32.xlu1 %v7359_v17, %s8595_s30  ;;  %3099 = vrot.lane.b32.xlu0 %v7315_v26, %s4534_s14  ;;  %v7389_v27 = vpop.permute.xlu2 %2775  ;;  %s4541_s30 = smov 73  }
 0x4fd   : > { %3040 = vrot.lane.b32.xlu2 %v7297_v8, %s4537_s29 }
 0x4ff   : > { %2855 = vrot.lane.b32.xlu1 %v7359_v17, %s8442_s16  ;;  %3080 = vrot.lane.b32.xlu0 %v7315_v26, %s4535_s12  ;;  %v7397_v53 = vpop.permute.xlu2 %2756  ;;  %s4539_s16 = smov 71  }
 0x505   : > { %3021 = vrot.lane.b32.xlu2 %v7297_v8, %s4538_s2 }
 0x507   : > { %2836 = vrot.lane.b32.xlu1 %v7359_v17, %s4528_s1  ;;  %3061 = vrot.lane.b32.xlu0 %v7315_v26, %s4536_s15  ;;  %v7405_v50 = vpop.permute.xlu2 %2741  ;;  %s8596_s1 = smov 107  }
 0x509   : > { %v7407_v25 = vpop.permute.xlu1 %2928  ;;  %v7409_v19 = vpop.permute.xlu0 %2909 }
 0x50a   : > { %v2933_v31 = vsel %vm2932_vm5, %v2927_v6, %v7407_v25  ;;  %v2914_v20 = vsel %vm2913_vm9, %v2908_v13, %v7409_v19 }
 0x50d   : > { %3002 = vrot.lane.b32.xlu2 %v7297_v8, %s4539_s16 }
 0x50f   : > { %2817 = vrot.lane.b32.xlu1 %v7359_v17, %s8596_s1  ;;  %3042 = vrot.lane.b32.xlu0 %v7315_v26, %s4537_s29  ;;  %v7421_v24 = vpop.permute.xlu2 %2728  ;;  %s8598_s1 = smov 109  }
 0x511   : > { %v7423_v33 = vpop.permute.xlu1 %2871  ;;  %v7425_v15 = vpop.permute.xlu0 %2853 }
 0x512   : > { %v2876_v35 = vsel %vm2875_vm11, %v2870_v56, %v7423_v33  ;;  %v2857_v32 = vsel %vm8597_vm12, %v2852_v40, %v7425_v15 }
 0x515   : > { %2983 = vrot.lane.b32.xlu2 %v7297_v8, %s4540_s0 }
 0x517   : > { %2798 = vrot.lane.b32.xlu1 %v7359_v17, %s4530_s13  ;;  %3023 = vrot.lane.b32.xlu0 %v7315_v26, %s4538_s2  ;;  %v7437_v47 = vpop.permute.xlu2 %2715 }
 0x519   : > { %v7439_v4 = vpop.permute.xlu0 %2834  ;;  %v7489_v46 = vpop.permute.xlu1 %3118 }
 0x51a   : > { %v2839_v48 = vsel %vm2838_vm13, %v2833_v45, %v7439_v4 }
 0x51d   : > { %2964 = vrot.lane.b32.xlu2 %v7297_v8, %s4541_s30 }
 0x51f   : > { %2779 = vrot.lane.b32.xlu1 %v7359_v17, %s8598_s1  ;;  %3004 = vrot.lane.b32.xlu0 %v7315_v26, %s4539_s16  ;;  %v7448_v36 = vpop.permute.xlu2 %2702  ;;  %s4045_s1 = scalar_lea.hbm %s8231_s11, %s4623_s21 }
 0x521   : > { %v7450_v49 = vpop.permute.xlu0 %2815 }
 0x522   : > { %v2820_v5 = vsel %vm2819_vm14, %v2814_v43, %v7450_v49 }
 0x525   : > { %2968 = vrot.lane.b32.xlu2 %v7359_v17, %s4541_s30 }
 0x527   : > { %3120 = vrot.lane.b32.xlu1 %v7359_v17, %s4533_s25  ;;  %2985 = vrot.lane.b32.xlu0 %v7315_v26, %s4540_s0  ;;  %v2948_v3 = vpop.permute.xlu2 %2947 }
 0x528   : > { %v2952_v44 = vsel %vm2951_vm15, %v2946_v37, %v2948_v3 }
 0x529   : > { %v7460_v14 = vpop.permute.xlu0 %2796  ;;  %3201 = vmatpush.msrb.mxu2 %v2952_v44 }
 0x52a   : > { %v2801_v0 = vsel %vm2800_vm7, %v2795_v58, %v7460_v14 }
 0x52b   : > { %3202 = vmatpush.msrb.mxu2 %v2933_v31 }
 0x52d   : > { %3203 = vmatpush.msrb.mxu2 %v2914_v20 }
 0x52f   : > { %3101 = vrot.lane.b32.xlu1 %v7359_v17, %s4534_s14  ;;  %2966 = vrot.lane.b32.xlu0 %v7315_v26, %s4541_s30  ;;  %v7467_v38 = vpop.permute.xlu2 %2890  ;;  %s4435_s30 = scalar_lea.hbm %s8231_s11, 2 }
 0x530   : > { %v2895_v42 = vsel %vm2894_vm6, %v2889_v29, %v7467_v38 }
 0x531   : > { %v7471_v62 = vpop.permute.xlu0 %2777  ;;  %3204 = vmatpush.msrb.mxu2 %v2895_v42 }
 0x532   : > { %v2782_v55 = vsel %vm2781_vm8, %v7389_v27, %v7471_v62 }
 0x533   : > { %3205 = vmatpush.msrb.mxu2 %v2876_v35  ;;  %v7562_v35 = vld [vmem:[%s8224_s4 + $0x10] sm:$0xff] }
 0x535   : > { %3206 = vmatpush.msrb.mxu2 %v2857_v32 }
 0x537   : > { %3082 = vrot.lane.b32.xlu1 %v7359_v17, %s4535_s12  ;;  %3187 = vperm.xlu0 %4388, %v3183_v51   ;;  %v7481_v41 = vpop.permute.xlu2 %3097 }
 0x538   : > { %3207 = vmatpush.msrb.mxu2 %v2839_v48 }
 0x539   : > { %v2759_v23 = vpop.permute.xlu0 %2758 }
 0x53a   : > { %v2763_v16 = vsel %vm2762_vm10, %v7397_v53, %v2759_v23  ;;  %3208 = vmatpush.msrb.mxu2 %v2820_v5 }
 0x53c   : > { %3209 = vmatpush.msrb.mxu2 %v2801_v0 }
 0x53e   : > { %3210 = vmatpush.msrb.mxu2 %v2782_v55 }
 0x53f   : > { %3063 = vrot.lane.b32.xlu1 %v7359_v17, %s4536_s15  ;;  %v7487_v9 = vpop.permute.xlu2 %3078 }
 0x540   : > { %3211 = vmatpush.msrb.mxu2 %v2763_v16 }
 0x541   : > { %v2744_v52 = vpop.permute.xlu0 %2743 }
 0x542   : > { %v2745_v30 = vsel %vm645_vm3, %v7405_v50, %v2744_v52  ;;  %2749 = vst.msk [vmem:[#allocation4 + $0x48] sm:$0xff] %vm645_vm3, %v2744_v52 }
 0x543   : > { %3212 = vmatpush.msrb.mxu2 %v2745_v30 }
 0x547   : > { %3044 = vrot.lane.b32.xlu1 %v7359_v17, %s4537_s29  ;;  %v7496_v34 = vpop.permute.xlu2 %3059 }
 0x549   : > { %v2950_v11 = vpop.permute.xlu1 %2949  ;;  %v2731_v57 = vpop.permute.xlu0 %2730 }
 0x54a   : > { %v2953_v21 = vsel %vm2951_vm15, %v2948_v3, %v2950_v11  ;;  %v2732_v1 = vsel %vm587_vm2, %v7421_v24, %v2731_v57  ;;  %2736 = vst.msk [vmem:[#allocation4 + $0x38] sm:$0xff] %vm645_vm3, %v2731_v57  ;;  %vm8599_vm2 = vcmask 1031168   ;;  %vm2989_vm15 = vcmask 588800   ;;  %v3142_v57 = vld [vmem:[#allocation4 + $0x48] sm:$0xff] }
 0x54b   : > { %2957 = vst.msk [vmem:[#allocation4 + $0xf8] sm:$0xff] %vm645_vm3, %v2953_v21  ;;  %3213 = vmatpush.msrb.mxu2 %v2732_v1 }
 0x54f   : > { %3025 = vrot.lane.b32.xlu1 %v7359_v17, %s4538_s2  ;;  %v2761_v26 = vpop.permute.xlu2 %2760 }
 0x550   : > { %v2764_v54 = vsel %vm2762_vm10, %v2759_v23, %v2761_v26 }
 0x551   : > { %v2931_v61 = vpop.permute.xlu1 %2930  ;;  %v2718_v7 = vpop.permute.xlu0 %2717  ;;  %2768 = vst.msk [vmem:[#allocation4 + $0x58] sm:$0xff] %vm645_vm3, %v2764_v54  ;;  %v3140_v1 = vld [vmem:[#allocation4 + $0x38] sm:$0xff] }
 0x552   : > { %v2934_v2 = vsel %vm2932_vm5, %v7407_v25, %v2931_v61  ;;  %v3164_v18 = vld [vmem:[#allocation4 + $0xf8] sm:$0xff]  ;;  %v2719_v22 = vsel %vm8599_vm2, %v7437_v47, %v2718_v7  ;;  %2723 = vst.msk [vmem:[#allocation4 + $0x28] sm:$0xff] %vm645_vm3, %v2718_v7  ;;  %vm3084_vm5 = vcmask 441344  }
 0x553   : > { %2938 = vst.msk [vmem:[#allocation4 + $0xe8] sm:$0xff] %vm645_vm3, %v2934_v2  ;;  %3247 = vmatpush.msrb.mxu3 %v3164_v18  ;;  %3214 = vmatpush.msrb.mxu2 %v2719_v22  ;;  %v3130_v22 = vld [vmem:[%s8224_s4 + $0x8] sm:$0xff] }
 0x557   : > { %3006 = vrot.lane.b32.xlu1 %v7359_v17, %s4539_s16  ;;  %v3041_v27 = vpop.permute.xlu2 %3040 }
 0x558   : > { %v3144_v11 = vld [vmem:[#allocation4 + $0x58] sm:$0xff] }
 0x559   : > { %v2912_v28 = vpop.permute.xlu1 %2911  ;;  %v2705_v12 = vpop.permute.xlu0 %2704  ;;  %v3138_v7 = vld [vmem:[#allocation4 + $0x28] sm:$0xff] }
 0x55a   : > { %v2915_v39 = vsel %vm2913_vm9, %v7409_v19, %v2912_v28  ;;  %v3162_v10 = vld [vmem:[#allocation4 + $0xe8] sm:$0xff]  ;;  %v2706_v60 = vsel %vm471_vm0, %v7448_v36, %v2705_v12  ;;  %2710 = vst.msk [vmem:[#allocation4 + $0x18] sm:$0xff] %vm645_vm3, %v2705_v12  ;;  %vm8600_vm9 = vmmov %vm8597_vm12  ;;  %vm3046_vm12 = vcmask 457728  }
 0x55b   : > { %2919 = vst.msk [vmem:[#allocation4 + $0xd8] sm:$0xff] %vm645_vm3, %v2915_v39  ;;  %3248 = vmatpush.msrb.mxu3 %v3162_v10  ;;  %3215 = vmatpush.msrb.mxu2 %v2706_v60  ;;  %v3134_v12 = vld [vmem:[#allocation4 + $0x8] sm:$0xff] }
 0x55d   : > { %3216 = vmatpush.msrb.mxu2 %v7297_v8 }
 0x55e   : > { %3217 = vmatmul.f32.vlgmr.msrb.gmra.mxu2 %v7524_v63 }
 0x55f   : > { %2987 = vrot.lane.b32.xlu1 %v7359_v17, %s4540_s0  ;;  %v3022_v19 = vpop.permute.xlu2 %3021  ;;  %s375_s0 = sand.u32 1, %s4469_s18  }
 0x560   : > { %s376_s14 = scalar_lea.vmem [#allocation6], %s375_s0  ;;  %s4037_s15 = scalar_lea.sflag [#allocation7], %s375_s0 }
 0x561   : > { %v2893_v59 = vpop.permute.xlu1 %2892  ;;  %v3117_v13 = vpop.permute.xlu0 %3116  ;;  %v3136_v28 = vld [vmem:[#allocation4 + $0x18] sm:$0xff]  ;;  %s4047_s12 = sshll.u32 %s376_s14, 4  ;;  %s4048_s12 = int_to_ptr.vmem [resolvable:$true] %s4047_s12 }
 0x562   : > { %v2896_v40 = vsel %vm2894_vm6, %v7467_v38, %v2893_v59  ;;  %v3160_v45 = vld [vmem:[#allocation4 + $0xd8] sm:$0xff]  ;;  %v3123_v43 = vsel %vm3122_vm1, %v3117_v13, %v7489_v46  ;;  %v3132_v59 = vld [vmem:[%s8224_s4 + $0x18] sm:$0xff]  ;;  %v3184_v13 = vld [vmem:[%s8225_s5 + $0x8] sm:$0xff]  ;;  %vm3447_vm6 = vcmask 1040384  }
 0x563   : > { %2900 = vst.msk [vmem:[#allocation4 + $0xc8] sm:$0xff] %vm645_vm3, %v2896_v40  ;;  %3249 = vmatpush.msrb.mxu3 %v3160_v45  ;;  %3231 = vmatpush.msra.mxu2 %v3123_v43 }
 0x566   : > { %3220 = vmatmul.f32.gmra.mxu2 %v7562_v35 }
 0x567   : > { %3192 = vperm.xlu1 %4414, %v3184_v13   ;;  %v3369_v13 = vld [vmem:[%s8226_s6 + $0xa0] sm:$0xff] }
 0x569   : > { %v2874_v8 = vpop.permute.xlu1 %2873  ;;  %v7535_v58 = vpop.permute.xlu0 %3099 }
 0x56a   : > { %v2877_v17 = vsel %vm2875_vm11, %v7423_v33, %v2874_v8  ;;  %v3158_v37 = vld [vmem:[#allocation4 + $0xc8] sm:$0xff]  ;;  %v3104_v6 = vsel %vm3103_vm4, %v7481_v41, %v7535_v58  ;;  %vm3065_vm11 = vcmask 449536  }
 0x56b   : > { %2881 = vst.msk [vmem:[#allocation4 + $0xb8] sm:$0xff] %vm645_vm3, %v2877_v17  ;;  %3250 = vmatpush.msrb.mxu3 %v3158_v37  ;;  %3232 = vmatpush.msra.mxu2 %v3104_v6 }
 0x571   : > { %v2856_v53 = vpop.permute.xlu1 %2855  ;;  %v7543_v29 = vpop.permute.xlu0 %3080 }
 0x572   : > { %v2858_v56 = vsel %vm8600_vm9, %v7425_v15, %v2856_v53  ;;  %v3156_v50 = vld [vmem:[#allocation4 + $0xb8] sm:$0xff]  ;;  %v3085_v25 = vsel %vm3084_vm5, %v7487_v9, %v7543_v29 }
 0x573   : > { %2862 = vst.msk [vmem:[#allocation4 + $0xa8] sm:$0xff] %vm645_vm3, %v2858_v56  ;;  %3251 = vmatpush.msrb.mxu3 %v3156_v50  ;;  %3233 = vmatpush.msra.mxu2 %v3085_v25 }
 0x579   : > { %v2837_v31 = vpop.permute.xlu1 %2836  ;;  %v7551_v20 = vpop.permute.xlu0 %3061 }
 0x57a   : > { %v2840_v24 = vsel %vm2838_vm13, %v7439_v4, %v2837_v31  ;;  %v3154_v33 = vld [vmem:[#allocation4 + $0xa8] sm:$0xff]  ;;  %v3066_v15 = vsel %vm3065_vm11, %v7496_v34, %v7551_v20  ;;  %v3003_v4 = vpop.permute.xlu2 %3002  ;;  %vm3027_vm13 = vcmask 572416  }
 0x57b   : > { %2844 = vst.msk [vmem:[#allocation4 + $0x98] sm:$0xff] %vm645_vm3, %v2840_v24  ;;  %3252 = vmatpush.msrb.mxu3 %v3154_v33  ;;  %3234 = vmatpush.msra.mxu2 %v3066_v15 }
 0x581   : > { %v2818_v32 = vpop.permute.xlu1 %2817  ;;  %v7565_v47 = vpop.permute.xlu0 %3042 }
 0x582   : > { %v2821_v48 = vsel %vm2819_vm14, %v7450_v49, %v2818_v32  ;;  %v3152_v36 = vld [vmem:[#allocation4 + $0x98] sm:$0xff]  ;;  %v3047_v5 = vsel %vm3046_vm12, %v3041_v27, %v7565_v47  ;;  %v2984_v49 = vpop.permute.xlu2 %2983  ;;  %vm3008_vm14 = vcmask 580608  }
 0x583   : > { %2825 = vst.msk [vmem:[#allocation4 + $0x88] sm:$0xff] %vm645_vm3, %v2821_v48  ;;  %3253 = vmatpush.msrb.mxu3 %v3152_v36  ;;  %3235 = vmatpush.msra.mxu2 %v3047_v5 }
 0x589   : > { %v2799_v3 = vpop.permute.xlu1 %2798  ;;  %v7572_v44 = vpop.permute.xlu0 %3023 }
 0x58a   : > { %v2802_v0 = vsel %vm2800_vm7, %v7460_v14, %v2799_v3  ;;  %v3150_v38 = vld [vmem:[#allocation4 + $0x88] sm:$0xff]  ;;  %v3028_v42 = vsel %vm3027_vm13, %v3022_v19, %v7572_v44  ;;  %v2965_v16 = vpop.permute.xlu2 %2964  ;;  %vm2970_vm7 = vcmask 596992  }
 0x58b   : > { %2806 = vst.msk [vmem:[#allocation4 + $0x78] sm:$0xff] %vm645_vm3, %v2802_v0  ;;  %3254 = vmatpush.msrb.mxu3 %v3150_v38  ;;  %3236 = vmatpush.msra.mxu2 %v3028_v42 }
 0x591   : > { %v2780_v55 = vpop.permute.xlu1 %2779  ;;  %v7579_v51 = vpop.permute.xlu0 %3004 }
 0x592   : > { %v2783_v41 = vsel %vm2781_vm8, %v7471_v62, %v2780_v55  ;;  %v3148_v23 = vld [vmem:[#allocation4 + $0x78] sm:$0xff]  ;;  %v3009_v14 = vsel %vm3008_vm14, %v3003_v4, %v7579_v51  ;;  %v2969_v21 = vpop.permute.xlu2 %2968  ;;  %vm3443_vm8 = vcmask 400384  }
 0x593   : > { %2787 = vst.msk [vmem:[#allocation4 + $0x68] sm:$0xff] %vm645_vm3, %v2783_v41  ;;  %3255 = vmatpush.msrb.mxu3 %v3148_v23  ;;  %3237 = vmatpush.msra.mxu2 %v3009_v14 }
 0x599   : > { %v3121_v9 = vpop.permute.xlu1 %3120  ;;  %v7586_v52 = vpop.permute.xlu0 %2985 }
 0x59a   : > { %v3124_v30 = vsel %vm3122_vm1, %v7489_v46, %v3121_v9  ;;  %v3146_v34 = vld [vmem:[#allocation4 + $0x68] sm:$0xff]  ;;  %v2990_v62 = vsel %vm2989_vm15, %v2984_v49, %v7586_v52 }
 0x59b   : > { %3128 = vst.msk [vmem:[#allocation4 + $0x188] sm:$0xff] %vm645_vm3, %v3124_v30  ;;  %3256 = vmatpush.msrb.mxu3 %v3146_v34  ;;  %3238 = vmatpush.msra.mxu2 %v2990_v62 }
 0x59d   : > { %3257 = vmatpush.msrb.mxu3 %v3144_v11 }
 0x59f   : > { %3258 = vmatpush.msrb.mxu3 %v3142_v57  ;;  %v3364_v57 = vld [vmem:[%s8226_s6 + $0x78] sm:$0xff] }
 0x5a0   : > { %3389 = vmatpush.msrb.mxu1 %v3364_v57 }
 0x5a1   : > { %v3102_v26 = vpop.permute.xlu1 %3101  ;;  %3259 = vmatpush.msrb.mxu3 %v3140_v1  ;;  %v2967_v54 = vpop.permute.xlu0 %2966  ;;  %v3377_v1 = vld [vmem:[%s8226_s6 + $0xe0] sm:$0x1f] }
 0x5a2   : > { %v3105_v46 = vsel %vm3103_vm4, %v7535_v58, %v3102_v26  ;;  %v3182_v61 = vld [vmem:[#allocation4 + $0x188] sm:$0xff]  ;;  %v2971_v2 = vsel %vm2970_vm7, %v2965_v16, %v2967_v54  ;;  %v2972_v18 = vsel %vm2970_vm7, %v2967_v54, %v2969_v21  ;;  %v3363_v21 = vld [vmem:[%s8226_s6 + $0x70] sm:$0xff]  ;;  %v3376_v26 = vld [vmem:[%s8226_s6 + $0xd8] sm:$0xff] }
 0x5a3   : > { %3109 = vst.msk [vmem:[#allocation4 + $0x178] sm:$0xff] %vm645_vm3, %v3105_v46  ;;  %3277 = vmatpush.msra.mxu0 %v3182_v61  ;;  %3260 = vmatpush.msrb.mxu3 %v3138_v7  ;;  %v3362_v54 = vld [vmem:[%s8226_s6 + $0x68] sm:$0xff]  ;;  %v3375_v46 = vld [vmem:[%s8226_s6 + $0xd0] sm:$0xff]  ;;  %v3361_v61 = vld [vmem:[%s8226_s6 + $0x60] sm:$0xff] }
 0x5a4   : > { %3239 = vmatpush.msra.mxu2 %v2971_v2  ;;  %2976 = vst.msk [vmem:[#allocation4 + $0x108] sm:$0xff] %vm645_vm3, %v2972_v18  ;;  %3390 = vmatpush.msrb.mxu1 %v3363_v21  ;;  %v3374_v7 = vld [vmem:[%s8226_s6 + $0xc8] sm:$0xff]  ;;  %v3360_v2 = vld [vmem:[%s8226_s6 + $0x58] sm:$0xff]  ;;  %v3373_v18 = vld [vmem:[%s8226_s6 + $0xc0] sm:$0xff] }
 0x5a5   : > { %3261 = vmatpush.msrb.mxu3 %v3136_v28  ;;  %4114 = vmatmul.msk.f32.vlgmr.msra.gmra.mxu2 %vm2989_vm15, %v3130_v22  ;;  %v3372_v28 = vld [vmem:[%s8226_s6 + $0xb8] sm:$0xff] }
 0x5a6   : > { %3391 = vmatpush.msrb.mxu1 %v3362_v54  ;;  %v4145_v54 = vld [vmem:[%s8227_s7 + $0xc8] sm:$0xff] }
 0x5a7   : > { %3262 = vmatpush.msrb.mxu3 %v3134_v12  ;;  %v3358_v12 = vld [vmem:[%s8226_s6 + $0x48] sm:$0xff] }
 0x5a8   : > { %3263 = vmatmul.f32.vlgmr.msrb.gmra.mxu3 %v7524_v63  ;;  %3392 = vmatpush.msrb.mxu1 %v3361_v61  ;;  %v4163_v61 = vld [vmem:[%s8227_s7 + $0x138] sm:$0xff] }
 0x5a9   : > { %v3083_v39 = vpop.permute.xlu1 %3082  ;;  %v3188_v33 = vpop.permute.xlu0 %3187 }
 0x5aa   : > { %v3086_v10 = vsel %vm3084_vm5, %v7543_v29, %v3083_v39  ;;  %v3180_v60 = vld [vmem:[#allocation4 + $0x178] sm:$0xff]  ;;  %3393 = vmatpush.msrb.mxu1 %v3360_v2  ;;  %v4144_v2 = vld [vmem:[%s8227_s7 + $0xc0] sm:$0xff] }
 0x5ab   : > { %3090 = vst.msk [vmem:[#allocation4 + $0x168] sm:$0xff] %vm645_vm3, %v3086_v10  ;;  %3278 = vmatpush.msra.mxu0 %v3180_v60  ;;  %v3166_v31 = vld [vmem:[#allocation4 + $0x108] sm:$0xff]  ;;  %v3371_v39 = vld [vmem:[%s8226_s6 + $0xb0] sm:$0xff]  ;;  %v3370_v60 = vld [vmem:[%s8226_s6 + $0xa8] sm:$0xff] }
 0x5ac   : > { %v3357_v10 = vld [vmem:[%s8226_s6 + $0x40] sm:$0xff] }
 0x5ad   : > { %4115 = vmatmul.msk.f32.gmra.mxu2 %vm2989_vm15, %v3132_v59 }
 0x5b0   : > { %3266 = vmatmul.f32.gmra.mxu3 %v7562_v35 }
 0x5b1   : > { %v3064_v63 = vpop.permute.xlu1 %3063 }
 0x5b2   : > { %v3067_v40 = vsel %vm3065_vm11, %v7551_v20, %v3064_v63  ;;  %v3178_v45 = vld [vmem:[#allocation4 + $0x168] sm:$0xff]  ;;  %v3355_v63 = vld [vmem:[%s8226_s6 + $0x30] sm:$0xff] }
 0x5b3   : > { %3071 = vst.msk [vmem:[#allocation4 + $0x158] sm:$0xff] %vm645_vm3, %v3067_v40  ;;  %3279 = vmatpush.msra.mxu0 %v3178_v45  ;;  %v3368_v40 = vld [vmem:[%s8226_s6 + $0x98] sm:$0xff]  ;;  %v3354_v45 = vld [vmem:[%s8226_s6 + $0x28] sm:$0xff] }
 0x5b9   : > { %v3045_v43 = vpop.permute.xlu1 %3044 }
 0x5ba   : > { %v3048_v8 = vsel %vm3046_vm12, %v7565_v47, %v3045_v43  ;;  %v3176_v58 = vld [vmem:[#allocation4 + $0x158] sm:$0xff] }
 0x5bb   : > { %3052 = vst.msk [vmem:[#allocation4 + $0x148] sm:$0xff] %vm645_vm3, %v3048_v8  ;;  %3280 = vmatpush.msra.mxu0 %v3176_v58  ;;  %v3367_v43 = vld [vmem:[%s8226_s6 + $0x90] sm:$0xff]  ;;  %v3353_v8 = vld [vmem:[%s8226_s6 + $0x20] sm:$0xff]  ;;  %v3366_v58 = vld [vmem:[%s8226_s6 + $0x88] sm:$0xff] }
 0x5c1   : > { %v3026_v17 = vpop.permute.xlu1 %3025 }
 0x5c2   : > { %v3029_v37 = vsel %vm3027_vm13, %v7572_v44, %v3026_v17  ;;  %v3174_v6 = vld [vmem:[#allocation4 + $0x148] sm:$0xff]  ;;  %v3352_v17 = vld [vmem:[%s8226_s6 + $0x18] sm:$0xff] }
 0x5c3   : > { %3033 = vst.msk [vmem:[#allocation4 + $0x138] sm:$0xff] %vm645_vm3, %v3029_v37  ;;  %3281 = vmatpush.msra.mxu0 %v3174_v6  ;;  %v3351_v37 = vld [vmem:[%s8226_s6 + $0x10] sm:$0xff] }
 0x5c9   : > { %v3007_v27 = vpop.permute.xlu1 %3006 }
 0x5ca   : > { %v3010_v53 = vsel %vm3008_vm14, %v7579_v51, %v3007_v27  ;;  %v3172_v29 = vld [vmem:[#allocation4 + $0x138] sm:$0xff] }
 0x5cb   : > { %3014 = vst.msk [vmem:[#allocation4 + $0x128] sm:$0xff] %vm645_vm3, %v3010_v53  ;;  %3282 = vmatpush.msra.mxu0 %v3172_v29 }
 0x5d1   : > { %v2988_v56 = vpop.permute.xlu1 %2987 }
 0x5d2   : > { %v2991_v50 = vsel %vm2989_vm15, %v7586_v52, %v2988_v56  ;;  %v3170_v25 = vld [vmem:[#allocation4 + $0x128] sm:$0xff] }
 0x5d3   : > { %2995 = vst.msk [vmem:[#allocation4 + $0x118] sm:$0xff] %vm645_vm3, %v2991_v50  ;;  %3283 = vmatpush.msra.mxu0 %v3170_v25  ;;  %v3350_v50 = vld [vmem:[%s8226_s6 + $0x8] sm:$0xff]  ;;  %v3365_v25 = vld [vmem:[%s8226_s6 + $0x80] sm:$0xff] }
 0x5d9   : > { %v3193_v47 = vpop.permute.xlu1 %3192 }
 0x5da   : > { %v3168_v19 = vld [vmem:[#allocation4 + $0x118] sm:$0xff] }
 0x5db   : > { %3284 = vmatpush.msra.mxu0 %v3168_v19  ;;  %v3349_v19 = vld [vmem:[%s8226_s6] sm:$0xff] }
 0x5dd   : > { %3285 = vmatpush.msra.mxu0 %v3166_v31 }
 0x5de   : > { %4116 = vmatmul.msk.f32.vlgmr.msra.gmra.mxu0 %vm2989_vm15, %v3130_v22  ;;  %v3359_v22 = vld [vmem:[%s8226_s6 + $0x50] sm:$0xff] }
 0x5df   : > { %3394 = vmatpush.msrb.mxu1 %v3359_v22  ;;  %v4162_v22 = vld [vmem:[%s8227_s7 + $0x130] sm:$0xff] }
 0x5e1   : > { %v3218_v20 = vpop.f32.mrf.mxu2  ;;  %3395 = vmatpush.msrb.mxu1 %v3358_v12  ;;  %v4143_v12 = vld [vmem:[%s8227_s7 + $0xb8] sm:$0xff] }
 0x5e2   : > { %v3219_v15 = vadd.f32 %v3218_v20, %v3188_v33 }
 0x5e3   : > { %3396 = vmatpush.msrb.mxu1 %v3357_v10  ;;  %v4161_v10 = vld [vmem:[%s8227_s7 + $0x128] sm:$0xff] }
 0x5e6   : > { %4117 = vmatmul.msk.f32.gmra.mxu0 %vm2989_vm15, %v3132_v59  ;;  %v3356_v59 = vld [vmem:[%s8226_s6 + $0x38] sm:$0xff] }
 0x5e7   : > { %3397 = vmatpush.msrb.mxu1 %v3356_v59  ;;  %v4142_v59 = vld [vmem:[%s8227_s7 + $0xb0] sm:$0xff] }
 0x5e9   : > { %v3221_v24 = vpop.f32.mrf.mxu2  ;;  %3398 = vmatpush.msrb.mxu1 %v3355_v63  ;;  %v4160_v63 = vld [vmem:[%s8227_s7 + $0x120] sm:$0xff] }
 0x5ea   : > { %v3222_v48 = vadd.f32 %v3221_v24, %v3193_v47 }
 0x5eb   : > { %3399 = vmatpush.msrb.mxu1 %v3354_v45  ;;  %v4150_v45 = vld [vmem:[%s8227_s7 + $0xe0] sm:$0xff] }
 0x5ed   : > { %3400 = vmatpush.msrb.mxu1 %v3353_v8  ;;  %v4192_v8 = vld [vmem:[%s8227_s7 + $0x1f0] sm:$0x1] }
 0x5ef   : > { %3401 = vmatpush.msrb.mxu1 %v3352_v17  ;;  %v4201_v17 = vld [vmem:[%s8227_s7 + $0x228] sm:$0x1] }
 0x5f1   : > { %3402 = vmatpush.msrb.mxu1 %v3351_v37  ;;  %v4190_v37 = vld [vmem:[%s8227_s7 + $0x1e0] sm:$0xff] }
 0x5f3   : > { %3403 = vmatpush.msrb.mxu1 %v3350_v50  ;;  %v4187_v50 = vld [vmem:[%s8227_s7 + $0x1c8] sm:$0xff] }
 0x5f5   : > { %3404 = vmatpush.msrb.mxu1 %v3349_v19  ;;  %v4186_v19 = vld [vmem:[%s8227_s7 + $0x1c0] sm:$0xff] }
 0x628   : > { %v3241_v35 = vpop.f32.mrf.mxu2 }
 0x629   : > { %v3242_v32 = vadd.f32 %v3241_v35, %v3219_v15  ;;  %v3442_v35 = vld [vmem:[%s8227_s7 + $0x30] sm:$0x1] }
 0x62a   : > { %4121 = vmatpush.msk.msra.mxu3 %vm3447_vm6, %v3442_v35  ;;  %v4174_v35 = vld [vmem:[%s8227_s7 + $0x180] sm:$0x1] }
 0x62b   : > { %v3293_v4 = vmax.f32 %v3242_v32, 0.0  ;;  %v3264_v44 = vpop.f32.mrf.mxu3  ;;  %v3441_v32 = vld [vmem:[%s8227_s7 + $0x28] sm:$0xff] }
 0x62c   : > { %v3265_v0 = vadd.f32 %v3264_v44, %v3188_v33  ;;  %3461 = vmatpush.msra.mxu3 %v3441_v32  ;;  %v3439_v44 = vld [vmem:[%s8227_s7 + $0x18] sm:$0xff] }
 0x62d   : > { %3309 = vrot.lane.b32.xlu0 %v3293_v4, %s8593_s24 }
 0x630   : > { %v3244_v36 = vpop.f32.mrf.mxu2 }
 0x631   : > { %v7631_v5 = vadd.f32 %v3244_v36, %v3222_v48  ;;  %v3440_v48 = vld [vmem:[%s8227_s7 + $0x20] sm:$0xff]  ;;  %v4127_v36 = vld [vmem:[%s8227_s7 + $0x58] sm:$0xff] }
 0x632   : > { %3462 = vmatpush.msra.mxu3 %v3440_v48  ;;  %v4173_v48 = vld [vmem:[%s8227_s7 + $0x178] sm:$0xff] }
 0x633   : > { %v3295_v3 = vmax.f32 %v7631_v5, 0.0  ;;  %v3267_v49 = vpop.f32.mrf.mxu3 }
 0x634   : > { %v3268_v51 = vadd.f32 %v3267_v49, %v3193_v47  ;;  %v4129_v47 = vld [vmem:[%s8227_s7 + $0x68] sm:$0x1]  ;;  %3463 = vmatpush.msra.mxu3 %v3439_v44 }
 0x635   : > { %4130 = vmatpush.msk.msrb.mxu0 %vm3447_vm6, %v4129_v47  ;;  %v4125_v49 = vld [vmem:[%s8227_s7 + $0x48] sm:$0xff] }
 0x636   : > { %v4237_v44 = vld [vmem:[%s8227_s7 + $0x308] sm:$0x1] }
 0x65b   : > { %v3287_v38 = vpop.f32.mrf.mxu0 }
 0x65c   : > { %v3288_v42 = vadd.f32 %v3287_v38, %v3265_v0  ;;  %v4126_v0 = vld [vmem:[%s8227_s7 + $0x50] sm:$0xff] }
 0x65d   : > { %v4156_v38 = vld [vmem:[%s8227_s7 + $0x110] sm:$0x1] }
 0x65e   : > { %v3294_v55 = vmax.f32 %v3288_v42, 0.0  ;;  %v3438_v42 = vld [vmem:[%s8227_s7 + $0x10] sm:$0xff]  ;;  %4157 = vmatpush.msk.msra.mxu1 %vm3447_vm6, %v4156_v38  ;;  %v4227_v38 = vld [vmem:[%s8227_s7 + $0x2c8] sm:$0xff] }
 0x65f   : > { %3464 = vmatpush.msra.mxu3 %v3438_v42  ;;  %v4171_v42 = vld [vmem:[%s8227_s7 + $0x168] sm:$0xff] }
 0x660   : > { %3298 = vst.msk [vmem:[#allocation5 + $0x8] sm:$0xff] %vm645_vm3, %v3294_v55  ;;  %v4165_v55 = vld [vmem:[%s8227_s7 + $0x148] sm:$0x1] }
 0x663   : > { %v3290_v41 = vpop.f32.mrf.mxu0 }
 0x664   : > { %v3291_v23 = vadd.f32 %v3290_v41, %v3268_v51  ;;  %v4155_v51 = vld [vmem:[%s8227_s7 + $0x108] sm:$0xff]  ;;  %v4164_v41 = vld [vmem:[%s8227_s7 + $0x140] sm:$0xff] }
 0x665   : > { %3601 = vmatpush.msra.mxu1 %v4155_v51 }
 0x666   : > { %v3296_v14 = vmax.f32 %v3291_v23, 0.0  ;;  %v3437_v23 = vld [vmem:[%s8227_s7 + $0x8] sm:$0xff] }
 0x667   : > { %v3302_v16 = vld [vmem:[#allocation5 + $0x8] sm:$0xff]  ;;  %3465 = vmatpush.msra.mxu3 %v3437_v23  ;;  %v4226_v23 = vld [vmem:[%s8227_s7 + $0x2c0] sm:$0xff] }
 0x668   : > { %3300 = vst.msk [vmem:[#allocation5 + $0x18] sm:$0xff] %vm645_vm3, %v3296_v14  ;;  %3311 = vrot.lane.b32.xlu2 %v3302_v16, %s8593_s24  ;;  %vm3385_vm3 = vcmask 1044480   ;;  %v4124_v14 = vld [vmem:[%s8227_s7 + $0x40] sm:$0xff] }
 0x669   : > { %4118 = vmatpush.msk.msrb.mxu2 %vm3385_vm3, %v3377_v1 }
 0x66b   : > { %3416 = vmatpush.msrb.mxu2 %v3376_v26  ;;  %v4135_v26 = vld [vmem:[%s8227_s7 + $0x88] sm:$0xff] }
 0x66d   : > { %3417 = vmatpush.msrb.mxu2 %v3375_v46  ;;  %v4154_v46 = vld [vmem:[%s8227_s7 + $0x100] sm:$0xff] }
 0x66e   : > { %3602 = vmatpush.msra.mxu1 %v4154_v46  ;;  %v4209_v46 = vld [vmem:[%s8227_s7 + $0x258] sm:$0xff] }
 0x66f   : > { %v7637_v9 = vld [vmem:[#allocation5 + $0x18] sm:$0xff]  ;;  %3418 = vmatpush.msrb.mxu2 %v3374_v7 }
 0x670   : > { %3315 = vrot.lane.b32.xlu1 %v7637_v9, %s8593_s24  ;;  %3313 = vrot.lane.b32.xlu2 %v3295_v3, %s8593_s24  ;;  %v4134_v7 = vld [vmem:[%s8227_s7 + $0x80] sm:$0xff]  ;;  %s4049_s24 = sshll.u32 %s4045_s1, 4  ;;  %s4050_s24 = int_to_ptr.hbm [resolvable:$true] %s4049_s24 }
 0x671   : > { %3419 = vmatpush.msrb.mxu2 %v3373_v18  ;;  %v4153_v18 = vld [vmem:[%s8227_s7 + $0xf8] sm:$0xff]  ;;  %s4429_s29 = sshra.s32 %s4050_s24, 4  ;;  %s4430_s29 = int_to_ptr.hbm [resolvable:$true] %s4429_s29 }
 0x672   : > { %3603 = vmatpush.msra.mxu1 %v4153_v18  ;;  %v4223_v18 = vld [vmem:[%s8227_s7 + $0x2a8] sm:$0xff]  ;;  %s4431_s2 = scalar_lea.hbm %s4430_s29, 1  ;;  %p4436_p0 = scmp.lt.s32.totalorder %s4430_s29, %s8231_s11 }
 0x673   : > { %3420 = vmatpush.msrb.mxu2 %v3372_v28  ;;  %v4133_v28 = vld [vmem:[%s8227_s7 + $0x78] sm:$0xff]  ;;  %p4432_p11 = scmp.ne.s32.totalorder %s4430_s29, %s4431_s2  ;;  %p4437_p1 = scmp.lt.s32.totalorder %s4435_s30, %s4431_s2 }
 0x675   : > { %3421 = vmatpush.msrb.mxu2 %v3371_v39  ;;  %v4152_v39 = vld [vmem:[%s8227_s7 + $0xf0] sm:$0xff]  ;;  %p4433_p12 = pnand %p4432_p11, %p4640_p5  ;;  %p4438_p2 = por %p4437_p1, %p4436_p0 }
 0x676   : > { %3604 = vmatpush.msra.mxu1 %v4152_v39 }
 0x677   : > { %3422 = vmatpush.msrb.mxu2 %v3370_v60  ;;  %v4132_v60 = vld [vmem:[%s8227_s7 + $0x70] sm:$0xff]  ;;  %p4434_p13 = pneg %p4433_p12 }
 0x679   : > { %3423 = vmatpush.msrb.mxu2 %v3369_v13  ;;  %v4151_v13 = vld [vmem:[%s8227_s7 + $0xe8] sm:$0xff]  ;;  %p4439_p3 = pnand %p4438_p2, %p4434_p13 }
 0x67a   : > { %3605 = vmatpush.msra.mxu1 %v4151_v13  ;;  %v4231_v13 = vld [vmem:[%s8227_s7 + $0x2d8] sm:$0xff] }
 0x67b   : > { %3424 = vmatpush.msrb.mxu2 %v3368_v40  ;;  %v4141_v40 = vld [vmem:[%s8227_s7 + $0xa8] sm:$0xff] }
 0x67c   : > { %3606 = vmatpush.msra.mxu1 %v4150_v45  ;;  %v4215_v45 = vld [vmem:[%s8227_s7 + $0x278] sm:$0xff] }
 0x67d   : > { %3425 = vmatpush.msrb.mxu2 %v3367_v43  ;;  %v4159_v43 = vld [vmem:[%s8227_s7 + $0x118] sm:$0xff] }
 0x67f   : > { %3426 = vmatpush.msrb.mxu2 %v3366_v58  ;;  %v4191_v58 = vld [vmem:[%s8227_s7 + $0x1e8] sm:$0xff] }
 0x681   : > { %3427 = vmatpush.msrb.mxu2 %v3365_v25  ;;  %v4197_v25 = vld [vmem:[%s8227_s7 + $0x208] sm:$0xff] }
 0x683   : > { %4166 = vmatpush.msk.msra.mxu2 %vm3447_vm6, %v4165_v55  ;;  %v4181_v55 = vld [vmem:[%s8227_s7 + $0x1a8] sm:$0xff] }
 0x685   : > { %3636 = vmatpush.msra.mxu2 %v4164_v41  ;;  %v4170_v41 = vld [vmem:[%s8227_s7 + $0x160] sm:$0xff] }
 0x687   : > { %3637 = vmatpush.msra.mxu2 %v4163_v61  ;;  %v4219_v61 = vld [vmem:[%s8227_s7 + $0x298] sm:$0x1] }
 0x689   : > { %3638 = vmatpush.msra.mxu2 %v4162_v22  ;;  %v4218_v22 = vld [vmem:[%s8227_s7 + $0x290] sm:$0xff] }
 0x68b   : > { %3639 = vmatpush.msra.mxu2 %v4161_v10  ;;  %v4217_v10 = vld [vmem:[%s8227_s7 + $0x288] sm:$0xff] }
 0x68d   : > { %3640 = vmatpush.msra.mxu2 %v4160_v63  ;;  %v4216_v63 = vld [vmem:[%s8227_s7 + $0x280] sm:$0xff] }
 0x68f   : > { %3641 = vmatpush.msra.mxu2 %v4159_v43  ;;  %v4204_v43 = vld [vmem:[%s8227_s7 + $0x230] sm:$0xff] }
 0x69f   : > { %v3310_v52 = vpop.permute.xlu0 %3309 }
 0x6c2   : > { %v3312_v30 = vpop.permute.xlu2 %3311 }
 0x6c3   : > { %v3317_v34 = vsel %vm471_vm0, %v3310_v52, %v3312_v30  ;;  %v7645_v62 = vmax.f32 %v3302_v16, %v3312_v30  ;;  %v3436_v16 = vld [vmem:[%s8227_s7] sm:$0xff]  ;;  %v4147_v30 = vld [vmem:[%s8227_s7 + $0xd8] sm:$0x1] }
 0x6c4   : > { %v7647_v11 = vmax.f32 %v3293_v4, %v3317_v34  ;;  %v4128_v4 = vld [vmem:[%s8227_s7 + $0x60] sm:$0xff]  ;;  %3466 = vmatpush.msra.mxu3 %v3436_v16  ;;  %v4137_v34 = vld [vmem:[%s8227_s7 + $0x98] sm:$0xff] }
 0x6c5   : > { %3333 = vrot.lane.b32.xlu0 %v7645_v62, %s4532_s22  ;;  %3496 = vmatpush.msrb.mxu0 %v4128_v4  ;;  %v4138_v52 = vld [vmem:[%s8227_s7 + $0xa0] sm:$0x1]  ;;  %v4235_v16 = vld [vmem:[%s8227_s7 + $0x2f8] sm:$0xff] }
 0x6c6   : > { %3331 = vrot.lane.b32.xlu1 %v7647_v11, %s4532_s22  ;;  %4139 = vmatpush.msk.msrb.mxu3 %vm3447_vm6, %v4138_v52 }
 0x6c7   : > { %3497 = vmatpush.msrb.mxu0 %v4127_v36  ;;  %v4183_v36 = vld [vmem:[%s8227_s7 + $0x1b8] sm:$0x1] }
 0x6c8   : > { %3531 = vmatpush.msrb.mxu3 %v4137_v34  ;;  %v4225_v34 = vld [vmem:[%s8227_s7 + $0x2b8] sm:$0xff] }
 0x6c9   : > { %3498 = vmatpush.msrb.mxu0 %v4126_v0  ;;  %v4182_v0 = vld [vmem:[%s8227_s7 + $0x1b0] sm:$0xff] }
 0x6ca   : > { %v3314_v6 = vpop.permute.xlu2 %3313 }
 0x6cb   : > { %3499 = vmatpush.msrb.mxu0 %v4125_v49  ;;  %v4236_v49 = vld [vmem:[%s8227_s7 + $0x300] sm:$0xff] }
 0x6cd   : > { %3500 = vmatpush.msrb.mxu0 %v4124_v14  ;;  %v4180_v14 = vld [vmem:[%s8227_s7 + $0x1a0] sm:$0xff] }
 0x6e2   : > { %v3316_v27 = vpop.permute.xlu1 %3315 }
 0x6e3   : > { %v3318_v53 = vsel %vm471_vm0, %v3314_v6, %v3316_v27  ;;  %v3326_v29 = vmax.f32 %v7637_v9, %v3316_v27  ;;  %vm3378_vm0 = vcmask 826368   ;;  %v4123_v9 = vld [vmem:[%s8227_s7 + $0x38] sm:$0xff]  ;;  %v4200_v6 = vld [vmem:[%s8227_s7 + $0x220] sm:$0xff] }
 0x6e4   : > { %v7735_v56 = vmax.f32 %v3295_v3, %v3318_v53  ;;  %3501 = vmatpush.msrb.mxu0 %v4123_v9  ;;  %v4189_v27 = vld [vmem:[%s8227_s7 + $0x1d8] sm:$0xff] }
 0x6e5   : > { %3337 = vrot.lane.b32.xlu2 %v3326_v29, %s4532_s22  ;;  %v4199_v53 = vld [vmem:[%s8227_s7 + $0x218] sm:$0xff] }
 0x6e6   : > { %3335 = vrot.lane.b32.xlu0 %v7735_v56, %s4532_s22  ;;  %4148 = vmatpush.msk.msra.mxu0 %vm3447_vm6, %v4147_v30  ;;  %v4169_v9 = vld [vmem:[%s8227_s7 + $0x158] sm:$0xff] }
 0x6e7   : > { %v4179_v30 = vld [vmem:[%s8227_s7 + $0x198] sm:$0xff] }
 0x737   : > { %v3334_v31 = vpop.permute.xlu0 %3333 }
 0x738   : > { %v3346_v20 = vmax.f32 %v7645_v62, %v3334_v31  ;;  %v3332_v24 = vpop.permute.xlu1 %3331  ;;  %v4146_v62 = vld [vmem:[%s8227_s7 + $0xd0] sm:$0xff] }
 0x739   : > { %v3339_v33 = vsel %vm2762_vm10, %v3332_v24, %v3334_v31  ;;  %3566 = vmatpush.msra.mxu0 %v4146_v62  ;;  %v4196_v31 = vld [vmem:[%s8227_s7 + $0x200] sm:$0xff]  ;;  %v4168_v62 = vld [vmem:[%s8227_s7 + $0x150] sm:$0xff] }
 0x73a   : > { %v3345_v15 = vmax.f32 %v7647_v11, %v3339_v33  ;;  %4119 = vmatmul.msk.f32.vlgmr.msrb.gmra.mxu2 %vm3378_vm0, %v3346_v20  ;;  %v4136_v11 = vld [vmem:[%s8227_s7 + $0x90] sm:$0xff]  ;;  %v4195_v20 = vld [vmem:[%s8227_s7 + $0x1f8] sm:$0xff] }
 0x73b   : > { %3532 = vmatpush.msrb.mxu3 %v4136_v11  ;;  %3567 = vmatpush.msra.mxu0 %v4145_v54  ;;  %v4234_v11 = vld [vmem:[%s8227_s7 + $0x2f0] sm:$0xff]  ;;  %v4177_v54 = vld [vmem:[%s8227_s7 + $0x188] sm:$0xff] }
 0x73c   : > { %3405 = vmatmul.f32.vlgmr.msrb.gmra.mxu1 %v3345_v15  ;;  %4202 = vmatpush.msk.msrb.mxu2 %vm3447_vm6, %v4201_v17 }
 0x73d   : > { %3533 = vmatpush.msrb.mxu3 %v4135_v26  ;;  %3568 = vmatpush.msra.mxu0 %v4144_v2  ;;  %v4233_v26 = vld [vmem:[%s8227_s7 + $0x2e8] sm:$0xff]  ;;  %v4208_v2 = vld [vmem:[%s8227_s7 + $0x250] sm:$0xff] }
 0x73e   : > { %4193 = vmatpush.msk.msrb.mxu1 %vm3447_vm6, %v4192_v8  ;;  %3776 = vmatpush.msrb.mxu2 %v4200_v6  ;;  %v4214_v8 = vld [vmem:[%s8227_s7 + $0x270] sm:$0xff] }
 0x73f   : > { %v3338_v5 = vpop.permute.xlu2 %3337  ;;  %3534 = vmatpush.msrb.mxu3 %v4134_v7  ;;  %3569 = vmatpush.msra.mxu0 %v4143_v12  ;;  %v4207_v12 = vld [vmem:[%s8227_s7 + $0x248] sm:$0xff] }
 0x740   : > { %v3348_v3 = vmax.f32 %v3326_v29, %v3338_v5  ;;  %3741 = vmatpush.msrb.mxu1 %v4191_v58  ;;  %3777 = vmatpush.msrb.mxu2 %v4199_v53  ;;  %v4188_v29 = vld [vmem:[%s8227_s7 + $0x1d0] sm:$0xff]  ;;  %v4246_v58 = vld [vmem:[%s8227_s7 + $0x340] sm:$0x1]  ;;  %v4245_v53 = vld [vmem:[%s8227_s7 + $0x338] sm:$0xff] }
 0x741   : > { %3535 = vmatpush.msrb.mxu3 %v4133_v28  ;;  %3570 = vmatpush.msra.mxu0 %v4142_v59  ;;  %v4232_v28 = vld [vmem:[%s8227_s7 + $0x2e0] sm:$0xff] }
 0x742   : > { %4120 = vmatmul.msk.f32.gmra.mxu2 %vm3378_vm0, %v3348_v3  ;;  %3742 = vmatpush.msrb.mxu1 %v4190_v37  ;;  %v4172_v3 = vld [vmem:[%s8227_s7 + $0x170] sm:$0xff]  ;;  %v4206_v59 = vld [vmem:[%s8227_s7 + $0x240] sm:$0xff] }
 0x743   : > { %3536 = vmatpush.msrb.mxu3 %v4132_v60  ;;  %3571 = vmatpush.msra.mxu0 %v4141_v40  ;;  %v4222_v60 = vld [vmem:[%s8227_s7 + $0x2a0] sm:$0xff]  ;;  %v4205_v40 = vld [vmem:[%s8227_s7 + $0x238] sm:$0xff] }
 0x744   : > { %3743 = vmatpush.msrb.mxu1 %v4189_v27  ;;  %v4213_v27 = vld [vmem:[%s8227_s7 + $0x268] sm:$0xff] }
 0x746   : > { %3744 = vmatpush.msrb.mxu1 %v4188_v29  ;;  %v4255_v29 = vld [vmem:[%s8227_s7 + $0x378] sm:$0x1] }
 0x748   : > { %3745 = vmatpush.msrb.mxu1 %v4187_v50 }
 0x74a   : > { %3746 = vmatpush.msrb.mxu1 %v4186_v19  ;;  %v4244_v19 = vld [vmem:[%s8227_s7 + $0x330] sm:$0xff] }
 0x758   : > { %v3336_v57 = vpop.permute.xlu0 %3335 }
 0x759   : > { %v3340_v21 = vsel %vm2762_vm10, %v3336_v57, %v3338_v5  ;;  %v4228_v5 = vld [vmem:[%s8227_s7 + $0x2d0] sm:$0x1] }
 0x75a   : > { %v3347_v1 = vmax.f32 %v7735_v56, %v3340_v21  ;;  %v4198_v56 = vld [vmem:[%s8227_s7 + $0x210] sm:$0xff]  ;;  %v4210_v21 = vld [vmem:[%s8227_s7 + $0x260] sm:$0x1] }
 0x75b   : > { %3778 = vmatpush.msrb.mxu2 %v4198_v56  ;;  %v4178_v57 = vld [vmem:[%s8227_s7 + $0x190] sm:$0xff] }
 0x75c   : > { %3408 = vmatmul.f32.gmra.mxu1 %v3347_v1  ;;  %v4224_v1 = vld [vmem:[%s8227_s7 + $0x2b0] sm:$0xff] }
 0x75d   : > { %3779 = vmatpush.msrb.mxu2 %v4197_v25 }
 0x75f   : > { %3780 = vmatpush.msrb.mxu2 %v4196_v31  ;;  %v4254_v31 = vld [vmem:[%s8227_s7 + $0x370] sm:$0xff] }
 0x761   : > { %3781 = vmatpush.msrb.mxu2 %v4195_v20  ;;  %v4243_v20 = vld [vmem:[%s8227_s7 + $0x328] sm:$0xff] }
 0x7b9   : > { %v3406_v24 = vpop.f32.mrf.mxu1 }
 0x7bd   : > { %v3429_v33 = vpop.f32.mrf.mxu2 }
 0x7be   : > { %v7932_v15 = vadd.f32 %v3429_v33, %v3406_v24  ;;  %v4253_v24 = vld [vmem:[%s8227_s7 + $0x368] sm:$0xff]  ;;  %v4242_v33 = vld [vmem:[%s8227_s7 + $0x320] sm:$0xff] }
 0x7c0   : > { %4122 = vmatmul.msk.f32.vlgmr.msra.gmra.mxu3 %vm3443_vm8, %v7932_v15  ;;  %v3480_v32 = vrot.slane %v7932_v15, 1  ;;  %v3585_v47 = vrot.slane %v7932_v15, 4  ;;  %v3620_v4 = vrot.slane %v7932_v15, 5  ;;  %v3515_v51 = vrot.slane %v7932_v15, 2 }
 0x7c1   : > { %4175 = vmatpush.msk.msra.mxu3 %vm3447_vm6, %v4174_v35  ;;  %v3550_v52 = vrot.slane %v7932_v15, 3  ;;  %v3655_v7 = vrot.slane %v7932_v15, 6  ;;  %v3690_v39 = vrot.slane %v7932_v15, 7  ;;  %v4252_v15 = vld [vmem:[%s8227_s7 + $0x360] sm:$0xff] }
 0x7c2   : > { %4131 = vmatmul.msk.f32.vlgmr.msrb.gmra.mxu0 %vm3443_vm8, %v3480_v32  ;;  %4158 = vmatmul.msk.f32.vlgmr.msra.gmra.mxu1 %vm3443_vm8, %v3585_v47  ;;  %v4241_v32 = vld [vmem:[%s8227_s7 + $0x318] sm:$0xff] }
 0x7c3   : > { %4167 = vmatmul.msk.f32.vlgmr.msra.gmra.mxu2 %vm3443_vm8, %v3620_v4  ;;  %3671 = vmatpush.msra.mxu3 %v4173_v48  ;;  %v4251_v47 = vld [vmem:[%s8227_s7 + $0x358] sm:$0xff]  ;;  %v4240_v48 = vld [vmem:[%s8227_s7 + $0x310] sm:$0xff] }
 0x7c4   : > { %4184 = vmatpush.msk.msrb.mxu0 %vm3447_vm6, %v4183_v36  ;;  %4229 = vmatpush.msk.msra.mxu1 %vm3447_vm6, %v4228_v5  ;;  %v4250_v36 = vld [vmem:[%s8227_s7 + $0x350] sm:$0xff] }
 0x7c5   : > { %3672 = vmatpush.msra.mxu3 %v4172_v3  ;;  %4238 = vmatpush.msk.msra.mxu2 %vm3447_vm6, %v4237_v44  ;;  %v3432_v17 = vpop.f32.mrf.mxu2  ;;  %v4249_v3 = vld [vmem:[%s8227_s7 + $0x348] sm:$0xff] }
 0x7c6   : > { %3706 = vmatpush.msrb.mxu0 %v4182_v0  ;;  %3881 = vmatpush.msra.mxu1 %v4227_v38  ;;  %v4013_v0 = vld [vmem:[%s8229_s9 + $0x78] sm:$0xff]  ;;  %v4012_v38 = vld [vmem:[%s8229_s9 + $0x70] sm:$0xff] }
 0x7c7   : > { %3673 = vmatpush.msra.mxu3 %v4171_v42  ;;  %3916 = vmatpush.msra.mxu2 %v4236_v49  ;;  %v4011_v42 = vld [vmem:[%s8229_s9 + $0x68] sm:$0xff]  ;;  %v4010_v49 = vld [vmem:[%s8229_s9 + $0x60] sm:$0xff] }
 0x7c8   : > { %3707 = vmatpush.msrb.mxu0 %v4181_v55  ;;  %4140 = vmatmul.msk.f32.vlgmr.msrb.gmra.mxu3 %vm3443_vm8, %v3515_v51  ;;  %v4009_v55 = vld [vmem:[%s8229_s9 + $0x58] sm:$0xff]  ;;  %v4008_v51 = vld [vmem:[%s8229_s9 + $0x50] sm:$0xff] }
 0x7c9   : > { %3674 = vmatpush.msra.mxu3 %v4170_v41  ;;  %3882 = vmatpush.msra.mxu1 %v4226_v23  ;;  %v4007_v41 = vld [vmem:[%s8229_s9 + $0x48] sm:$0xff]  ;;  %v4006_v23 = vld [vmem:[%s8229_s9 + $0x40] sm:$0xff] }
 0x7ca   : > { %3708 = vmatpush.msrb.mxu0 %v4180_v14  ;;  %3917 = vmatpush.msra.mxu2 %v4235_v16  ;;  %v3435_v16 = vld [vmem:[%s8228_s8] sm:$0x1] }
 0x7cb   : > { %4149 = vmatmul.msk.f32.vlgmr.msra.gmra.mxu0 %vm3443_vm8, %v3550_v52  ;;  %3675 = vmatpush.msra.mxu3 %v4169_v9  ;;  %v4005_v52 = vld [vmem:[%s8229_s9 + $0x38] sm:$0xff] }
 0x7cc   : > { %3709 = vmatpush.msrb.mxu0 %v4179_v30  ;;  %3883 = vmatpush.msra.mxu1 %v4225_v34  ;;  %v4004_v34 = vld [vmem:[%s8229_s9 + $0x30] sm:$0xff] }
 0x7cd   : > { %3676 = vmatpush.msra.mxu3 %v4168_v62  ;;  %3918 = vmatpush.msra.mxu2 %v4234_v11  ;;  %v4003_v62 = vld [vmem:[%s8229_s9 + $0x28] sm:$0xff] }
 0x7ce   : > { %3710 = vmatpush.msrb.mxu0 %v4178_v57  ;;  %3884 = vmatpush.msra.mxu1 %v4224_v1  ;;  %v4002_v57 = vld [vmem:[%s8229_s9 + $0x20] sm:$0xff] }
 0x7cf   : > { %4211 = vmatpush.msk.msrb.mxu3 %vm3447_vm6, %v4210_v21  ;;  %3919 = vmatpush.msra.mxu2 %v4233_v26  ;;  %v4001_v26 = vld [vmem:[%s8229_s9 + $0x18] sm:$0xff] }
 0x7d0   : > { %3711 = vmatpush.msrb.mxu0 %v4177_v54  ;;  %4176 = vmatmul.msk.f32.vlgmr.msra.gmra.mxu3 %vm3443_vm8, %v3655_v7  ;;  %v3999_v7 = vld [vmem:[%s8229_s9 + $0x8] sm:$0xff] }
 0x7d1   : > { %3811 = vmatpush.msrb.mxu3 %v4209_v46  ;;  %3885 = vmatpush.msra.mxu1 %v4223_v18  ;;  %v3998_v18 = vld [vmem:[%s8229_s9] sm:$0xff] }
 0x7d2   : > { %4220 = vmatpush.msk.msra.mxu0 %vm3447_vm6, %v4219_v61  ;;  %3920 = vmatpush.msra.mxu2 %v4232_v28  ;;  %v4000_v61 = vld [vmem:[%s8229_s9 + $0x10] sm:$0xff] }
 0x7d3   : > { %3812 = vmatpush.msrb.mxu3 %v4208_v2  ;;  %4185 = vmatmul.msk.f32.vlgmr.msrb.gmra.mxu0 %vm3443_vm8, %v3690_v39 }
 0x7d4   : > { %3846 = vmatpush.msra.mxu0 %v4218_v22  ;;  %3886 = vmatpush.msra.mxu1 %v4222_v60 }
 0x7d5   : > { %3813 = vmatpush.msrb.mxu3 %v4207_v12  ;;  %3921 = vmatpush.msra.mxu2 %v4231_v13 }
 0x7d6   : > { %3847 = vmatpush.msra.mxu0 %v4217_v10 }
 0x7d7   : > { %3814 = vmatpush.msrb.mxu3 %v4206_v59 }
 0x7d8   : > { %3848 = vmatpush.msra.mxu0 %v4216_v63 }
 0x7d9   : > { %3815 = vmatpush.msrb.mxu3 %v4205_v40  ;;  %v3409_v37 = vpop.f32.mrf.mxu1 }
 0x7da   : > { %3849 = vmatpush.msra.mxu0 %v4215_v45  ;;  %v3433_v6 = vadd.f32 %v3432_v17, %v3409_v37 }
 0x7db   : > { %3816 = vmatpush.msrb.mxu3 %v4204_v43 }
 0x7dc   : > { %3850 = vmatpush.msra.mxu0 %v4214_v8  ;;  %4194 = vmatmul.msk.f32.vlgmr.msrb.gmra.mxu1 %vm3443_vm8, %v3433_v6  ;;  %v3760_v56 = vrot.slane %v3433_v6, 1  ;;  %v3795_v50 = vrot.slane %v3433_v6, 2  ;;  %v3830_v25 = vrot.slane %v3433_v6, 3  ;;  %v3865_v35 = vrot.slane %v3433_v6, 4 }
 0x7dd   : > { %4247 = vmatpush.msk.msra.mxu3 %vm3447_vm6, %v4246_v58  ;;  %v3900_v4 = vrot.slane %v3433_v6, 5  ;;  %v3935_v5 = vrot.slane %v3433_v6, 6  ;;  %v3970_v44 = vrot.slane %v3433_v6, 7  ;;  %4015 = vmatpush.msrb.mxu1 %v4013_v0 }
 0x7de   : > { %3851 = vmatpush.msra.mxu0 %v4213_v27  ;;  %4203 = vmatmul.msk.f32.vlgmr.msrb.gmra.mxu2 %vm3443_vm8, %v3760_v56 }
 0x7df   : > { %3951 = vmatpush.msra.mxu3 %v4245_v53  ;;  %4221 = vmatmul.msk.f32.vlgmr.msra.gmra.mxu0 %vm3443_vm8, %v3830_v25 }
 0x7e0   : > { %4256 = vmatpush.msk.msrb.mxu0 %vm3447_vm6, %v4255_v29  ;;  %4212 = vmatmul.msk.f32.vlgmr.msrb.gmra.mxu3 %vm3443_vm8, %v3795_v50 }
 0x7e1   : > { %3952 = vmatpush.msra.mxu3 %v4244_v19  ;;  %4016 = vmatpush.msrb.mxu1 %v4012_v38 }
 0x7e2   : > { %3986 = vmatpush.msrb.mxu0 %v4254_v31  ;;  %v4014_v31 = vld [vmem:[%s8230_s10] sm:$0x1] }
 0x7e3   : > { %3953 = vmatpush.msra.mxu3 %v4243_v20  ;;  %4017 = vmatpush.msrb.mxu1 %v4011_v42 }
 0x7e4   : > { %3987 = vmatpush.msrb.mxu0 %v4253_v24  ;;  %4230 = vmatmul.msk.f32.vlgmr.msra.gmra.mxu1 %vm3443_vm8, %v3865_v35 }
 0x7e5   : > { %3954 = vmatpush.msra.mxu3 %v4242_v33  ;;  %4018 = vmatpush.msrb.mxu1 %v4010_v49 }
 0x7e6   : > { %3988 = vmatpush.msrb.mxu0 %v4252_v15  ;;  %4239 = vmatmul.msk.f32.vlgmr.msra.gmra.mxu2 %vm3443_vm8, %v3900_v4 }
 0x7e7   : > { %3955 = vmatpush.msra.mxu3 %v4241_v32  ;;  %4019 = vmatpush.msrb.mxu1 %v4009_v55 }
 0x7e8   : > { %3989 = vmatpush.msrb.mxu0 %v4251_v47 }
 0x7e9   : > { %3956 = vmatpush.msra.mxu3 %v4240_v48  ;;  %4020 = vmatpush.msrb.mxu1 %v4008_v51 }
 0x7ea   : > { %3990 = vmatpush.msrb.mxu0 %v4250_v36  ;;  %4248 = vmatmul.msk.f32.vlgmr.msra.gmra.mxu3 %vm3443_vm8, %v3935_v5 }
 0x7eb   : > { %4021 = vmatpush.msrb.mxu1 %v4007_v41 }
 0x7ec   : > { %3991 = vmatpush.msrb.mxu0 %v4249_v3 }
 0x7ed   : > { %4257 = vmatmul.msk.f32.vlgmr.msrb.gmra.mxu0 %vm3443_vm8, %v3970_v44  ;;  %4022 = vmatpush.msrb.mxu1 %v4006_v23 }
 0x7ef   : > { %4023 = vmatpush.msrb.mxu1 %v4005_v52 }
 0x7f1   : > { %4024 = vmatpush.msrb.mxu1 %v4004_v34 }
 0x7f3   : > { %4025 = vmatpush.msrb.mxu1 %v4003_v62 }
 0x7f5   : > { %4026 = vmatpush.msrb.mxu1 %v4002_v57 }
 0x7f7   : > { %4027 = vmatpush.msrb.mxu1 %v4001_v26 }
 0x7f9   : > { %4028 = vmatpush.msrb.mxu1 %v4000_v61 }
 0x7fb   : > { %4029 = vmatpush.msrb.mxu1 %v3999_v7 }
 0x7fd   : > { %4030 = vmatpush.msrb.mxu1 %v3998_v18 }
 0x83f   : > { %v3503_v14 = vpop.f32.mrf.mxu0  ;;  %v3608_v2 = vpop.f32.mrf.mxu1 }
 0x843   : > { %v3468_v9 = vpop.f32.mrf.mxu3 }
 0x844   : > { %v3471_v30 = vadd.f32 %v3468_v9, %v3435_v16 }
 0x846   : > { %v3506_v11 = vadd.f32 %v3503_v14, %v3471_v30  ;;  %v3643_v28 = vpop.f32.mrf.mxu2 }
 0x848   : > { %v3573_v54 = vpop.f32.mrf.mxu0 }
 0x84b   : > { %v3538_v21 = vpop.f32.mrf.mxu3 }
 0x84c   : > { %v3541_v1 = vadd.f32 %v3538_v21, %v3506_v11 }
 0x84e   : > { %v3576_v46 = vadd.f32 %v3573_v54, %v3541_v1 }
 0x850   : > { %v3611_v22 = vadd.f32 %v3608_v2, %v3576_v46  ;;  %v3713_v60 = vpop.f32.mrf.mxu0 }
 0x852   : > { %v3646_v12 = vadd.f32 %v3643_v28, %v3611_v22 }
 0x853   : > { %v3678_v39 = vpop.f32.mrf.mxu3 }
 0x854   : > { %v3681_v10 = vadd.f32 %v3678_v39, %v3646_v12 }
 0x856   : > { %v3716_v13 = vadd.f32 %v3713_v60, %v3681_v10 }
 0x859   : > { %v3748_v59 = vpop.f32.mrf.mxu1 }
 0x85a   : > { %v3751_v63 = vadd.f32 %v3748_v59, %v3716_v13 }
 0x85c   : > { %v3853_v58 = vpop.f32.mrf.mxu0 }
 0x861   : > { %v3783_v40 = vpop.f32.mrf.mxu2  ;;  %v3888_v37 = vpop.f32.mrf.mxu1 }
 0x862   : > { %v3786_v45 = vadd.f32 %v3783_v40, %v3751_v63 }
 0x863   : > { %v3818_v43 = vpop.f32.mrf.mxu3 }
 0x864   : > { %v3821_v8 = vadd.f32 %v3818_v43, %v3786_v45 }
 0x866   : > { %v3856_v17 = vadd.f32 %v3853_v58, %v3821_v8 }
 0x868   : > { %v3891_v6 = vadd.f32 %v3888_v37, %v3856_v17 }
 0x869   : > { %v3923_v27 = vpop.f32.mrf.mxu2 }
 0x86a   : > { %v3926_v53 = vadd.f32 %v3923_v27, %v3891_v6  ;;  %v3993_v50 = vpop.f32.mrf.mxu0 }
 0x86d   : > { %v3958_v29 = vpop.f32.mrf.mxu3 }
 0x86e   : > { %v3961_v56 = vadd.f32 %v3958_v29, %v3926_v53 }
 0x870   : > { %v3996_v25 = vadd.f32 %v3993_v50, %v3961_v56 }
 0x872   : > { %v3997_v19 = vmax.f32 %v3996_v25, 0.0 }
 0x874   : > { %4031 = vmatmul.f32.vlgmr.msrb.gmra.mxu1 %v3997_v19 }
 0x8f1   : > { %v4032_v20 = vpop.f32.mrf.mxu1 }
 0x8f2   : > { %v4033_v24 = vadd.f32 %v4032_v20, %v4014_v31 }
 0x8f4   : > { %4035 = vst [vmem:[%s376_s14] sm:$0x1] %v4033_v24 }
 0x8f5   : > { %4442 = shalt.err (!%p4439_p3)
}
 0x8f6   : > { %4261 = dma.vmem_to_hbm [thread:$0]  (%p4640_p5), %s4048_s12, 16, %s4050_s24, %s4037_s15  }
 0x8f7 PF: > { %p4267_p4 = scmp.ge.s32.totalorder %s4477_s20, 2  ;;  %s4061_s0 = sand.u32 1, %s4465_s17  }
 0x8f8   : > { %s4062_s1 = scalar_lea.sflag [#allocation7], %s4061_s0 }
 0x8f9   : > { %p4264_p7 = pnand %p4267_p4, %p4644_p6 }
 0x8fb   : > { %p4265_p8 = pneg %p4264_p7 }
 0x8fd   : > { %4460 = dma.done.wait (%p4265_p8), %s4062_s1, 16  }
 0x8fe   : > { %4462 = vsyncadd (%p4265_p8), %s4062_s1, 4294967280  ;;  %p21_p9 = scmp.ge.s32.totalorder %s4627_s23, 4   ;;  %s8601_s17 = smov %s4469_s18 }
 0x8ff   : > { %s8602_s18 = smov %s4473_s19  ;;  %s8603_s19 = smov %s4638_s26 }
 0x900   : > { %s8604_s20 = smov %s4627_s23  ;;  %23 = sbr.rel (!%p21_p9) target bundleno = 7 (0x7), region = 114 }
 0x905   :  { %4067 = vsyncpa [#allocation7], 1 }
 0x906   :  { %4069 = vsyncpa [#allocation7 + $0x1], 1 }

</bundles_post_ra>
